<compile_context>
chip_gen: v6e
topology: v6e:2x2x1
jax: 0.10.0
libtpu: 0.0.40
codegen_flags: <defaults>
</compile_context>

<pallas_src>
import functools
import math

import jax
import jax.numpy as jnp
import numpy as np
from jax import lax
from jax.experimental import pallas as pl
from jax.experimental.pallas import tpu as pltpu

# Exact erf GELU matches torch.nn.GELU(); set True to trade parity for the
# cheaper tanh form on the EUP slot.
GELU_APPROXIMATE = False


def _gelu(x):
    if GELU_APPROXIMATE:
        return jax.nn.gelu(x, approximate=True)
    return 0.5 * x * (1.0 + lax.erf(x * (1.0 / math.sqrt(2.0))))


def _round_up(x, m):
    return (x + m - 1) // m * m


# ---------------------------------------------------------------------------
# Device / feature probing
# ---------------------------------------------------------------------------
@functools.lru_cache(maxsize=None)
def _device_info():
    cap = None
    try:
        info = pltpu.get_tpu_info()
        cap = int(getattr(info, "vmem_capacity_bytes", 0)) or None
    except Exception:
        cap = None
    if cap is None:
        cap = 64 * 1024 * 1024          # v7x lower bound -> safe everywhere
    kind = ""
    try:
        kind = jax.devices()[0].device_kind.lower()
    except Exception:
        pass
    return cap, kind


@functools.lru_cache(maxsize=None)
def _buffered_supported():
    """Probe whether pl.BlockSpec(pipeline_mode=pl.Buffered(n)) lowers here."""
    try:
        def k(x_ref, w_ref, o_ref):
            o_ref[...] = x_ref[...] + w_ref[...]

        x = jnp.arange(32 * 128, dtype=jnp.float32).reshape(32, 128)
        wgt = jnp.ones((8, 128), jnp.float32)
        out = pl.pallas_call(
            k,
            out_shape=jax.ShapeDtypeStruct((32, 128), jnp.float32),
            grid=(4,),
            in_specs=[pl.BlockSpec((8, 128), lambda i: (i, 0),
                                   pipeline_mode=pl.Buffered(3)),
                      pl.BlockSpec((8, 128), lambda i: (0, 0),
                                   pipeline_mode=pl.Buffered(1))],
            out_specs=pl.BlockSpec((8, 128), lambda i: (i, 0)),
        )(x, wgt)
        return bool(jnp.allclose(out, x + 1.0))
    except Exception:
        return False


def _spec(shape, index_map, depth=None):
    """BlockSpec with optional explicit buffer depth (1 = resident operand)."""
    if depth is not None and depth != 2 and _buffered_supported():
        return pl.BlockSpec(shape, index_map, pipeline_mode=pl.Buffered(depth))
    return pl.BlockSpec(shape, index_map)


def _plan_tile(*, in_row_bytes, out_row_bytes, work_row_bytes, fixed_bytes,
               cap_rows, in_depth, align):
    """Pick the largest aligned time tile fitting the per-device VMEM budget."""
    cap, _ = _device_info()
    budget = int(cap * 0.5)
    per_row = in_depth * in_row_bytes + 2 * out_row_bytes + work_row_bytes
    t = max(1, (budget - fixed_bytes) // max(per_row, 1))
    t = min(cap_rows, t)
    t = max(align, (t // align) * align)
    est = fixed_bytes + t * per_row
    vmem_limit = int(min(cap * 0.85, max(2 * est, 24 * 1024 * 1024)))
    return int(t), vmem_limit


def _compiler_params(sems, vmem_limit):
    return pltpu.CompilerParams(dimension_semantics=sems,
                                vmem_limit_bytes=vmem_limit)


def _pack_affine(b, gamma, beta, c_out):
    if b is None:
        b = jnp.zeros((c_out,), jnp.float32)
    if gamma is None:
        gamma = jnp.ones((c_out,), jnp.float32)
    if beta is None:
        beta = jnp.zeros((c_out,), jnp.float32)
    return jnp.stack([b, gamma, beta]).astype(jnp.float32)   # (3, C_out)


# ---------------------------------------------------------------------------
# In-kernel helpers
# ---------------------------------------------------------------------------
def _mask_write(y, o_ref, *, t_valid, tile, transpose_out):
    # Zero rows beyond the true output length (keeps padded rows finite so the
    # next layer's zero-weight taps / discarded rows can never pick up NaNs).
    rows = lax.broadcasted_iota(jnp.int32, (tile, 1), 0) + pl.program_id(1) * tile
    y = jnp.where(rows < t_valid, y, 0.0)
    if transpose_out:
        o_ref[0] = y.T.astype(o_ref.dtype)      # NCL slab written directly
    else:
        o_ref[0] = y.astype(o_ref.dtype)


def _bias_norm_act(y, p_ref, norm, eps):
    y = y + p_ref[0:1, :]
    if norm == "layer":                          # LayerNorm over channels/row
        mean = jnp.mean(y, axis=1, keepdims=True)
        var = jnp.mean(jnp.square(y - mean), axis=1, keepdims=True)
        y = (y - mean) * lax.rsqrt(var + eps)
        y = y * p_ref[1:2, :] + p_ref[2:3, :]
    return _gelu(y)


# ---------------------------------------------------------------------------
# Kernels
# ---------------------------------------------------------------------------
def _conv_patch_kernel(patch_ref, w_ref, p_ref, o_ref, *, norm, eps, t_valid,
                       tile, transpose_out):
    # patch_ref: (1, tile, K*C_in)   w_ref: (K*C_in, C_out)   p_ref: (3, C_out)
    y = jnp.dot(patch_ref[0], w_ref[...], preferred_element_type=jnp.float32)
    y = _bias_norm_act(y, p_ref, norm, eps)
    _mask_write(y, o_ref, t_valid=t_valid, tile=tile, transpose_out=transpose_out)


def _conv_brick_kernel(main_ref, halo_ref, w_ref, p_ref, o_ref, *, s0, s1, norm,
                       eps, t_valid, tile, transpose_out):
    # Fused im2col for stride < K <= 2*stride:
    #   main_ref: (1, tile, s0) "bricks" (stride rows of x each)
    #   halo_ref: (1, 8, s0)    next tile's first bricks (same HBM array)
    #   w_ref:    (K*C_in, C_out) in (k, c_in) row order
    b0 = main_ref[0]                                            # (tile, s0)
    w = w_ref[...]
    y = jnp.dot(b0, w[0:s0, :], preferred_element_type=jnp.float32)
    # Taps that fall in the next brick: rows shifted up by one, last row halo.
    z = jnp.concatenate([main_ref[0, :, 0:s1], halo_ref[0, :, 0:s1]], axis=0)
    b1 = z[1:tile + 1]                                          # (tile, s1)
    y = y + jnp.dot(b1, w[s0:, :], preferred_element_type=jnp.float32)
    y = _bias_norm_act(y, p_ref, norm, eps)
    _mask_write(y, o_ref, t_valid=t_valid, tile=tile, transpose_out=transpose_out)


def _gn_stats_kernel(patch_ref, w_ref, p_ref, stat_ref, *, t_valid, tile):
    # Pass 1 of GroupNorm(num_groups == C): masked per-channel sum / sumsq.
    ti = pl.program_id(1)
    y = jnp.dot(patch_ref[0], w_ref[...], preferred_element_type=jnp.float32)
    y = y + p_ref[0:1, :]
    rows = lax.broadcasted_iota(jnp.int32, (tile, 1), 0) + ti * tile
    y = jnp.where(rows < t_valid, y, 0.0)
    s = jnp.concatenate([jnp.sum(y, axis=0, keepdims=True),
                         jnp.sum(y * y, axis=0, keepdims=True)], axis=0)

    @pl.when(ti == 0)
    def _init():
        stat_ref[...] = jnp.zeros_like(stat_ref)

    stat_ref[0] = stat_ref[0] + s


def _gn_apply_kernel(patch_ref, stat_ref, w_ref, p_ref, o_ref, *, eps, t_valid,
                     tile, transpose_out):
    # Pass 2: recompute the cheap K-wide conv, normalize with global stats.
    y = jnp.dot(patch_ref[0], w_ref[...], preferred_element_type=jnp.float32)
    y = y + p_ref[0:1, :]
    st = stat_ref[0]                                           # (2, C_out)
    inv_n = 1.0 / float(t_valid)
    mean = st[0:1, :] * inv_n
    var = jnp.maximum(st[1:2, :] * inv_n - mean * mean, 0.0)
    y = (y - mean) * lax.rsqrt(var + eps)
    y = y * p_ref[1:2, :] + p_ref[2:3, :]
    y = _gelu(y)
    _mask_write(y, o_ref, t_valid=t_valid, tile=tile, transpose_out=transpose_out)


# ---------------------------------------------------------------------------
# One conv layer
# ---------------------------------------------------------------------------
def _conv_block(x, t_in_true, w, bias, gamma, beta, *, stride, norm, is_last,
                tile_cap, eps=1e-5):
    B, t_in_alloc, c_in = x.shape
    c_out, c_in_w, K = w.shape
    assert c_in_w == c_in
    t_out_true = (t_in_true - K) // stride + 1
    t_out_alloc = t_out_true if is_last else _round_up(t_out_true, 2)

    layer0 = (c_in == 1)
    op_dtype = jnp.float32 if layer0 else jnp.bfloat16
    opb = jnp.dtype(op_dtype).itemsize
    out_dtype = jnp.float32 if is_last else jnp.bfloat16
    out_row_bytes = c_out * jnp.dtype(out_dtype).itemsize
    align = 128 if is_last else 8            # transposed out block needs 128 lanes

    _, kind = _device_info()
    in_depth = 3 if "v6" in kind else 2      # hide DMA jitter on v6e

    pp = _pack_affine(bias, gamma, beta, c_out)
    # Single (k, c_in)-ordered weight layout serves every path below.
    w2 = jnp.transpose(w, (2, 1, 0)).reshape(K * c_in, c_out).astype(op_dtype)
    kcin = K * c_in

    def out_spec(tile):
        if is_last:
            return pl.BlockSpec((1, c_out, tile), lambda bi, ti: (bi, 0, ti))
        return pl.BlockSpec((1, tile, c_out), lambda bi, ti: (bi, ti, 0))

    out_shape = (jax.ShapeDtypeStruct((B, c_out, t_out_true), out_dtype) if is_last
                 else jax.ShapeDtypeStruct((B, t_out_alloc, c_out), out_dtype))

    brick_ok = (stride < K <= 2 * stride and t_in_alloc % stride == 0
                and (t_in_alloc // stride) >= 8)
    reshape_ok = (K == stride and t_in_alloc % K == 0)

    # ---------------- GroupNorm layer (layer 0, "group" mode): two passes ----
    if norm == "group":
        idx = jnp.arange(t_out_true)[:, None] * stride + jnp.arange(K)[None, :]
        patches = x[:, idx, :].reshape(B, t_out_true, kcin).astype(op_dtype)
        tile, vlim = _plan_tile(in_row_bytes=kcin * opb, out_row_bytes=out_row_bytes,
                                work_row_bytes=8 * c_out,
                                fixed_bytes=kcin * c_out * opb + 64 * 1024,
                                cap_rows=tile_cap, in_depth=in_depth, align=align)
        n_t = pl.cdiv(t_out_alloc, tile)
        max_pt = max(0, (t_out_true - 1) // tile)
        patch_spec = _spec((1, tile, kcin),
                           lambda bi, ti: (bi, jnp.minimum(ti, max_pt), 0),
                           depth=in_depth)
        w_spec = _spec((kcin, c_out), lambda bi, ti: (0, 0), depth=1)
        p_spec = _spec((3, c_out), lambda bi, ti: (0, 0), depth=1)

        stats = pl.pallas_call(
            functools.partial(_gn_stats_kernel, t_valid=t_out_true, tile=tile),
            out_shape=jax.ShapeDtypeStruct((B, 2, c_out), jnp.float32),
            grid_spec=pltpu.PrefetchScalarGridSpec(
                num_scalar_prefetch=0, grid=(B, n_t),
                in_specs=[patch_spec, w_spec, p_spec],
                out_specs=pl.BlockSpec((1, 2, c_out), lambda bi, ti: (bi, 0, 0))),
            compiler_params=_compiler_params(("parallel", "arbitrary"), vlim),
        )(patches, w2, pp)

        stat_spec = pl.BlockSpec((1, 2, c_out), lambda bi, ti: (bi, 0, 0))
        out = pl.pallas_call(
            functools.partial(_gn_apply_kernel, eps=eps, t_valid=t_out_true,
                              tile=tile, transpose_out=is_last),
            out_shape=out_shape,
            grid_spec=pltpu.PrefetchScalarGridSpec(
                num_scalar_prefetch=0, grid=(B, n_t),
                in_specs=[patch_spec, stat_spec, w_spec, p_spec],
                out_specs=out_spec(tile)),
            compiler_params=_compiler_params(("parallel", "parallel"), vlim),
        )(patches, stats, w2, pp)
        return out, t_out_true

    # ---------------- Overlapped conv, im2col fused in-kernel ----------------
    if brick_ok:
        s0 = stride * c_in
        s1 = (K - stride) * c_in
        t_bricks = t_in_alloc // stride
        xb = x.reshape(B, t_bricks, s0).astype(op_dtype)      # free reshape
        tile, vlim = _plan_tile(in_row_bytes=s0 * opb, out_row_bytes=out_row_bytes,
                                work_row_bytes=8 * c_out + 2 * s1 * opb,
                                fixed_bytes=kcin * c_out * opb + 64 * 1024,
                                cap_rows=tile_cap, in_depth=in_depth, align=align)
        n_t = pl.cdiv(t_out_alloc, tile)
        max_mb = max(0, (t_bricks - 1) // tile)
        max_hb = max(0, (t_bricks - 1) // 8)
        main_spec = _spec((1, tile, s0),
                          lambda bi, ti: (bi, jnp.minimum(ti, max_mb), 0),
                          depth=in_depth)
        halo_spec = pl.BlockSpec(
            (1, 8, s0),
            lambda bi, ti: (bi, jnp.minimum((ti + 1) * (tile // 8), max_hb), 0))
        w_spec = _spec((kcin, c_out), lambda bi, ti: (0, 0), depth=1)
        p_spec = _spec((3, c_out), lambda bi, ti: (0, 0), depth=1)

        out = pl.pallas_call(
            functools.partial(_conv_brick_kernel, s0=s0, s1=s1, norm=norm, eps=eps,
                              t_valid=t_out_true, tile=tile, transpose_out=is_last),
            out_shape=out_shape,
            grid_spec=pltpu.PrefetchScalarGridSpec(
                num_scalar_prefetch=0, grid=(B, n_t),
                in_specs=[main_spec, halo_spec, w_spec, p_spec],
                out_specs=out_spec(tile)),
            compiler_params=_compiler_params(("parallel", "parallel"), vlim),
        )(xb, xb, w2, pp)
        return out, t_out_true

    # ---------------- K == stride (free reshape) or generic fallback ---------
    if reshape_ok:
        patches = x.reshape(B, t_in_alloc // K, kcin).astype(op_dtype)
    else:
        # TODO(synk): only hit when the free brick/reshape preconditions fail
        # (e.g. layer 0 in "layer" mode with T % stride != 0); this path still
        # materializes an im2col gather in HBM.
        idx = jnp.arange(t_out_true)[:, None] * stride + jnp.arange(K)[None, :]
        patches = x[:, idx, :].reshape(B, t_out_true, kcin).astype(op_dtype)
    rows_avail = patches.shape[1]
    tile, vlim = _plan_tile(in_row_bytes=kcin * opb, out_row_bytes=out_row_bytes,
                            work_row_bytes=8 * c_out,
                            fixed_bytes=kcin * c_out * opb + 64 * 1024,
                            cap_rows=tile_cap, in_depth=in_depth, align=align)
    n_t = pl.cdiv(t_out_alloc, tile)
    max_pt = max(0, (rows_avail - 1) // tile)
    patch_spec = _spec((1, tile, kcin),
                       lambda bi, ti: (bi, jnp.minimum(ti, max_pt), 0),
                       depth=in_depth)
    w_spec = _spec((kcin, c_out), lambda bi, ti: (0, 0), depth=1)
    p_spec = _spec((3, c_out), lambda bi, ti: (0, 0), depth=1)

    out = pl.pallas_call(
        functools.partial(_conv_patch_kernel, norm=norm, eps=eps, t_valid=t_out_true,
                          tile=tile, transpose_out=is_last),
        out_shape=out_shape,
        grid_spec=pltpu.PrefetchScalarGridSpec(
            num_scalar_prefetch=0, grid=(B, n_t),
            in_specs=[patch_spec, w_spec, p_spec],
            out_specs=out_spec(tile)),
        compiler_params=_compiler_params(("parallel", "parallel"), vlim),
    )(patches, w2, pp)
    return out, t_out_true


# ---------------------------------------------------------------------------
# HubertFeatureEncoder forward (stack of conv layers)
# ---------------------------------------------------------------------------
@functools.partial(jax.jit,
                   static_argnames=("conv_stride", "feat_extract_norm", "tile_cap"))
def hubert_feature_encoder(input_values, params, *, conv_stride,
                           feat_extract_norm, tile_cap=1024):
    """input_values: (B, T) raw waveform -> (B, conv_dim[-1], T_last) like torch."""
    if feat_extract_norm not in ("group", "layer"):
        raise ValueError(feat_extract_norm)
    B, T = input_values.shape
    h = input_values.astype(jnp.float32)[:, :, None]        # (B, T, 1) channel-last
    t_true = T
    n = len(params)
    for i, p in enumerate(params):
        if feat_extract_norm == "group":
            norm = "group" if i == 0 else "none"
        else:
            norm = "layer"
        gamma = p.get("gamma") if norm != "none" else None
        beta = p.get("beta") if norm != "none" else None
        h, t_true = _conv_block(h, t_true, p["w"], p.get("b"), gamma, beta,
                                stride=conv_stride[i], norm=norm,
                                is_last=(i == n - 1), tile_cap=tile_cap)
    return h                                                 # (B, C_last, T_last) f32


# ---------------------------------------------------------------------------
# Pure-JAX reference (f32) for the correctness check
# ---------------------------------------------------------------------------
def reference_forward(input_values, params, *, conv_stride, feat_extract_norm):
    h = input_values[:, None, :].astype(jnp.float32)          # (B, 1, T) NCL
    for i, p in enumerate(params):
        h = lax.conv_general_dilated(
            h, p["w"].astype(jnp.float32), window_strides=(conv_stride[i],),
            padding="VALID", dimension_numbers=("NCH", "OIH", "NCH"))
        h = h + p["b"][None, :, None]
        if feat_extract_norm == "group" and i == 0:
            mean = h.mean(axis=2, keepdims=True)
            var = jnp.square(h - mean).mean(axis=2, keepdims=True)
            h = (h - mean) / jnp.sqrt(var + 1e-5)
            h = h * p["gamma"][None, :, None] + p["beta"][None, :, None]
        elif feat_extract_norm == "layer":
            ht = h.transpose(0, 2, 1)
            mean = ht.mean(axis=-1, keepdims=True)
            var = jnp.square(ht - mean).mean(axis=-1, keepdims=True)
            ht = (ht - mean) / jnp.sqrt(var + 1e-5) * p["gamma"] + p["beta"]
            h = ht.transpose(0, 2, 1)
        h = 0.5 * h * (1.0 + lax.erf(h / math.sqrt(2.0)))
    return h


# ---------------------------------------------------------------------------
if __name__ == "__main__":
    # Small synthetic HubertConfig subset (feature-extractor fields only).
    conv_dim = (128, 128, 128)     # 128-multiples keep output stores lane-dense
    conv_kernel = (10, 3, 2)       # exercises GN two-pass, brick halo, reshape
    conv_stride = (5, 2, 2)
    conv_bias = True

    B, T = 2, 4001                 # odd T also exercises the gather fallback
    key = jax.random.PRNGKey(0)
    k_in, k_params = jax.random.split(key)
    input_values = jax.random.normal(k_in, (B, T), dtype=jnp.float32)

    params = []
    in_dim = 1
    pkeys = jax.random.split(k_params, 4 * len(conv_dim))
    for i, out_dim in enumerate(conv_dim):
        K = conv_kernel[i]
        fan_in = in_dim * K
        w = jax.random.normal(pkeys[4 * i], (out_dim, in_dim, K),
                              jnp.float32) / math.sqrt(fan_in)
        b = (0.01 * jax.random.normal(pkeys[4 * i + 1], (out_dim,), jnp.float32)
             if conv_bias else jnp.zeros((out_dim,), jnp.float32))
        gamma = 1.0 + 0.1 * jax.random.normal(pkeys[4 * i + 2], (out_dim,), jnp.float32)
        beta = 0.1 * jax.random.normal(pkeys[4 * i + 3], (out_dim,), jnp.float32)
        params.append(dict(w=w, b=b, gamma=gamma, beta=beta))
        in_dim = out_dim
    params = tuple(params)

    for mode in ("group", "layer"):
        out = hubert_feature_encoder(input_values, params,
                                     conv_stride=conv_stride,
                                     feat_extract_norm=mode,
                                     tile_cap=256)     # small tiles => multi-tile paths
        out = jax.block_until_ready(out)
        ref = jax.block_until_ready(
            reference_forward(input_values, params, conv_stride=conv_stride,
                              feat_extract_norm=mode))
        assert out.shape == ref.shape, (mode, out.shape, ref.shape)
        # bf16 matmul operands / inter-layer activations => loose tolerance.
        np.testing.assert_allclose(np.asarray(out, dtype=np.float32),
                                   np.asarray(ref), atol=1e-1, rtol=1e-1)

    print("KERNEL_OK")
</pallas_src>

<mosaic_0001>
module attributes {stable_mosaic.version = 11 : i64} {
  func.func @_gn_stats_kernel(%arg0: i32, %arg1: i32, %arg2: memref<1x256x10xf32, #tpu.memory_space<vmem>>, %arg3: memref<10x128xf32, #tpu.memory_space<vmem>>, %arg4: memref<3x128xf32, #tpu.memory_space<vmem>>, %arg5: memref<1x2x128xf32, #tpu.memory_space<vmem>>) attributes {dimension_semantics = [#tpu.dimension_semantics<parallel>, #tpu.dimension_semantics<arbitrary>], iteration_bounds = array<i64: 2, 4>, scalar_prefetch = 0 : i64, scratch_operands = 0 : i64, tpu.core_type = #tpu.core_type<tc>, window_params = [{transform_indices = @transform_0, window_bounds = array<i64: 1, 256, 10>}, {pipeline_mode = #tpu.pipeline_mode<synchronous>, transform_indices = @transform_1, window_bounds = array<i64: 10, 128>}, {pipeline_mode = #tpu.pipeline_mode<synchronous>, transform_indices = @transform_2, window_bounds = array<i64: 3, 128>}, {transform_indices = @transform_3, window_bounds = array<i64: 1, 2, 128>}]} {
    %c0 = arith.constant 0 : index
    %c0_0 = arith.constant 0 : index
    %c0_1 = arith.constant 0 : index
    %0 = vector.load %arg2[%c0, %c0_0, %c0_1] : memref<1x256x10xf32, #tpu.memory_space<vmem>>, vector<1x256x10xf32>
    %1 = vector.shape_cast %0 : vector<1x256x10xf32> to vector<256x10xf32>
    %c0_2 = arith.constant 0 : index
    %c0_3 = arith.constant 0 : index
    %2 = vector.load %arg3[%c0_2, %c0_3] : memref<10x128xf32, #tpu.memory_space<vmem>>, vector<10x128xf32>
    %cst = arith.constant dense<0.000000e+00> : vector<256x128xf32>
    %3 = tpu.matmul %1, %2, %cst {dimension_numbers = #tpu.dot_dimension_numbers<[1], [0], [0], [1], [0, 0, 1, 1], [], []>} : vector<256x10xf32>, vector<10x128xf32>, vector<256x128xf32> -> vector<256x128xf32>
    %c0_4 = arith.constant 0 : index
    %c0_5 = arith.constant 0 : index
    %4 = vector.load %arg4[%c0_4, %c0_5] : memref<3x128xf32, #tpu.memory_space<vmem>>, vector<1x128xf32>
    %5 = vector.broadcast %4 : vector<1x128xf32> to vector<256x128xf32>
    %6 = arith.addf %3, %5 : vector<256x128xf32>
    %7 = tpu.iota {dimensions = array<i32: 0>} : vector<256x1xi32>
    %c256_i32 = arith.constant 256 : i32
    %8 = arith.muli %arg1, %c256_i32 : i32
    %9 = vector.broadcast %8 : i32 to vector<256x1xi32>
    %10 = arith.addi %7, %9 : vector<256x1xi32>
    %c799_i32 = arith.constant 799 : i32
    %11 = vector.broadcast %c799_i32 : i32 to vector<256x1xi32>
    %12 = arith.cmpi slt, %10, %11 : vector<256x1xi32>
    %cst_6 = arith.constant 0.000000e+00 : f32
    %13 = vector.shape_cast %12 : vector<256x1xi1> to vector<256x1xi1>
    %14 = vector.broadcast %13 : vector<256x1xi1> to vector<256x128xi1>
    %15 = vector.broadcast %cst_6 : f32 to vector<256x128xf32>
    %16 = arith.select %14, %6, %15 : vector<256x128xi1>, vector<256x128xf32>
    %cst_7 = arith.constant dense<0.000000e+00> : vector<128xf32>
    %17 = vector.multi_reduction <add>, %16, %cst_7 [0] : vector<256x128xf32> to vector<128xf32>
    %18 = vector.shape_cast %17 : vector<128xf32> to vector<1x128xf32>
    %19 = arith.mulf %16, %16 : vector<256x128xf32>
    %cst_8 = arith.constant dense<0.000000e+00> : vector<128xf32>
    %20 = vector.multi_reduction <add>, %19, %cst_8 [0] : vector<256x128xf32> to vector<128xf32>
    %21 = vector.shape_cast %20 : vector<128xf32> to vector<1x128xf32>
    %22 = tpu.concatenate %18, %21 in 0 : vector<1x128xf32>, vector<1x128xf32> -> vector<2x128xf32>
    %c0_i32 = arith.constant 0 : i32
    %23 = arith.cmpi eq, %arg1, %c0_i32 : i32
    %24 = arith.extui %23 : i1 to i32
    %c0_i32_9 = arith.constant 0 : i32
    %25 = arith.cmpi ne, %24, %c0_i32_9 : i32
    scf.if %25 {
      %cst_16 = arith.constant 0.000000e+00 : f32
      %32 = vector.broadcast %cst_16 : f32 to vector<1x2x128xf32>
      %c0_17 = arith.constant 0 : index
      %c0_18 = arith.constant 0 : index
      %c0_19 = arith.constant 0 : index
      %33 = vector.load %arg5[%c0_17, %c0_18, %c0_19] : memref<1x2x128xf32, #tpu.memory_space<vmem>>, vector<1x2x128xf32>
      tpu.vector_store %arg5[%c0_17, %c0_18, %c0_19], %32 {strides = array<i32>} : memref<1x2x128xf32, #tpu.memory_space<vmem>>, vector<1x2x128xf32>,
    } else {
    }
    %c0_10 = arith.constant 0 : index
    %c0_11 = arith.constant 0 : index
    %c0_12 = arith.constant 0 : index
    %26 = vector.load %arg5[%c0_10, %c0_11, %c0_12] : memref<1x2x128xf32, #tpu.memory_space<vmem>>, vector<1x2x128xf32>
    %27 = vector.shape_cast %26 : vector<1x2x128xf32> to vector<2x128xf32>
    %28 = arith.addf %27, %22 : vector<2x128xf32>
    %c0_13 = arith.constant 0 : index
    %c0_14 = arith.constant 0 : index
    %c0_15 = arith.constant 0 : index
    %29 = vector.load %arg5[%c0_13, %c0_14, %c0_15] : memref<1x2x128xf32, #tpu.memory_space<vmem>>, vector<1x2x128xf32>
    %30 = vector.shape_cast %29 : vector<1x2x128xf32> to vector<2x128xf32>
    %31 = vector.shape_cast %28 : vector<2x128xf32> to vector<1x2x128xf32>
    tpu.vector_store %arg5[%c0_13, %c0_14, %c0_15], %31 {strides = array<i32>} : memref<1x2x128xf32, #tpu.memory_space<vmem>>, vector<1x2x128xf32>,
    return
  }
  func.func @transform_0(%arg0: i32, %arg1: i32) -> (i32, i32, i32) {
    %c3_i32 = arith.constant 3 : i32
    %0 = arith.minsi %arg1, %c3_i32 : i32
    %c0_i32 = arith.constant 0 : i32
    %c0_i32_0 = arith.constant 0 : i32
    return %arg0, %0, %c0_i32 : i32, i32, i32
  }
  func.func @transform_1(%arg0: i32, %arg1: i32) -> (i32, i32) {
    %c0_i32 = arith.constant 0 : i32
    %c0_i32_0 = arith.constant 0 : i32
    %c0_i32_1 = arith.constant 0 : i32
    return %c0_i32, %c0_i32_0 : i32, i32
  }
  func.func @transform_2(%arg0: i32, %arg1: i32) -> (i32, i32) {
    %c0_i32 = arith.constant 0 : i32
    %c0_i32_0 = arith.constant 0 : i32
    %c0_i32_1 = arith.constant 0 : i32
    return %c0_i32, %c0_i32_0 : i32, i32
  }
  func.func @transform_3(%arg0: i32, %arg1: i32) -> (i32, i32, i32) {
    %c0_i32 = arith.constant 0 : i32
    %c0_i32_0 = arith.constant 0 : i32
    %c0_i32_1 = arith.constant 0 : i32
    return %arg0, %c0_i32, %c0_i32_0 : i32, i32, i32
  }
}

module attributes {stable_mosaic.version = 11 : i64} {
  func.func @_gn_apply_kernel(%arg0: i32, %arg1: i32, %arg2: memref<1x256x10xf32, #tpu.memory_space<vmem>>, %arg3: memref<1x2x128xf32, #tpu.memory_space<vmem>>, %arg4: memref<10x128xf32, #tpu.memory_space<vmem>>, %arg5: memref<3x128xf32, #tpu.memory_space<vmem>>, %arg6: memref<1x256x128xbf16, #tpu.memory_space<vmem>>) attributes {dimension_semantics = [#tpu.dimension_semantics<parallel>, #tpu.dimension_semantics<parallel>], iteration_bounds = array<i64: 2, 4>, scalar_prefetch = 0 : i64, scratch_operands = 0 : i64, tpu.core_type = #tpu.core_type<tc>, window_params = [{transform_indices = @transform_0, window_bounds = array<i64: 1, 256, 10>}, {transform_indices = @transform_1, window_bounds = array<i64: 1, 2, 128>}, {pipeline_mode = #tpu.pipeline_mode<synchronous>, transform_indices = @transform_2, window_bounds = array<i64: 10, 128>}, {pipeline_mode = #tpu.pipeline_mode<synchronous>, transform_indices = @transform_3, window_bounds = array<i64: 3, 128>}, {transform_indices = @transform_4, window_bounds = array<i64: 1, 256, 128>}]} {
    %c0 = arith.constant 0 : index
    %c0_0 = arith.constant 0 : index
    %c0_1 = arith.constant 0 : index
    %0 = vector.load %arg2[%c0, %c0_0, %c0_1] : memref<1x256x10xf32, #tpu.memory_space<vmem>>, vector<1x256x10xf32>
    %1 = vector.shape_cast %0 : vector<1x256x10xf32> to vector<256x10xf32>
    %c0_2 = arith.constant 0 : index
    %c0_3 = arith.constant 0 : index
    %2 = vector.load %arg4[%c0_2, %c0_3] : memref<10x128xf32, #tpu.memory_space<vmem>>, vector<10x128xf32>
    %cst = arith.constant dense<0.000000e+00> : vector<256x128xf32>
    %3 = tpu.matmul %1, %2, %cst {dimension_numbers = #tpu.dot_dimension_numbers<[1], [0], [0], [1], [0, 0, 1, 1], [], []>} : vector<256x10xf32>, vector<10x128xf32>, vector<256x128xf32> -> vector<256x128xf32>
    %c0_4 = arith.constant 0 : index
    %c0_5 = arith.constant 0 : index
    %4 = vector.load %arg5[%c0_4, %c0_5] : memref<3x128xf32, #tpu.memory_space<vmem>>, vector<1x128xf32>
    %5 = vector.broadcast %4 : vector<1x128xf32> to vector<256x128xf32>
    %6 = arith.addf %3, %5 : vector<256x128xf32>
    %c0_6 = arith.constant 0 : index
    %c0_7 = arith.constant 0 : index
    %c0_8 = arith.constant 0 : index
    %7 = vector.load %arg3[%c0_6, %c0_7, %c0_8] : memref<1x2x128xf32, #tpu.memory_space<vmem>>, vector<1x2x128xf32>
    %8 = vector.shape_cast %7 : vector<1x2x128xf32> to vector<2x128xf32>
    %9 = vector.extract_strided_slice %8 {offsets = [0, 0], sizes = [1, 128], strides = [1, 1]} : vector<2x128xf32> to vector<1x128xf32>
    %cst_9 = arith.constant 0.00125156448 : f32
    %10 = vector.broadcast %cst_9 : f32 to vector<1x128xf32>
    %11 = arith.mulf %9, %10 : vector<1x128xf32>
    %12 = vector.extract_strided_slice %8 {offsets = [1, 0], sizes = [1, 128], strides = [1, 1]} : vector<2x128xf32> to vector<1x128xf32>
    %cst_10 = arith.constant 0.00125156448 : f32
    %13 = vector.broadcast %cst_10 : f32 to vector<1x128xf32>
    %14 = arith.mulf %12, %13 : vector<1x128xf32>
    %15 = arith.mulf %11, %11 : vector<1x128xf32>
    %16 = arith.subf %14, %15 : vector<1x128xf32>
    %cst_11 = arith.constant 0.000000e+00 : f32
    %17 = vector.broadcast %cst_11 : f32 to vector<1x128xf32>
    %18 = arith.maximumf %16, %17 : vector<1x128xf32>
    %19 = vector.broadcast %11 : vector<1x128xf32> to vector<256x128xf32>
    %20 = arith.subf %6, %19 : vector<256x128xf32>
    %cst_12 = arith.constant 9.99999974E-6 : f32
    %21 = vector.broadcast %cst_12 : f32 to vector<1x128xf32>
    %22 = arith.addf %18, %21 : vector<1x128xf32>
    %23 = math.rsqrt %22 : vector<1x128xf32>
    %24 = vector.broadcast %23 : vector<1x128xf32> to vector<256x128xf32>
    %25 = arith.mulf %20, %24 : vector<256x128xf32>
    %c1 = arith.constant 1 : index
    %c0_13 = arith.constant 0 : index
    %26 = vector.load %arg5[%c1, %c0_13] : memref<3x128xf32, #tpu.memory_space<vmem>>, vector<1x128xf32>
    %27 = vector.broadcast %26 : vector<1x128xf32> to vector<256x128xf32>
    %28 = arith.mulf %25, %27 : vector<256x128xf32>
    %c2 = arith.constant 2 : index
    %c0_14 = arith.constant 0 : index
    %29 = vector.load %arg5[%c2, %c0_14] : memref<3x128xf32, #tpu.memory_space<vmem>>, vector<1x128xf32>
    %30 = vector.broadcast %29 : vector<1x128xf32> to vector<256x128xf32>
    %31 = arith.addf %28, %30 : vector<256x128xf32>
    %cst_15 = arith.constant 5.000000e-01 : f32
    %32 = vector.broadcast %cst_15 : f32 to vector<256x128xf32>
    %33 = arith.mulf %32, %31 : vector<256x128xf32>
    %cst_16 = arith.constant 0.707106769 : f32
    %34 = vector.broadcast %cst_16 : f32 to vector<256x128xf32>
    %35 = arith.mulf %31, %34 : vector<256x128xf32>
    %36 = math.erf %35 : vector<256x128xf32>
    %cst_17 = arith.constant 1.000000e+00 : f32
    %37 = vector.broadcast %cst_17 : f32 to vector<256x128xf32>
    %38 = arith.addf %37, %36 : vector<256x128xf32>
    %39 = arith.mulf %33, %38 : vector<256x128xf32>
    %40 = tpu.iota {dimensions = array<i32: 0>} : vector<256x1xi32>
    %c256_i32 = arith.constant 256 : i32
    %41 = arith.muli %arg1, %c256_i32 : i32
    %42 = vector.broadcast %41 : i32 to vector<256x1xi32>
    %43 = arith.addi %40, %42 : vector<256x1xi32>
    %c799_i32 = arith.constant 799 : i32
    %44 = vector.broadcast %c799_i32 : i32 to vector<256x1xi32>
    %45 = arith.cmpi slt, %43, %44 : vector<256x1xi32>
    %cst_18 = arith.constant 0.000000e+00 : f32
    %46 = vector.shape_cast %45 : vector<256x1xi1> to vector<256x1xi1>
    %47 = vector.broadcast %46 : vector<256x1xi1> to vector<256x128xi1>
    %48 = vector.broadcast %cst_18 : f32 to vector<256x128xf32>
    %49 = arith.select %47, %39, %48 : vector<256x128xi1>, vector<256x128xf32>
    %50 = arith.truncf %49 : vector<256x128xf32> to vector<256x128xbf16>
    %c0_19 = arith.constant 0 : index
    %c0_20 = arith.constant 0 : index
    %c0_21 = arith.constant 0 : index
    %51 = vector.load %arg6[%c0_19, %c0_20, %c0_21] : memref<1x256x128xbf16, #tpu.memory_space<vmem>>, vector<1x256x128xbf16>
    %52 = vector.shape_cast %51 : vector<1x256x128xbf16> to vector<256x128xbf16>
    %53 = vector.shape_cast %50 : vector<256x128xbf16> to vector<1x256x128xbf16>
    tpu.vector_store %arg6[%c0_19, %c0_20, %c0_21], %53 {strides = array<i32>} : memref<1x256x128xbf16, #tpu.memory_space<vmem>>, vector<1x256x128xbf16>,
    return
  }
  func.func @transform_0(%arg0: i32, %arg1: i32) -> (i32, i32, i32) {
    %c3_i32 = arith.constant 3 : i32
    %0 = arith.minsi %arg1, %c3_i32 : i32
    %c0_i32 = arith.constant 0 : i32
    %c0_i32_0 = arith.constant 0 : i32
    return %arg0, %0, %c0_i32 : i32, i32, i32
  }
  func.func @transform_1(%arg0: i32, %arg1: i32) -> (i32, i32, i32) {
    %c0_i32 = arith.constant 0 : i32
    %c0_i32_0 = arith.constant 0 : i32
    %c0_i32_1 = arith.constant 0 : i32
    return %arg0, %c0_i32, %c0_i32_0 : i32, i32, i32
  }
  func.func @transform_2(%arg0: i32, %arg1: i32) -> (i32, i32) {
    %c0_i32 = arith.constant 0 : i32
    %c0_i32_0 = arith.constant 0 : i32
    %c0_i32_1 = arith.constant 0 : i32
    return %c0_i32, %c0_i32_0 : i32, i32
  }
  func.func @transform_3(%arg0: i32, %arg1: i32) -> (i32, i32) {
    %c0_i32 = arith.constant 0 : i32
    %c0_i32_0 = arith.constant 0 : i32
    %c0_i32_1 = arith.constant 0 : i32
    return %c0_i32, %c0_i32_0 : i32, i32
  }
  func.func @transform_4(%arg0: i32, %arg1: i32) -> (i32, i32, i32) {
    %c0_i32 = arith.constant 0 : i32
    %c0_i32_0 = arith.constant 0 : i32
    return %arg0, %arg1, %c0_i32 : i32, i32, i32
  }
}

module attributes {stable_mosaic.version = 11 : i64} {
  func.func @_conv_brick_kernel(%arg0: i32, %arg1: i32, %arg2: memref<1x256x256xbf16, #tpu.memory_space<vmem>>, %arg3: memref<1x8x256xbf16, #tpu.memory_space<vmem>>, %arg4: memref<384x128xbf16, #tpu.memory_space<vmem>>, %arg5: memref<3x128xf32, #tpu.memory_space<vmem>>, %arg6: memref<1x256x128xbf16, #tpu.memory_space<vmem>>) attributes {dimension_semantics = [#tpu.dimension_semantics<parallel>, #tpu.dimension_semantics<parallel>], iteration_bounds = array<i64: 2, 2>, scalar_prefetch = 0 : i64, scratch_operands = 0 : i64, tpu.core_type = #tpu.core_type<tc>, window_params = [{transform_indices = @transform_0, window_bounds = array<i64: 1, 256, 256>}, {transform_indices = @transform_1, window_bounds = array<i64: 1, 8, 256>}, {pipeline_mode = #tpu.pipeline_mode<synchronous>, transform_indices = @transform_2, window_bounds = array<i64: 384, 128>}, {pipeline_mode = #tpu.pipeline_mode<synchronous>, transform_indices = @transform_3, window_bounds = array<i64: 3, 128>}, {transform_indices = @transform_4, window_bounds = array<i64: 1, 256, 128>}]} {
    %c0 = arith.constant 0 : index
    %c0_0 = arith.constant 0 : index
    %c0_1 = arith.constant 0 : index
    %0 = vector.load %arg2[%c0, %c0_0, %c0_1] : memref<1x256x256xbf16, #tpu.memory_space<vmem>>, vector<1x256x256xbf16>
    %1 = vector.shape_cast %0 : vector<1x256x256xbf16> to vector<256x256xbf16>
    %c0_2 = arith.constant 0 : index
    %c0_3 = arith.constant 0 : index
    %2 = vector.load %arg4[%c0_2, %c0_3] : memref<384x128xbf16, #tpu.memory_space<vmem>>, vector<384x128xbf16>
    %3 = vector.extract_strided_slice %2 {offsets = [0, 0], sizes = [256, 128], strides = [1, 1]} : vector<384x128xbf16> to vector<256x128xbf16>
    %cst = arith.constant dense<0.000000e+00> : vector<256x128xf32>
    %4 = tpu.matmul %1, %3, %cst {dimension_numbers = #tpu.dot_dimension_numbers<[1], [0], [0], [1], [0, 0, 1, 1], [], []>} : vector<256x256xbf16>, vector<256x128xbf16>, vector<256x128xf32> -> vector<256x128xf32>
    %c0_4 = arith.constant 0 : index
    %c0_5 = arith.constant 0 : index
    %c0_6 = arith.constant 0 : index
    %5 = vector.load %arg2[%c0_4, %c0_5, %c0_6] : memref<1x256x256xbf16, #tpu.memory_space<vmem>>, vector<1x256x128xbf16>
    %6 = vector.shape_cast %5 : vector<1x256x128xbf16> to vector<256x128xbf16>
    %c0_7 = arith.constant 0 : index
    %c0_8 = arith.constant 0 : index
    %c0_9 = arith.constant 0 : index
    %7 = vector.load %arg3[%c0_7, %c0_8, %c0_9] : memref<1x8x256xbf16, #tpu.memory_space<vmem>>, vector<1x8x128xbf16>
    %8 = vector.shape_cast %7 : vector<1x8x128xbf16> to vector<8x128xbf16>
    %9 = tpu.concatenate %6, %8 in 0 : vector<256x128xbf16>, vector<8x128xbf16> -> vector<264x128xbf16>
    %10 = vector.extract_strided_slice %9 {offsets = [1, 0], sizes = [256, 128], strides = [1, 1]} : vector<264x128xbf16> to vector<256x128xbf16>
    %11 = vector.extract_strided_slice %2 {offsets = [256, 0], sizes = [128, 128], strides = [1, 1]} : vector<384x128xbf16> to vector<128x128xbf16>
    %cst_10 = arith.constant dense<0.000000e+00> : vector<256x128xf32>
    %12 = tpu.matmul %10, %11, %cst_10 {dimension_numbers = #tpu.dot_dimension_numbers<[1], [0], [0], [1], [0, 0, 1, 1], [], []>} : vector<256x128xbf16>, vector<128x128xbf16>, vector<256x128xf32> -> vector<256x128xf32>
    %13 = arith.addf %4, %12 : vector<256x128xf32>
    %c0_11 = arith.constant 0 : index
    %c0_12 = arith.constant 0 : index
    %14 = vector.load %arg5[%c0_11, %c0_12] : memref<3x128xf32, #tpu.memory_space<vmem>>, vector<1x128xf32>
    %15 = vector.broadcast %14 : vector<1x128xf32> to vector<256x128xf32>
    %16 = arith.addf %13, %15 : vector<256x128xf32>
    %cst_13 = arith.constant 5.000000e-01 : f32
    %17 = vector.broadcast %cst_13 : f32 to vector<256x128xf32>
    %18 = arith.mulf %17, %16 : vector<256x128xf32>
    %cst_14 = arith.constant 0.707106769 : f32
    %19 = vector.broadcast %cst_14 : f32 to vector<256x128xf32>
    %20 = arith.mulf %16, %19 : vector<256x128xf32>
    %21 = math.erf %20 : vector<256x128xf32>
    %cst_15 = arith.constant 1.000000e+00 : f32
    %22 = vector.broadcast %cst_15 : f32 to vector<256x128xf32>
    %23 = arith.addf %22, %21 : vector<256x128xf32>
    %24 = arith.mulf %18, %23 : vector<256x128xf32>
    %25 = tpu.iota {dimensions = array<i32: 0>} : vector<256x1xi32>
    %c256_i32 = arith.constant 256 : i32
    %26 = arith.muli %arg1, %c256_i32 : i32
    %27 = vector.broadcast %26 : i32 to vector<256x1xi32>
    %28 = arith.addi %25, %27 : vector<256x1xi32>
    %c399_i32 = arith.constant 399 : i32
    %29 = vector.broadcast %c399_i32 : i32 to vector<256x1xi32>
    %30 = arith.cmpi slt, %28, %29 : vector<256x1xi32>
    %cst_16 = arith.constant 0.000000e+00 : f32
    %31 = vector.shape_cast %30 : vector<256x1xi1> to vector<256x1xi1>
    %32 = vector.broadcast %31 : vector<256x1xi1> to vector<256x128xi1>
    %33 = vector.broadcast %cst_16 : f32 to vector<256x128xf32>
    %34 = arith.select %32, %24, %33 : vector<256x128xi1>, vector<256x128xf32>
    %35 = arith.truncf %34 : vector<256x128xf32> to vector<256x128xbf16>
    %c0_17 = arith.constant 0 : index
    %c0_18 = arith.constant 0 : index
    %c0_19 = arith.constant 0 : index
    %36 = vector.load %arg6[%c0_17, %c0_18, %c0_19] : memref<1x256x128xbf16, #tpu.memory_space<vmem>>, vector<1x256x128xbf16>
    %37 = vector.shape_cast %36 : vector<1x256x128xbf16> to vector<256x128xbf16>
    %38 = vector.shape_cast %35 : vector<256x128xbf16> to vector<1x256x128xbf16>
    tpu.vector_store %arg6[%c0_17, %c0_18, %c0_19], %38 {strides = array<i32>} : memref<1x256x128xbf16, #tpu.memory_space<vmem>>, vector<1x256x128xbf16>,
    return
  }
  func.func @transform_0(%arg0: i32, %arg1: i32) -> (i32, i32, i32) {
    %c1_i32 = arith.constant 1 : i32
    %0 = arith.minsi %arg1, %c1_i32 : i32
    %c0_i32 = arith.constant 0 : i32
    %c0_i32_0 = arith.constant 0 : i32
    return %arg0, %0, %c0_i32 : i32, i32, i32
  }
  func.func @transform_1(%arg0: i32, %arg1: i32) -> (i32, i32, i32) {
    %c1_i32 = arith.constant 1 : i32
    %0 = arith.addi %arg1, %c1_i32 : i32
    %c32_i32 = arith.constant 32 : i32
    %1 = arith.muli %0, %c32_i32 : i32
    %c49_i32 = arith.constant 49 : i32
    %2 = arith.minsi %1, %c49_i32 : i32
    %c0_i32 = arith.constant 0 : i32
    %c0_i32_0 = arith.constant 0 : i32
    return %arg0, %2, %c0_i32 : i32, i32, i32
  }
  func.func @transform_2(%arg0: i32, %arg1: i32) -> (i32, i32) {
    %c0_i32 = arith.constant 0 : i32
    %c0_i32_0 = arith.constant 0 : i32
    %c0_i32_1 = arith.constant 0 : i32
    return %c0_i32, %c0_i32_0 : i32, i32
  }
  func.func @transform_3(%arg0: i32, %arg1: i32) -> (i32, i32) {
    %c0_i32 = arith.constant 0 : i32
    %c0_i32_0 = arith.constant 0 : i32
    %c0_i32_1 = arith.constant 0 : i32
    return %c0_i32, %c0_i32_0 : i32, i32
  }
  func.func @transform_4(%arg0: i32, %arg1: i32) -> (i32, i32, i32) {
    %c0_i32 = arith.constant 0 : i32
    %c0_i32_0 = arith.constant 0 : i32
    return %arg0, %arg1, %c0_i32 : i32, i32, i32
  }
}

module attributes {stable_mosaic.version = 11 : i64} {
  func.func @_conv_patch_kernel(%arg0: i32, %arg1: i32, %arg2: memref<1x256x256xbf16, #tpu.memory_space<vmem>>, %arg3: memref<256x128xbf16, #tpu.memory_space<vmem>>, %arg4: memref<3x128xf32, #tpu.memory_space<vmem>>, %arg5: memref<1x128x256xf32, #tpu.memory_space<vmem>>) attributes {dimension_semantics = [#tpu.dimension_semantics<parallel>, #tpu.dimension_semantics<parallel>], iteration_bounds = array<i64: 2, 1>, scalar_prefetch = 0 : i64, scratch_operands = 0 : i64, tpu.core_type = #tpu.core_type<tc>, window_params = [{transform_indices = @transform_0, window_bounds = array<i64: 1, 256, 256>}, {pipeline_mode = #tpu.pipeline_mode<synchronous>, transform_indices = @transform_1, window_bounds = array<i64: 256, 128>}, {pipeline_mode = #tpu.pipeline_mode<synchronous>, transform_indices = @transform_2, window_bounds = array<i64: 3, 128>}, {transform_indices = @transform_3, window_bounds = array<i64: 1, 128, 256>}]} {
    %c0 = arith.constant 0 : index
    %c0_0 = arith.constant 0 : index
    %c0_1 = arith.constant 0 : index
    %0 = vector.load %arg2[%c0, %c0_0, %c0_1] : memref<1x256x256xbf16, #tpu.memory_space<vmem>>, vector<1x256x256xbf16>
    %1 = vector.shape_cast %0 : vector<1x256x256xbf16> to vector<256x256xbf16>
    %c0_2 = arith.constant 0 : index
    %c0_3 = arith.constant 0 : index
    %2 = vector.load %arg3[%c0_2, %c0_3] : memref<256x128xbf16, #tpu.memory_space<vmem>>, vector<256x128xbf16>
    %cst = arith.constant dense<0.000000e+00> : vector<256x128xf32>
    %3 = tpu.matmul %1, %2, %cst {dimension_numbers = #tpu.dot_dimension_numbers<[1], [0], [0], [1], [0, 0, 1, 1], [], []>} : vector<256x256xbf16>, vector<256x128xbf16>, vector<256x128xf32> -> vector<256x128xf32>
    %c0_4 = arith.constant 0 : index
    %c0_5 = arith.constant 0 : index
    %4 = vector.load %arg4[%c0_4, %c0_5] : memref<3x128xf32, #tpu.memory_space<vmem>>, vector<1x128xf32>
    %5 = vector.broadcast %4 : vector<1x128xf32> to vector<256x128xf32>
    %6 = arith.addf %3, %5 : vector<256x128xf32>
    %cst_6 = arith.constant 5.000000e-01 : f32
    %7 = vector.broadcast %cst_6 : f32 to vector<256x128xf32>
    %8 = arith.mulf %7, %6 : vector<256x128xf32>
    %cst_7 = arith.constant 0.707106769 : f32
    %9 = vector.broadcast %cst_7 : f32 to vector<256x128xf32>
    %10 = arith.mulf %6, %9 : vector<256x128xf32>
    %11 = math.erf %10 : vector<256x128xf32>
    %cst_8 = arith.constant 1.000000e+00 : f32
    %12 = vector.broadcast %cst_8 : f32 to vector<256x128xf32>
    %13 = arith.addf %12, %11 : vector<256x128xf32>
    %14 = arith.mulf %8, %13 : vector<256x128xf32>
    %15 = tpu.iota {dimensions = array<i32: 0>} : vector<256x1xi32>
    %c256_i32 = arith.constant 256 : i32
    %16 = arith.muli %arg1, %c256_i32 : i32
    %17 = vector.broadcast %16 : i32 to vector<256x1xi32>
    %18 = arith.addi %15, %17 : vector<256x1xi32>
    %c199_i32 = arith.constant 199 : i32
    %19 = vector.broadcast %c199_i32 : i32 to vector<256x1xi32>
    %20 = arith.cmpi slt, %18, %19 : vector<256x1xi32>
    %cst_9 = arith.constant 0.000000e+00 : f32
    %21 = vector.shape_cast %20 : vector<256x1xi1> to vector<256x1xi1>
    %22 = vector.broadcast %21 : vector<256x1xi1> to vector<256x128xi1>
    %23 = vector.broadcast %cst_9 : f32 to vector<256x128xf32>
    %24 = arith.select %22, %14, %23 : vector<256x128xi1>, vector<256x128xf32>
    %25 = tpu.transpose %24, [1, 0] : vector<256x128xf32> -> vector<128x256xf32>
    %c0_10 = arith.constant 0 : index
    %c0_11 = arith.constant 0 : index
    %c0_12 = arith.constant 0 : index
    %26 = vector.load %arg5[%c0_10, %c0_11, %c0_12] : memref<1x128x256xf32, #tpu.memory_space<vmem>>, vector<1x128x256xf32>
    %27 = vector.shape_cast %26 : vector<1x128x256xf32> to vector<128x256xf32>
    %28 = vector.shape_cast %25 : vector<128x256xf32> to vector<1x128x256xf32>
    tpu.vector_store %arg5[%c0_10, %c0_11, %c0_12], %28 {strides = array<i32>} : memref<1x128x256xf32, #tpu.memory_space<vmem>>, vector<1x128x256xf32>,
    return
  }
  func.func @transform_0(%arg0: i32, %arg1: i32) -> (i32, i32, i32) {
    %c0_i32 = arith.constant 0 : i32
    %0 = arith.minsi %arg1, %c0_i32 : i32
    %c0_i32_0 = arith.constant 0 : i32
    %c0_i32_1 = arith.constant 0 : i32
    return %arg0, %0, %c0_i32_0 : i32, i32, i32
  }
  func.func @transform_1(%arg0: i32, %arg1: i32) -> (i32, i32) {
    %c0_i32 = arith.constant 0 : i32
    %c0_i32_0 = arith.constant 0 : i32
    %c0_i32_1 = arith.constant 0 : i32
    return %c0_i32, %c0_i32_0 : i32, i32
  }
  func.func @transform_2(%arg0: i32, %arg1: i32) -> (i32, i32) {
    %c0_i32 = arith.constant 0 : i32
    %c0_i32_0 = arith.constant 0 : i32
    %c0_i32_1 = arith.constant 0 : i32
    return %c0_i32, %c0_i32_0 : i32, i32
  }
  func.func @transform_3(%arg0: i32, %arg1: i32) -> (i32, i32, i32) {
    %c0_i32 = arith.constant 0 : i32
    %c0_i32_0 = arith.constant 0 : i32
    return %arg0, %c0_i32, %arg1 : i32, i32, i32
  }
}

</mosaic_0001>

<bundles_post_ra>
// kernel: hubert_feature_encoder.4
= control target key start
LH: loop header
LB: loop body
LE: loop exit
PB: predicated region body
PF: predicated region fallthrough
CT: control target
= control target key end

     0   :  { %s1216_s12 = smov 0   ;;  %s1218_s13 = smov 0   ;;  %s1496_s0 = inlined_call_operand.vmem [shape: f32[2,799,10], index: 0, kind: input, shape index: {}]   ;;  %s1497_s1 = inlined_call_operand.vmem [shape: f32[10,128], index: 1, kind: input, shape index: {}]   ;;  %s1498_s2 = inlined_call_operand.vmem [shape: f32[3,128], index: 2, kind: input, shape index: {}]   ;;  %s1499_s3 = inlined_call_operand.vmem [shape: f32[2,2,128], index: 3, kind: output, shape index: {}]  }
   0x1   :  { %s1220_s14 = smov 0   ;;  %s1222_s15 = smov 0  }
   0x2   :  { %s1224_s16 = smov 0  }
   0x3 LB: > { %s22_s17 = sadd.s32 1, %s1185_s14  ;;  %s25_s18 = sadd.s32 1, %s1189_s15  ;;  %s1193_s16 = sphi %s1224_s16, %s13_s16   ;;  %s1189_s15 = sphi %s1222_s15, %s1503_s15   ;;  %s1185_s14 = sphi %s1220_s14, %s1502_s14   ;;  %s1181_s13 = sphi %s1218_s13, %s1501_s13   ;;  %s1177_s12 = sphi %s1216_s12, %s1500_s12  }
   0x4   : > { %p23_p0 = scmp.ge.s32.totalorder %s22_s17, 4  ;;  %p981_p1 = scmp.ge.s32.totalorder %s1193_s16, 1 }
   0x5   : > { %p172_p2 = scmp.lt.s32.totalorder %s1193_s16, 9 }
   0x6   : > { %s1505_s17 = smov (%p23_p0, %s22_s17), 0  ;;  %s1507_s18 = smov (!%p23_p0, %s25_s18), %s1189_s15 }
   0x7   : > { %p173_p3 = pnand %p981_p1, %p172_p2  ;;  %p27_p4 = scmp.ge.s32.totalorder %s1507_s18, 2 }
   0x8   : > { %p205_p5 = scmp.lt.s32.totalorder (!%p173_p3), %s1177_s12, 3  ;;  %p212_p6 = scmp.lt.s32.totalorder (!%p173_p3), %s1181_s13, 1 }
   0x9   : > { %s1509_s18 = smov (%p27_p4, %s1507_s18), 0  ;;  %176 = sbr.rel (%p173_p3) target bundleno = 314 (0x13a), region = 32 }
   0xa   : > { %s1019_s8 = sshll.u32 (!%p173_p3), %s1177_s12, 8  ;;  %p1020_p8 = scmp.ne.s32.totalorder (!%p173_p3), %s1177_s12, 0 }
   0xe   : > { %v264_v0 = vld [vmem:[%s1497_s1 + $0x8] sm:$0x3]  ;;  %vm367_vm0 = vcmask 1041408   ;;  %v263_v1 = vld [vmem:[%s1497_s1] sm:$0xff]  ;;  %s206_s23 = scalar_select %p205_p5, %s1177_s12, 3  ;;  %vm270_vm1 = vcmask 80896   ;;  %v596_v34 = vlaneseq  ;;  %v1334_v37 = vstv %s1019_s8 }
   0xf   : > { %1057 = vmatprep.subr.msk.mxu0 %vm367_vm0, %v264_v0  ;;  %1109 = vmatprep.subr.msk.mxu1 %vm367_vm0, %v264_v0  ;;  %s1511_s13 = smov (!%p212_p6, %s1181_s13), 1  ;;  %v1339_v38 = vld [vmem:[%s1498_s2] ss:$0 sm:$0xff] }
  0x10   : > { %1058 = vmatpush3.msk.msra.mxu0 %vm367_vm0, %v264_v0  ;;  %1111 = vmatpush3.msk.msra.mxu1 %vm367_vm0, %v264_v0  ;;  %s982_s24 = sshll.u32 %s206_s23, 5  ;;  %s1113_s25 = smul.u32 100, %s1511_s13  ;;  %v1330_v35 = vshrl.u32 %v596_v34, 7 }
  0x11   : > { %1059 = vmatprep.subr.mxu0 %v263_v1  ;;  %1110 = vmatprep.subr.mxu1 %v263_v1  ;;  %p214_p7 = scmp.lt.s32.totalorder %s982_s24, 99  ;;  %s984_s26 = sshll.u32 %s1511_s13, 1 }
  0x12   : > { %1060 = vmatpush3.msra.mxu0 %v263_v1  ;;  %1112 = vmatpush3.msra.mxu1 %v263_v1  ;;  %s1259_s29 = scalar_lea.vmem %s1499_s3, %s984_s26  ;;  %v598_v36 = vadd.s32 8, %v1330_v35  ;;  %v631_v40 = vadd.s32 %v1334_v37, %v1330_v35  ;;  %v600_v41 = vadd.s32 24, %v1330_v35  ;;  %v599_v42 = vadd.s32 16, %v1330_v35 }
  0x13   : > { %s1513_s24 = smov (!%p214_p7, %s982_s24), 99  ;;  %v602_v43 = vadd.s32 40, %v1330_v35  ;;  %v601_v45 = vadd.s32 32, %v1330_v35  ;;  %v604_v54 = vadd.s32 56, %v1330_v35  ;;  %v603_v61 = vadd.s32 48, %v1330_v35 }
  0x14   : > { %s217_s30 = sadd.s32 %s1113_s25, %s1513_s24  ;;  %v632_v39 = vadd.s32 %v1334_v37, %v598_v36  ;;  %vm663_vm3 = vcmp.lt.s32.totalorder %v631_v40, 799  ;;  %v634_v48 = vadd.s32 %v1334_v37, %v600_v41  ;;  %v633_v49 = vadd.s32 %v1334_v37, %v599_v42 }
  0x15   : > { %s983_s4 = sshll.u32 %s217_s30, 3  ;;  %v636_v51 = vadd.s32 %v1334_v37, %v602_v43  ;;  %v635_v53 = vadd.s32 %v1334_v37, %v601_v45  ;;  %v606_v63 = vadd.s32 72, %v1330_v35  ;;  %v605_v0 = vadd.s32 64, %v1330_v35 }
  0x16   : > { %s1264_s7 = scalar_lea.vmem %s1496_s0, %s983_s4  ;;  %vm664_vm2 = vcmp.lt.s32.totalorder %v632_v39, 799  ;;  %vm666_vm4 = vcmp.lt.s32.totalorder %v634_v48, 799  ;;  %vm665_vm5 = vcmp.lt.s32.totalorder %v633_v49, 799  ;;  %v610_v43 = vadd.s32 104, %v1330_v35 }
  0x17   : > { %v231_v2 = vld [vmem:[%s1264_s7] sm:$0xff]  ;;  %v232_v3 = vld [vmem:[%s1264_s7 + $0x8] sm:$0xff]  ;;  %v233_v4 = vld [vmem:[%s1264_s7 + $0x10] sm:$0xff]  ;;  %vm668_vm6 = vcmp.lt.s32.totalorder %v636_v51, 799  ;;  %vm667_vm7 = vcmp.lt.s32.totalorder %v635_v53, 799 }
  0x18   : > { %1061 = vmatprep.mubr.msk.f32.mxu0 %vm270_vm1, %v231_v2  ;;  %v234_v5 = vld [vmem:[%s1264_s7 + $0x18] sm:$0xff]  ;;  %v235_v6 = vld [vmem:[%s1264_s7 + $0x20] sm:$0xff]  ;;  %v248_v8 = vld [vmem:[%s1264_s7 + $0x88] sm:$0xff] }
  0x19   : > { %1062 = vmatmul.mubr.msk.f32.vlgmr.msra.gmra.mxu0 %vm270_vm1, %v232_v3  ;;  %v247_v7 = vld [vmem:[%s1264_s7 + $0x80] sm:$0xff]  ;;  %v249_v9 = vld [vmem:[%s1264_s7 + $0x90] sm:$0xff]  ;;  %v236_v10 = vld [vmem:[%s1264_s7 + $0x28] sm:$0xff] }
  0x1a   : > { %1064 = vmatprep.mubr.msk.f32.mxu0 %vm270_vm1, %v233_v4  ;;  %1085 = vmatprep.mubr.msk.f32.mxu1 %vm270_vm1, %v247_v7  ;;  %v237_v11 = vld [vmem:[%s1264_s7 + $0x30] sm:$0xff]  ;;  %v250_v12 = vld [vmem:[%s1264_s7 + $0x98] sm:$0xff]  ;;  %v251_v13 = vld [vmem:[%s1264_s7 + $0xa0] sm:$0xff] }
  0x1b   : > { %1086 = vmatmul.mubr.msk.f32.vlgmr.msra.gmra.mxu1 %vm270_vm1, %v248_v8  ;;  %v238_v14 = vld [vmem:[%s1264_s7 + $0x38] sm:$0xff]  ;;  %v239_v15 = vld [vmem:[%s1264_s7 + $0x40] sm:$0xff]  ;;  %v252_v16 = vld [vmem:[%s1264_s7 + $0xa8] sm:$0xff] }
  0x1c   : > { %1088 = vmatprep.mubr.msk.f32.mxu1 %vm270_vm1, %v249_v9  ;;  %v253_v17 = vld [vmem:[%s1264_s7 + $0xb0] sm:$0xff]  ;;  %v240_v18 = vld [vmem:[%s1264_s7 + $0x48] sm:$0xff]  ;;  %v254_v20 = vld [vmem:[%s1264_s7 + $0xb8] sm:$0xff]  ;;  %v608_v9 = vadd.s32 88, %v1330_v35 }
  0x1d   : > { %1065 = vmatmul.mubr.msk.f32.gmra.mxu0 %vm270_vm1, %v234_v5  ;;  %v241_v19 = vld [vmem:[%s1264_s7 + $0x50] sm:$0xff]  ;;  %v255_v21 = vld [vmem:[%s1264_s7 + $0xc0] sm:$0xff]  ;;  %v242_v22 = vld [vmem:[%s1264_s7 + $0x58] sm:$0xff]  ;;  %v638_v5 = vadd.s32 %v1334_v37, %v604_v54  ;;  %v612_v54 = vadd.s32 120, %v1330_v35 }
  0x1e   : > { %1067 = vmatprep.mubr.msk.f32.mxu0 %vm270_vm1, %v235_v6  ;;  %v243_v23 = vld [vmem:[%s1264_s7 + $0x60] sm:$0xff]  ;;  %v256_v24 = vld [vmem:[%s1264_s7 + $0xc8] sm:$0xff]  ;;  %v257_v25 = vld [vmem:[%s1264_s7 + $0xd0] sm:$0xff] }
  0x1f   : > { %1089 = vmatmul.mubr.msk.f32.gmra.mxu1 %vm270_vm1, %v250_v12  ;;  %v244_v26 = vld [vmem:[%s1264_s7 + $0x68] sm:$0xff]  ;;  %v245_v27 = vld [vmem:[%s1264_s7 + $0x70] sm:$0xff]  ;;  %v258_v28 = vld [vmem:[%s1264_s7 + $0xd8] sm:$0xff]  ;;  %vm670_vm8 = vcmp.lt.s32.totalorder %v638_v5, 799 }
  0x20   : > { %1091 = vmatprep.mubr.msk.f32.mxu1 %vm270_vm1, %v251_v13  ;;  %v259_v29 = vld [vmem:[%s1264_s7 + $0xe0] sm:$0xff]  ;;  %v246_v30 = vld [vmem:[%s1264_s7 + $0x78] sm:$0xff]  ;;  %v260_v31 = vld [vmem:[%s1264_s7 + $0xe8] sm:$0xff] }
  0x21   : > { %1068 = vmatmul.mubr.msk.f32.gmra.mxu0 %vm270_vm1, %v236_v10  ;;  %v261_v32 = vld [vmem:[%s1264_s7 + $0xf0] sm:$0xff]  ;;  %v262_v33 = vld [vmem:[%s1264_s7 + $0xf8] sm:$0xff] }
  0x22   : > { %1070 = vmatprep.mubr.msk.f32.mxu0 %vm270_vm1, %v237_v11 }
  0x23   : > { %1092 = vmatmul.mubr.msk.f32.gmra.mxu1 %vm270_vm1, %v252_v16 }
  0x24   : > { %1094 = vmatprep.mubr.msk.f32.mxu1 %vm270_vm1, %v253_v17  ;;  %v640_v17 = vadd.s32 %v1334_v37, %v606_v63 }
  0x25   : > { %1071 = vmatmul.mubr.msk.f32.gmra.mxu0 %vm270_vm1, %v238_v14 }
  0x26   : > { %1073 = vmatprep.mubr.msk.f32.mxu0 %vm270_vm1, %v239_v15  ;;  %v637_v15 = vadd.s32 %v1334_v37, %v603_v61  ;;  %vm672_vm10 = vcmp.lt.s32.totalorder %v640_v17, 799  ;;  %v644_v61 = vadd.s32 %v1334_v37, %v610_v43 }
  0x27   : > { %1095 = vmatmul.mubr.msk.f32.gmra.mxu1 %vm270_vm1, %v254_v20 }
  0x28   : > { %1097 = vmatprep.mubr.msk.f32.mxu1 %vm270_vm1, %v255_v21  ;;  %vm669_vm9 = vcmp.lt.s32.totalorder %v637_v15, 799  ;;  %vm676_vm14 = vcmp.lt.s32.totalorder %v644_v61, 799  ;;  %v618_v61 = vadd.s32 168, %v1330_v35 }
  0x29   : > { %1074 = vmatmul.mubr.msk.f32.gmra.mxu0 %vm270_vm1, %v240_v18  ;;  %v639_v18 = vadd.s32 %v1334_v37, %v605_v0 }
  0x2a   : > { %1076 = vmatprep.mubr.msk.f32.mxu0 %vm270_vm1, %v241_v19  ;;  %v607_v19 = vadd.s32 80, %v1330_v35 }
  0x2b   : > { %1098 = vmatmul.mubr.msk.f32.gmra.mxu1 %vm270_vm1, %v256_v24  ;;  %vm671_vm11 = vcmp.lt.s32.totalorder %v639_v18, 799 }
  0x2c   : > { %1100 = vmatprep.mubr.msk.f32.mxu1 %vm270_vm1, %v257_v25  ;;  %v641_v36 = vadd.s32 %v1334_v37, %v607_v19 }
  0x2d   : > { %1077 = vmatmul.mubr.msk.f32.gmra.mxu0 %vm270_vm1, %v242_v22 }
  0x2e   : > { %1079 = vmatprep.mubr.msk.f32.mxu0 %vm270_vm1, %v243_v23  ;;  %vm673_vm13 = vcmp.lt.s32.totalorder %v641_v36, 799  ;;  %v615_v36 = vadd.s32 144, %v1330_v35 }
  0x2f   : > { %1101 = vmatmul.mubr.msk.f32.gmra.mxu1 %vm270_vm1, %v258_v28  ;;  %v642_v28 = vadd.s32 %v1334_v37, %v608_v9 }
  0x30   : > { %1103 = vmatprep.mubr.msk.f32.mxu1 %vm270_vm1, %v259_v29 }
  0x31   : > { %1080 = vmatmul.mubr.msk.f32.gmra.mxu0 %vm270_vm1, %v244_v26  ;;  %vm674_vm12 = vcmp.lt.s32.totalorder %v642_v28, 799 }
  0x32   : > { %1082 = vmatprep.mubr.msk.f32.mxu0 %vm270_vm1, %v245_v27 }
  0x33   : > { %1104 = vmatmul.mubr.msk.f32.gmra.mxu1 %vm270_vm1, %v260_v31 }
  0x34   : > { %1106 = vmatprep.mubr.msk.f32.mxu1 %vm270_vm1, %v261_v32 }
  0x35   : > { %1083 = vmatmul.mubr.msk.f32.gmra.mxu0 %vm270_vm1, %v246_v30 }
  0x37   : > { %1107 = vmatmul.mubr.msk.f32.gmra.mxu1 %vm270_vm1, %v262_v33 }
  0xd9   : > { %v1063_v44 = vpop.f32.mrf.mxu0 }
  0xda   : > { %v443_v46 = vadd.f32 %v1063_v44, %v1339_v38 }
  0xdb   : > { %v437_v47 = vpop.f32.mrf.mxu0  ;;  %v1356_v58 = vpop.f32.mrf.mxu1 }
  0xdc   : > { %v438_v50 = vadd.f32 %v1339_v38, %v437_v47  ;;  %v760_v55 = vsel %vm664_vm2, %v443_v46, 0.0 }
  0xdd   : > { %v1066_v52 = vpop.f32.mrf.mxu0  ;;  %v1362_v1 = vpop.f32.mrf.mxu1  ;;  %v829_v2 = vmul.f32 %v760_v55, %v760_v55 }
  0xde   : > { %v759_v56 = vsel %vm663_vm3, %v438_v50, 0.0  ;;  %v453_v57 = vadd.f32 %v1066_v52, %v1339_v38  ;;  %v609_v52 = vadd.s32 96, %v1330_v35 }
  0xdf   : > { %v828_v59 = vmul.f32 %v759_v56, %v759_v56  ;;  %v447_v60 = vpop.f32.mrf.mxu0  ;;  %v791_v3 = vadd.f32 %v760_v55, %v759_v56  ;;  %v1367_v10 = vpop.f32.mrf.mxu1  ;;  %v611_v55 = vadd.s32 112, %v1330_v35 }
  0xe0   : > { %v448_v62 = vadd.f32 %v1339_v38, %v447_v60  ;;  %v762_v6 = vsel %vm666_vm4, %v453_v57, 0.0 }
  0xe1   : > { %v1069_v4 = vpop.f32.mrf.mxu0  ;;  %v860_v11 = vadd.f32 %v829_v2, %v828_v59  ;;  %v1374_v20 = vpop.f32.mrf.mxu1  ;;  %v831_v21 = vmul.f32 %v762_v6, %v762_v6 }
  0xe2   : > { %v761_v7 = vsel %vm665_vm5, %v448_v62, 0.0  ;;  %v463_v8 = vadd.f32 %v1069_v4, %v1339_v38 }
  0xe3   : > { %v792_v12 = vadd.f32 %v791_v3, %v761_v7  ;;  %v830_v13 = vmul.f32 %v761_v7, %v761_v7  ;;  %v457_v14 = vpop.f32.mrf.mxu0  ;;  %v1380_v29 = vpop.f32.mrf.mxu1  ;;  %v614_v3 = vadd.s32 136, %v1330_v35 }
  0xe4   : > { %v458_v16 = vadd.f32 %v1339_v38, %v457_v14  ;;  %v764_v25 = vsel %vm668_vm6, %v463_v8, 0.0  ;;  %v643_v8 = vadd.s32 %v1334_v37, %v609_v52 }
  0xe5   : > { %v861_v22 = vadd.f32 %v860_v11, %v830_v13  ;;  %v793_v23 = vadd.f32 %v792_v12, %v762_v6  ;;  %v1072_v24 = vpop.f32.mrf.mxu0  ;;  %v833_v39 = vmul.f32 %v764_v25, %v764_v25  ;;  %v1385_v44 = vpop.f32.mrf.mxu1  ;;  %v646_v11 = vadd.s32 %v1334_v37, %v612_v54 }
  0xe6   : > { %v763_v26 = vsel %vm667_vm7, %v458_v16, 0.0  ;;  %v473_v27 = vadd.f32 %v1072_v24, %v1339_v38  ;;  %v645_v12 = vadd.s32 %v1334_v37, %v611_v55  ;;  %v613_v13 = vadd.s32 128, %v1330_v35 }
  0xe7   : > { %v794_v30 = vadd.f32 %v793_v23, %v763_v26  ;;  %v832_v31 = vmul.f32 %v763_v26, %v763_v26  ;;  %v862_v32 = vadd.f32 %v861_v22, %v831_v21  ;;  %v467_v33 = vpop.f32.mrf.mxu0  ;;  %v1394_v62 = vpop.f32.mrf.mxu1  ;;  %v648_v23 = vadd.s32 %v1334_v37, %v614_v3 }
  0xe8   : > { %v468_v34 = vadd.f32 %v1339_v38, %v467_v33  ;;  %v766_v45 = vsel %vm670_vm8, %v473_v27, 0.0  ;;  %vm675_vm15 = vcmp.lt.s32.totalorder %v643_v8, 799  ;;  %vm678_vm0 = vcmp.lt.s32.totalorder %v646_v11, 799 }
  0xe9   : > { %v863_v40 = vadd.f32 %v862_v32, %v832_v31  ;;  %v795_v41 = vadd.f32 %v794_v30, %v764_v25  ;;  %v1075_v42 = vpop.f32.mrf.mxu0  ;;  %v835_v56 = vmul.f32 %v766_v45, %v766_v45  ;;  %v1405_v18 = vpop.f32.mrf.mxu1  ;;  %vm677_vm1 = vcmp.lt.s32.totalorder %v645_v12, 799 }
  0xea   : > { %v765_v46 = vsel %vm669_vm9, %v468_v34, 0.0  ;;  %v483_v47 = vadd.f32 %v1075_v42, %v1339_v38  ;;  %v647_v31 = vadd.s32 %v1334_v37, %v613_v13  ;;  %vm680_vm2 = vcmp.lt.s32.totalorder %v648_v23, 799 }
  0xeb   : > { %v796_v48 = vadd.f32 %v795_v41, %v765_v46  ;;  %v834_v49 = vmul.f32 %v765_v46, %v765_v46  ;;  %v864_v50 = vadd.f32 %v863_v40, %v833_v39  ;;  %v477_v51 = vpop.f32.mrf.mxu0  ;;  %v1414_v39 = vpop.f32.mrf.mxu1  ;;  %v649_v55 = vadd.s32 %v1334_v37, %v615_v36 }
  0xec   : > { %v478_v53 = vadd.f32 %v1339_v38, %v477_v51  ;;  %v768_v63 = vsel %vm672_vm10, %v483_v47, 0.0  ;;  %vm679_vm3 = vcmp.lt.s32.totalorder %v647_v31, 799  ;;  %v617_v51 = vadd.s32 160, %v1330_v35 }
  0xed   : > { %v865_v57 = vadd.f32 %v864_v50, %v834_v49  ;;  %v797_v59 = vadd.f32 %v796_v48, %v766_v45  ;;  %v1078_v60 = vpop.f32.mrf.mxu0  ;;  %v837_v14 = vmul.f32 %v768_v63, %v768_v63  ;;  %v616_v48 = vadd.s32 152, %v1330_v35 }
  0xee   : > { %v767_v0 = vsel %vm671_vm11, %v478_v53, 0.0  ;;  %v493_v2 = vadd.f32 %v1078_v60, %v1339_v38  ;;  %v518_v50 = vadd.f32 %v1339_v38, %v1362_v1  ;;  %v523_v60 = vadd.f32 %v1356_v58, %v1339_v38 }
  0xef   : > { %v798_v4 = vadd.f32 %v797_v59, %v767_v0  ;;  %v836_v5 = vmul.f32 %v767_v0, %v767_v0  ;;  %v866_v6 = vadd.f32 %v865_v57, %v835_v56  ;;  %v487_v7 = vpop.f32.mrf.mxu0  ;;  %v557_v56 = vpop.f32.mrf.mxu1  ;;  %vm681_vm4 = vcmp.lt.s32.totalorder %v649_v55, 799 }
  0xf0   : > { %v488_v9 = vadd.f32 %v1339_v38, %v487_v7  ;;  %v770_v19 = vsel %vm674_vm12, %v493_v2, 0.0  ;;  %v650_v2 = vadd.s32 %v1334_v37, %v616_v48  ;;  %v775_v3 = vsel %vm679_vm3, %v518_v50, 0.0 }
  0xf1   : > { %v867_v15 = vadd.f32 %v866_v6, %v836_v5  ;;  %v799_v16 = vadd.f32 %v798_v4, %v768_v63  ;;  %v1081_v17 = vpop.f32.mrf.mxu0  ;;  %v839_v32 = vmul.f32 %v770_v19, %v770_v19  ;;  %v528_v4 = vadd.f32 %v1339_v38, %v1374_v20  ;;  %v1434_v58 = vpop.f32.mrf.mxu1 }
  0xf2   : > { %v769_v21 = vsel %vm673_vm13, %v488_v9, 0.0  ;;  %v503_v22 = vadd.f32 %v1081_v17, %v1339_v38  ;;  %v651_v5 = vadd.s32 %v1334_v37, %v617_v51  ;;  %v619_v6 = vadd.s32 176, %v1330_v35 }
  0xf3   : > { %v800_v24 = vadd.f32 %v799_v16, %v769_v21  ;;  %v838_v25 = vmul.f32 %v769_v21, %v769_v21  ;;  %v868_v26 = vadd.f32 %v867_v15, %v837_v14  ;;  %v497_v27 = vpop.f32.mrf.mxu0  ;;  %v776_v11 = vsel %vm680_vm2, %v523_v60, 0.0 }
  0xf4   : > { %v498_v30 = vadd.f32 %v1339_v38, %v497_v27  ;;  %v772_v40 = vsel %vm676_vm14, %v503_v22, 0.0  ;;  %v533_v12 = vadd.f32 %v1367_v10, %v1339_v38  ;;  %v652_v13 = vadd.s32 %v1334_v37, %v618_v61 }
  0xf5   : > { %v869_v28 = vadd.f32 %v868_v26, %v838_v25  ;;  %v801_v33 = vadd.f32 %v800_v24, %v770_v19  ;;  %v1084_v34 = vpop.f32.mrf.mxu0  ;;  %v841_v52 = vmul.f32 %v772_v40, %v772_v40  ;;  %v620_v14 = vadd.s32 184, %v1330_v35  ;;  %v567_v25 = vpop.f32.mrf.mxu1 }
  0xf6   : > { %v771_v41 = vsel %vm675_vm15, %v498_v30, 0.0  ;;  %v513_v42 = vadd.f32 %v1084_v34, %v1339_v38  ;;  %v844_v15 = vmul.f32 %v775_v3, %v775_v3  ;;  %vm682_vm5 = vcmp.lt.s32.totalorder %v650_v2, 799 }
  0xf7   : > { %v802_v43 = vadd.f32 %v801_v33, %v771_v41  ;;  %v840_v45 = vmul.f32 %v771_v41, %v771_v41  ;;  %v870_v46 = vadd.f32 %v869_v28, %v839_v32  ;;  %v507_v47 = vpop.f32.mrf.mxu0  ;;  %v777_v17 = vsel %vm681_vm4, %v528_v4, 0.0 }
  0xf8   : > { %v508_v49 = vadd.f32 %v1339_v38, %v507_v47  ;;  %v774_v57 = vsel %vm678_vm0, %v513_v42, 0.0  ;;  %v538_v19 = vadd.f32 %v1339_v38, %v1385_v44  ;;  %vm683_vm6 = vcmp.lt.s32.totalorder %v651_v5, 799 }
  0xf9   : > { %v871_v53 = vadd.f32 %v870_v46, %v840_v45  ;;  %v803_v54 = vadd.f32 %v802_v43, %v772_v40  ;;  %v843_v7 = vmul.f32 %v774_v57, %v774_v57  ;;  %v653_v21 = vadd.s32 %v1334_v37, %v619_v6  ;;  %v1105_v43 = vpop.f32.mrf.mxu1 }
  0xfa   : > { %v773_v59 = vsel %vm677_vm1, %v508_v49, 0.0  ;;  %v845_v22 = vmul.f32 %v776_v11, %v776_v11  ;;  %v621_v10 = vadd.s32 192, %v1330_v35  ;;  %v778_v26 = vsel %vm682_vm5, %v533_v12, 0.0 }
  0xfb   : > { %v804_v63 = vadd.f32 %v803_v54, %v773_v59  ;;  %v842_v1 = vmul.f32 %v773_v59, %v773_v59  ;;  %v872_v0 = vadd.f32 %v871_v53, %v841_v52  ;;  %v543_v27 = vadd.f32 %v1380_v29, %v1339_v38 }
  0xfc   : > { %vm684_vm7 = vcmp.lt.s32.totalorder %v652_v13, 799  ;;  %v654_v30 = vadd.s32 %v1334_v37, %v620_v14  ;;  %v846_v32 = vmul.f32 %v777_v17, %v777_v17  ;;  %v622_v44 = vadd.s32 200, %v1330_v35 }
  0xfd   : > { %v873_v8 = vadd.f32 %v872_v0, %v842_v1  ;;  %v805_v9 = vadd.f32 %v804_v63, %v774_v57  ;;  %v779_v33 = vsel %vm683_vm6, %v538_v19, 0.0  ;;  %v548_v34 = vadd.f32 %v1339_v38, %v1405_v18 }
  0xfe   : > { %vm685_vm8 = vcmp.lt.s32.totalorder %v653_v21, 799  ;;  %v623_v36 = vadd.s32 208, %v1330_v35  ;;  %v847_v40 = vmul.f32 %v778_v26, %v778_v26  ;;  %v655_v29 = vadd.s32 %v1334_v37, %v621_v10 }
  0xff   : > { %v806_v20 = vadd.f32 %v805_v9, %v775_v3  ;;  %v874_v16 = vadd.f32 %v873_v8, %v843_v7  ;;  %v780_v45 = vsel %vm684_vm7, %v543_v27, 0.0  ;;  %v553_v46 = vadd.f32 %v1394_v62, %v1339_v38  ;;  %v577_v62 = vpop.f32.mrf.mxu1 }
 0x100   : > { %vm686_vm9 = vcmp.lt.s32.totalorder %v654_v30, 799  ;;  %v624_v47 = vadd.s32 216, %v1330_v35  ;;  %v848_v49 = vmul.f32 %v779_v33, %v779_v33  ;;  %v656_v18 = vadd.s32 %v1334_v37, %v622_v44 }
 0x101   : > { %v875_v23 = vadd.f32 %v874_v16, %v844_v15  ;;  %v807_v24 = vadd.f32 %v806_v20, %v776_v11  ;;  %v781_v51 = vsel %vm685_vm8, %v548_v34, 0.0  ;;  %v558_v52 = vadd.f32 %v1339_v38, %v557_v56  ;;  %v1108_v9 = vpop.f32.mrf.mxu1 }
 0x102   : > { %v657_v53 = vadd.s32 %v1334_v37, %v623_v36  ;;  %v625_v54 = vadd.s32 224, %v1330_v35  ;;  %v849_v55 = vmul.f32 %v780_v45, %v780_v45  ;;  %vm687_vm10 = vcmp.lt.s32.totalorder %v655_v29, 799 }
 0x103   : > { %v808_v31 = vadd.f32 %v807_v24, %v777_v17  ;;  %v876_v28 = vadd.f32 %v875_v23, %v845_v22  ;;  %v782_v60 = vsel %vm686_vm9, %v553_v46, 0.0  ;;  %v563_v61 = vadd.f32 %v1414_v39, %v1339_v38  ;;  %v587_v24 = vpop.f32.mrf.mxu1 }
 0x104   : > { %v658_v63 = vadd.s32 %v1334_v37, %v624_v47  ;;  %v626_v1 = vadd.s32 232, %v1330_v35  ;;  %v850_v2 = vmul.f32 %v781_v51, %v781_v51  ;;  %vm688_vm11 = vcmp.lt.s32.totalorder %v656_v18, 799 }
 0x105   : > { %v877_v41 = vadd.f32 %v876_v28, %v846_v32  ;;  %v809_v42 = vadd.f32 %v808_v31, %v778_v26  ;;  %v783_v3 = vsel %vm687_vm10, %v558_v52, 0.0  ;;  %v568_v4 = vadd.f32 %v1339_v38, %v567_v25 }
 0x106   : > { %vm689_vm12 = vcmp.lt.s32.totalorder %v657_v53, 799  ;;  %v659_v5 = vadd.s32 %v1334_v37, %v625_v54  ;;  %v851_v6 = vmul.f32 %v782_v60, %v782_v60  ;;  %v627_v39 = vadd.s32 240, %v1330_v35 }
 0x107   : > { %v810_v48 = vadd.f32 %v809_v42, %v779_v33  ;;  %v878_v50 = vadd.f32 %v877_v41, %v847_v40  ;;  %v784_v11 = vsel %vm688_vm11, %v563_v61, 0.0  ;;  %v573_v12 = vadd.f32 %v1434_v58, %v1339_v38 }
 0x108   : > { %vm690_vm13 = vcmp.lt.s32.totalorder %v658_v63, 799  ;;  %v660_v13 = vadd.s32 %v1334_v37, %v626_v1  ;;  %v852_v20 = vmul.f32 %v783_v3, %v783_v3  ;;  %v628_v16 = vadd.s32 248, %v1330_v35 }
 0x109   : > { %v879_v57 = vadd.f32 %v878_v50, %v848_v49  ;;  %v811_v59 = vadd.f32 %v810_v48, %v780_v45  ;;  %v785_v17 = vsel %vm689_vm12, %v568_v4, 0.0  ;;  %v578_v19 = vadd.f32 %v1339_v38, %v577_v62 }
 0x10a   : > { %vm691_vm14 = vcmp.lt.s32.totalorder %v659_v5, 799  ;;  %v853_v21 = vmul.f32 %v784_v11, %v784_v11  ;;  %v661_v10 = vadd.s32 %v1334_v37, %v627_v39  ;;  %v786_v25 = vsel %vm690_vm13, %v573_v12, 0.0 }
 0x10b   : > { %v812_v0 = vadd.f32 %v811_v59, %v781_v51  ;;  %v880_v56 = vadd.f32 %v879_v57, %v849_v55  ;;  %v583_v58 = vadd.f32 %v1105_v43, %v1339_v38  ;;  %vm692_vm15 = vcmp.lt.s32.totalorder %v660_v13, 799 }
 0x10c   : > { %v854_v27 = vmul.f32 %v785_v17, %v785_v17  ;;  %v662_v31 = vadd.s32 %v1334_v37, %v628_v16  ;;  %v787_v35 = vsel %vm691_vm14, %v578_v19, 0.0  ;;  %v588_v32 = vadd.f32 %v1339_v38, %v587_v24 }
 0x10d   : > { %v881_v7 = vadd.f32 %v880_v56, %v850_v2  ;;  %v813_v8 = vadd.f32 %v812_v0, %v782_v60  ;;  %v855_v28 = vmul.f32 %v786_v25, %v786_v25  ;;  %vm693_vm0 = vcmp.lt.s32.totalorder %v661_v10, 799 }
 0x10e   : > { %v788_v34 = vsel %vm692_vm15, %v583_v58, 0.0  ;;  %v593_v36 = vadd.f32 %v1108_v9, %v1339_v38  ;;  %v856_v41 = vmul.f32 %v787_v35, %v787_v35  ;;  %vm694_vm1 = vcmp.lt.s32.totalorder %v662_v31, 799 }
 0x10f   : > { %v814_v14 = vadd.f32 %v813_v8, %v783_v3  ;;  %v882_v15 = vadd.f32 %v881_v7, %v851_v6  ;;  %v789_v29 = vsel %vm693_vm0, %v588_v32, 0.0  ;;  %v857_v43 = vmul.f32 %v788_v34, %v788_v34 }
 0x110   : > { %v790_v47 = vsel %vm694_vm1, %v593_v36, 0.0  ;;  %v858_v48 = vmul.f32 %v789_v29, %v789_v29  ;;  %vm897_vm2 = vcmask 1040384  }
 0x111   : > { %v883_v22 = vadd.f32 %v882_v15, %v852_v20  ;;  %v815_v23 = vadd.f32 %v814_v14, %v784_v11  ;;  %v859_v50 = vmul.f32 %v790_v47, %v790_v47 }
 0x113   : > { %v816_v26 = vadd.f32 %v815_v23, %v785_v17  ;;  %v884_v30 = vadd.f32 %v883_v22, %v853_v21 }
 0x115   : > { %v885_v44 = vadd.f32 %v884_v30, %v854_v27  ;;  %v817_v33 = vadd.f32 %v816_v26, %v786_v25 }
 0x117   : > { %v818_v40 = vadd.f32 %v817_v33, %v787_v35  ;;  %v886_v42 = vadd.f32 %v885_v44, %v855_v28 }
 0x119   : > { %v887_v45 = vadd.f32 %v886_v42, %v856_v41  ;;  %v819_v46 = vadd.f32 %v818_v40, %v788_v34 }
 0x11b   : > { %v820_v37 = vadd.f32 %v819_v46, %v789_v29  ;;  %v888_v49 = vadd.f32 %v887_v45, %v857_v43 }
 0x11d   : > { %v821_v18 = vadd.f32 %v820_v37, %v790_v47  ;;  %v889_v51 = vadd.f32 %v888_v49, %v858_v48 }
 0x11f   : > { %v822_v52 = vrot.slane %v821_v18, 4  ;;  %v890_v53 = vadd.f32 %v889_v51, %v859_v50 }
 0x121   : > { %v823_v54 = vadd.f32 %v822_v52, %v821_v18  ;;  %v891_v55 = vrot.slane %v890_v53, 4 }
 0x123   : > { %v824_v38 = vrot.slane %v823_v54, 2  ;;  %v892_v57 = vadd.f32 %v891_v55, %v890_v53 }
 0x125   : > { %v825_v59 = vadd.f32 %v824_v38, %v823_v54  ;;  %v893_v62 = vrot.slane %v892_v57, 2 }
 0x127   : > { %v826_v60 = vrot.slane %v825_v59, 1  ;;  %v894_v61 = vadd.f32 %v893_v62, %v892_v57 }
 0x129   : > { %v895_v63 = vrot.slane %v894_v61, 1  ;;  %v827_v1 = vadd.f32 %v826_v60, %v825_v59  ;;  %902 = sbr.rel (%p1020_p8) target bundleno = 304 (0x130), region = 36 }
 0x12b   : > { %v896_v0 = vadd.f32 %v895_v63, %v894_v61 }
 0x12d   : > { %v898_v2 = vsel %vm897_vm2, %v827_v1, %v896_v0 }
 0x12e   : > { %v1195_v56 = vmov 0.0  }
 0x12f   : > { %903 = vst [vmem:[%s1259_s29] sm:$0x3] %v1195_v56 }
 0x130 PF:  {}
 0x136   : > { %v904_v3 = vld [vmem:[%s1259_s29] sm:$0x3] }
 0x137   : > { %v905_v4 = vadd.f32 %v904_v3, %v898_v2 }
 0x139   : > { %906 = vst [vmem:[%s1259_s29] sm:$0x3] %v905_v4 }
 0x13a PF: > { %s13_s16 = sadd.s32 1, %s1193_s16   ;;  %s1500_s12 = smov %s1185_s14 }
 0x13b   : > { %p10_p9 = scmp.ge.s32.totalorder %s13_s16, 10   ;;  %s1501_s13 = smov %s1189_s15 }
 0x13c   : > { %s1502_s14 = smov %s1505_s17  ;;  %s1503_s15 = smov %s1509_s18 }
 0x13d   :  { %12 = sbr.rel (!%p10_p9) target bundleno = 3 (0x3), region = 66 }

// kernel: hubert_feature_encoder.5
= control target key start
LH: loop header
LB: loop body
LE: loop exit
PB: predicated region body
PF: predicated region fallthrough
CT: control target
= control target key end

     0   :  { %s2335_s15 = smov 0   ;;  %s2337_s16 = smov 0   ;;  %s3101_s0 = inlined_call_operand.vmem [shape: f32[2,799,10], index: 0, kind: input, shape index: {}]   ;;  %s3102_s1 = inlined_call_operand.vmem [shape: f32[2,2,128], index: 1, kind: input, shape index: {}]   ;;  %s3103_s2 = inlined_call_operand.vmem [shape: f32[10,128], index: 2, kind: input, shape index: {}]   ;;  %s3104_s3 = inlined_call_operand.vmem [shape: f32[3,128], index: 3, kind: input, shape index: {}]   ;;  %s3105_s4 = inlined_call_operand.vmem [shape: bf16[2,800,128], index: 4, kind: output, shape index: {}]  }
   0x1   :  { %s2339_s17 = smov 0   ;;  %s2341_s18 = smov 0  }
   0x2   :  { %s2343_s19 = smov 0   ;;  %s2345_s20 = smov 0  }
   0x3   :  { %s2347_s21 = smov 0  }
   0x4 LB: > { %s23_s22 = sadd.s32 1, %s2268_s19  ;;  %s26_s23 = sadd.s32 1, %s2272_s20  ;;  %s2276_s21 = sphi %s2347_s21, %s14_s21   ;;  %s2272_s20 = sphi %s2345_s20, %s3115_s20   ;;  %s2268_s19 = sphi %s2343_s19, %s3114_s19   ;;  %s2264_s18 = sphi %s2341_s18, %s3113_s18   ;;  %s2260_s17 = sphi %s2339_s17, %s3112_s17   ;;  %s2256_s16 = sphi %s2337_s16, %s3111_s16   ;;  %s2252_s15 = sphi %s2335_s15, %s3110_s15  }
   0x5   : > { %p24_p0 = scmp.ge.s32.totalorder %s23_s22, 4  ;;  %s1688_s24 = sadd.s32 4294967295, %s2276_s21  }
   0x6   : > { %p145_p1 = scmp.ne.s32.totalorder %s2256_s16, %s2252_s15  ;;  %p146_p2 = scmp.eq.s32.totalorder %s1688_s24, 7 }
   0x7   : > { %s3117_s22 = smov (%p24_p0, %s23_s22), 0  ;;  %s3119_s23 = smov (!%p24_p0, %s26_s23), %s2272_s20 }
   0x8   : > { %s131_s25 = ssub.s32 %s2268_s19, %s3117_s22  ;;  %p28_p3 = scmp.ge.s32.totalorder %s3119_s23, 2 }
   0x9   : > { %p1692_p4 = scmp.ge.s32.totalorder %s2276_s21, 1  ;;  %p2381_p5 = por %p146_p2, %p145_p1 }
   0xa   : > { %p208_p6 = scmp.lt.s32.totalorder %s2276_s21, 9  ;;  %s3121_s23 = smov (%p28_p3, %s3119_s23), 0 }
   0xb   : > { %s130_s27 = ssub.s32 %s2272_s20, %s3121_s23  ;;  %s135_s29 = sadd.s32 1, %s2256_s16 }
   0xc   : > { %p209_p7 = pnand %p1692_p4, %p208_p6  ;;  %s132_s28 = sor.u32 %s131_s25, %s130_s27 }
   0xd   : > { %p133_p8 = scmp.eq.s32.totalorder %s132_s28, 0  ;;  %p247_p9 = scmp.lt.s32.totalorder (!%p209_p7), %s2260_s17, 3 }
   0xe   : > { %212 = sbr.rel (%p209_p7) target bundleno = 399 (0x18f), region = 36  ;;  %p254_p10 = scmp.lt.s32.totalorder (!%p209_p7), %s2264_s18, 1 }
   0xf   : > { %s2392_s30 = scalar_select %p133_p8, %s2256_s16, %s135_s29  }
  0x10   : > { %s1733_s7 = sshll.u32 (!%p209_p7), %s2260_s17, 8 }
  0x13   : > { %v311_v0 = vld [vmem:[%s3103_s2 + $0x8] sm:$0x3]  ;;  %vm414_vm0 = vcmask 1041408   ;;  %v310_v1 = vld [vmem:[%s3103_s2] sm:$0xff]  ;;  %s248_s9 = scalar_select %p247_p9, %s2260_s17, 3  ;;  %vm317_vm1 = vcmask 80896   ;;  %v651_v41 = vlaneseq  ;;  %v2488_v49 = vstv %s1733_s7 }
  0x14   : > { %1946 = vmatprep.subr.msk.mxu0 %vm414_vm0, %v311_v0  ;;  %1998 = vmatprep.subr.msk.mxu1 %vm414_vm0, %v311_v0  ;;  %s2404_s10 = scalar_select %p254_p10, %s2264_s18, 1 }
  0x15   : > { %1947 = vmatpush3.msk.msra.mxu0 %vm414_vm0, %v311_v0  ;;  %2000 = vmatpush3.msk.msra.mxu1 %vm414_vm0, %v311_v0  ;;  %s1694_s11 = sshll.u32 %s248_s9, 5  ;;  %v2480_v42 = vshrl.u32 %v651_v41, 7  ;;  %s1767_s25 = sshll.u32 (%p2381_p5), %s2260_s17, 5 }
  0x16   : > { %1948 = vmatprep.subr.mxu0 %v310_v1  ;;  %1999 = vmatprep.subr.mxu1 %v310_v1  ;;  %p256_p11 = scmp.lt.s32.totalorder %s1694_s11, 99  ;;  %s2002_s12 = smul.u32 100, %s2404_s10 }
  0x17   : > { %1949 = vmatpush3.msra.mxu0 %v310_v1  ;;  %2001 = vmatpush3.msra.mxu1 %v310_v1  ;;  %s1696_s28 = sshll.u32 %s2404_s10, 1  ;;  %v653_v43 = vsub.s32 0, %v2480_v42  ;;  %v691_v44 = vsub.s32 1, %v2480_v42  ;;  %v961_v46 = vadd.s32 8, %v2480_v42  ;;  %v977_v47 = vadd.s32 136, %v2480_v42 }
  0x18   : > { %s3123_s11 = smov (!%p256_p11, %s1694_s11), 99  ;;  %s272_s6 = scalar_lea.vmem %s3102_s1, %s1696_s28  ;;  %v976_v48 = vadd.s32 128, %v2480_v42  ;;  %v963_v50 = vadd.s32 24, %v2480_v42  ;;  %v979_v51 = vadd.s32 152, %v2480_v42  ;;  %v962_v54 = vadd.s32 16, %v2480_v42 }
  0x19   : > { %s259_s13 = sadd.s32 %s2002_s12, %s3123_s11  ;;  %v643_v34 = vld [vmem:[%s272_s6] sm:$0x3]  ;;  %v978_v55 = vadd.s32 144, %v2480_v42  ;;  %v965_v56 = vadd.s32 40, %v2480_v42  ;;  %v981_v57 = vadd.s32 168, %v2480_v42  ;;  %v2501_v58 = vadd.s32 %v2488_v49, %v961_v46  ;;  %s1322_s28 = ssub.s32 (%p2381_p5), 100, %s1767_s25 }
  0x1a   : > { %s1695_s14 = sshll.u32 %s259_s13, 3  ;;  %v644_v35 = vmul.f32 0.0012515645, %v643_v34  ;;  %v2504_v59 = vadd.s32 %v2488_v49, %v977_v47  ;;  %v2508_v60 = vadd.s32 %v2488_v49, %v2480_v42  ;;  %v2511_v61 = vadd.s32 %v2488_v49, %v976_v48  ;;  %p1323_p12 = scmp.lt.s32.totalorder (%p2381_p5), %s1322_s28, 32 }
  0x1b   : > { %s2410_s27 = scalar_lea.vmem %s3101_s0, %s1695_s14  ;;  %v2514_v62 = vadd.s32 %v2488_v49, %v963_v50  ;;  %v2517_v63 = vadd.s32 %v2488_v49, %v979_v51  ;;  %v964_v0 = vadd.s32 32, %v2480_v42  ;;  %v980_v1 = vadd.s32 160, %v2480_v42  ;;  %s244_s14 = sand.u32 1, %s2252_s15  }
  0x1c   : > { %v278_v2 = vld [vmem:[%s2410_s27] sm:$0xff]  ;;  %v279_v4 = vld [vmem:[%s2410_s27 + $0x8] sm:$0xff]  ;;  %v280_v6 = vld [vmem:[%s2410_s27 + $0x10] sm:$0xff]  ;;  %v645_v36 = vmul.f32 %v644_v35, %v644_v35  ;;  %v2492_v52 = vrot.slane %v644_v35, %v653_v43  ;;  %v971_v48 = vadd.s32 88, %v2480_v42  ;;  %v987_v50 = vadd.s32 216, %v2480_v42  ;;  %s2694_s15 = sshll.u32 %s244_s14, 7 }
  0x1d   : > { %v294_v3 = vld [vmem:[%s2410_s27 + $0x80] sm:$0xff]  ;;  %1950 = vmatprep.mubr.msk.f32.mxu0 %vm317_vm1, %v278_v2  ;;  %v295_v5 = vld [vmem:[%s2410_s27 + $0x88] sm:$0xff]  ;;  %v296_v7 = vld [vmem:[%s2410_s27 + $0x90] sm:$0xff]  ;;  %vm1027_vm2 = vcmp.lt.s32.totalorder %v2501_v58, 799  ;;  %vm1026_vm3 = vcmp.lt.s32.totalorder %v2508_v60, 799  ;;  %vm1043_vm4 = vcmp.lt.s32.totalorder %v2504_v59, 799 }
  0x1e   : > { %1974 = vmatprep.mubr.msk.f32.mxu1 %vm317_vm1, %v294_v3  ;;  %1951 = vmatmul.mubr.msk.f32.vlgmr.msra.gmra.mxu0 %vm317_vm1, %v279_v4  ;;  %v281_v8 = vld [vmem:[%s2410_s27 + $0x18] sm:$0xff]  ;;  %v282_v10 = vld [vmem:[%s2410_s27 + $0x20] sm:$0xff]  ;;  %v283_v12 = vld [vmem:[%s2410_s27 + $0x28] sm:$0xff]  ;;  %v647_v37 = vrot.slane %v645_v36, 7  ;;  %v967_v3 = vadd.s32 56, %v2480_v42  ;;  %v983_v4 = vadd.s32 184, %v2480_v42 }
  0x1f   : > { %1975 = vmatmul.mubr.msk.f32.vlgmr.msra.gmra.mxu1 %vm317_vm1, %v295_v5  ;;  %1953 = vmatprep.mubr.msk.f32.mxu0 %vm317_vm1, %v280_v6  ;;  %v297_v9 = vld [vmem:[%s2410_s27 + $0x98] sm:$0xff]  ;;  %v298_v11 = vld [vmem:[%s2410_s27 + $0xa0] sm:$0xff]  ;;  %v299_v13 = vld [vmem:[%s2410_s27 + $0xa8] sm:$0xff]  ;;  %v966_v5 = vadd.s32 48, %v2480_v42  ;;  %v982_v6 = vadd.s32 176, %v2480_v42  ;;  %vm1042_vm5 = vcmp.lt.s32.totalorder %v2511_v61, 799 }
  0x20   : > { %1977 = vmatprep.mubr.msk.f32.mxu1 %vm317_vm1, %v296_v7  ;;  %v284_v14 = vld [vmem:[%s2410_s27 + $0x30] sm:$0xff]  ;;  %v285_v16 = vld [vmem:[%s2410_s27 + $0x38] sm:$0xff]  ;;  %v286_v18 = vld [vmem:[%s2410_s27 + $0x40] sm:$0xff]  ;;  %v649_v38 = vsub.f32 %v644_v35, %v647_v37  ;;  %v2531_v7 = vadd.s32 %v2488_v49, %v962_v54  ;;  %vm1029_vm6 = vcmp.lt.s32.totalorder %v2514_v62, 799  ;;  %vm1045_vm7 = vcmp.lt.s32.totalorder %v2517_v63, 799  ;;  %s2717_s24 = scalar_lea.vmem [#allocation2], %s2694_s15  }
  0x21   : > { %v300_v15 = vld [vmem:[%s2410_s27 + $0xb0] sm:$0xff]  ;;  %v301_v17 = vld [vmem:[%s2410_s27 + $0xb8] sm:$0xff]  ;;  %v302_v19 = vld [vmem:[%s2410_s27 + $0xc0] sm:$0xff] }
  0x22   : > { %1954 = vmatmul.mubr.msk.f32.gmra.mxu0 %vm317_vm1, %v281_v8  ;;  %v287_v20 = vld [vmem:[%s2410_s27 + $0x48] sm:$0xff]  ;;  %v288_v22 = vld [vmem:[%s2410_s27 + $0x50] sm:$0xff]  ;;  %v289_v24 = vld [vmem:[%s2410_s27 + $0x58] sm:$0xff]  ;;  %v650_v39 = vmax.f32 %v649_v38, 0.0  ;;  %v2534_v8 = vadd.s32 %v2488_v49, %v978_v55  ;;  %vm1028_vm8 = vcmp.lt.s32.totalorder %v2531_v7, 799 }
  0x23   : > { %1978 = vmatmul.mubr.msk.f32.gmra.mxu1 %vm317_vm1, %v297_v9  ;;  %1956 = vmatprep.mubr.msk.f32.mxu0 %vm317_vm1, %v282_v10  ;;  %v303_v21 = vld [vmem:[%s2410_s27 + $0xc8] sm:$0xff]  ;;  %v304_v23 = vld [vmem:[%s2410_s27 + $0xd0] sm:$0xff]  ;;  %v305_v25 = vld [vmem:[%s2410_s27 + $0xd8] sm:$0xff]  ;;  %v2537_v9 = vadd.s32 %v2488_v49, %v965_v56  ;;  %v2540_v10 = vadd.s32 %v2488_v49, %v981_v57 }
  0x24   : > { %1980 = vmatprep.mubr.msk.f32.mxu1 %vm317_vm1, %v298_v11  ;;  %v290_v26 = vld [vmem:[%s2410_s27 + $0x60] sm:$0xff]  ;;  %v291_v28 = vld [vmem:[%s2410_s27 + $0x68] sm:$0xff]  ;;  %v292_v30 = vld [vmem:[%s2410_s27 + $0x70] sm:$0xff]  ;;  %v687_v40 = vadd.f32 1e-05, %v650_v39  ;;  %vm1044_vm9 = vcmp.lt.s32.totalorder %v2534_v8, 799 }
  0x25   : > { %v306_v27 = vld [vmem:[%s2410_s27 + $0xe0] sm:$0xff]  ;;  %v307_v29 = vld [vmem:[%s2410_s27 + $0xe8] sm:$0xff]  ;;  %v308_v31 = vld [vmem:[%s2410_s27 + $0xf0] sm:$0xff]  ;;  %vm1031_vm10 = vcmp.lt.s32.totalorder %v2537_v9, 799  ;;  %vm1047_vm12 = vcmp.lt.s32.totalorder %v2540_v10, 799 }
  0x26   : > { %1957 = vmatmul.mubr.msk.f32.gmra.mxu0 %vm317_vm1, %v283_v12  ;;  %v293_v32 = vld [vmem:[%s2410_s27 + $0x78] sm:$0xff]  ;;  %2124 = vrsqrt.f32 %v687_v40  ;;  %v2524_v2 = vld [vmem:[%s3104_s3] ss:$0 sm:$0xff]  ;;  %v2594_v43 = vld [vmem:[%s3104_s3 + $0x2] ss:$0 sm:$0xff] }
  0x27   : > { %1981 = vmatmul.mubr.msk.f32.gmra.mxu1 %vm317_vm1, %v299_v13  ;;  %1959 = vmatprep.mubr.msk.f32.mxu0 %vm317_vm1, %v284_v14  ;;  %v309_v33 = vld [vmem:[%s2410_s27 + $0xf8] sm:$0xff]  ;;  %v969_v13 = vadd.s32 72, %v2480_v42  ;;  %v985_v14 = vadd.s32 200, %v2480_v42  ;;  %s2003_s27 = smul.u32 (%p2381_p5), 100, %s2264_s18 }
  0x28   : > { %1983 = vmatprep.mubr.msk.f32.mxu1 %vm317_vm1, %v300_v15  ;;  %v968_v15 = vadd.s32 64, %v2480_v42 }
  0x29   : > { %v2576_v34 = vadd.s32 %v2488_v49, %v969_v13  ;;  %v2579_v35 = vadd.s32 %v2488_v49, %v985_v14  ;;  %s1328_s29 = sadd.s32 (%p2381_p5), %s2003_s27, %s1767_s25 }
  0x2a   : > { %1960 = vmatmul.mubr.msk.f32.gmra.mxu0 %vm317_vm1, %v285_v16  ;;  %v984_v16 = vadd.s32 192, %v2480_v42  ;;  %v2582_v36 = vadd.s32 %v2488_v49, %v968_v15  ;;  %s1770_s5 = sshll.u32 (%p2381_p5), %s1328_s29, 2 }
  0x2b   : > { %1984 = vmatmul.mubr.msk.f32.gmra.mxu1 %vm317_vm1, %v301_v17  ;;  %1962 = vmatprep.mubr.msk.f32.mxu0 %vm317_vm1, %v286_v18  ;;  %s2964_s8 = scalar_lea.vmem (%p2381_p5), %s3105_s4, %s1770_s5  }
  0x2c   : > { %1986 = vmatprep.mubr.msk.f32.mxu1 %vm317_vm1, %v302_v19  ;;  %v2549_v19 = vadd.s32 %v2488_v49, %v964_v0  ;;  %v2585_v37 = vadd.s32 %v2488_v49, %v984_v16 }
  0x2e   : > { %1963 = vmatmul.mubr.msk.f32.gmra.mxu0 %vm317_vm1, %v287_v20  ;;  %v2552_v20 = vadd.s32 %v2488_v49, %v980_v1  ;;  %vm1030_vm11 = vcmp.lt.s32.totalorder %v2549_v19, 799 }
  0x2f   : > { %1987 = vmatmul.mubr.msk.f32.gmra.mxu1 %vm317_vm1, %v303_v21  ;;  %1965 = vmatprep.mubr.msk.f32.mxu0 %vm317_vm1, %v288_v22 }
  0x30   : > { %1989 = vmatprep.mubr.msk.f32.mxu1 %vm317_vm1, %v304_v23  ;;  %v2555_v23 = vadd.s32 %v2488_v49, %v967_v3  ;;  %vm1046_vm13 = vcmp.lt.s32.totalorder %v2552_v20, 799 }
  0x32   : > { %1966 = vmatmul.mubr.msk.f32.gmra.mxu0 %vm317_vm1, %v289_v24  ;;  %v2558_v24 = vadd.s32 %v2488_v49, %v983_v4  ;;  %vm1033_vm14 = vcmp.lt.s32.totalorder %v2555_v23, 799 }
  0x33   : > { %1990 = vmatmul.mubr.msk.f32.gmra.mxu1 %vm317_vm1, %v305_v25  ;;  %1968 = vmatprep.mubr.msk.f32.mxu0 %vm317_vm1, %v290_v26  ;;  %v2125_v45 = vpop.eup %2124  ;;  %v2561_v25 = vadd.s32 %v2488_v49, %v966_v5  ;;  %v2564_v26 = vadd.s32 %v2488_v49, %v982_v6 }
  0x34   : > { %1992 = vmatprep.mubr.msk.f32.mxu1 %vm317_vm1, %v306_v27  ;;  %v2494_v53 = vrot.slane %v2125_v45, %v691_v44  ;;  %vm1049_vm0 = vcmp.lt.s32.totalorder %v2558_v24, 799 }
  0x35   : > { %vm1032_vm15 = vcmp.lt.s32.totalorder %v2561_v25, 799 }
  0x36   : > { %1969 = vmatmul.mubr.msk.f32.gmra.mxu0 %vm317_vm1, %v291_v28 }
  0x37   : > { %1993 = vmatmul.mubr.msk.f32.gmra.mxu1 %vm317_vm1, %v307_v29  ;;  %1971 = vmatprep.mubr.msk.f32.mxu0 %vm317_vm1, %v292_v30 }
  0x38   : > { %1995 = vmatprep.mubr.msk.f32.mxu1 %vm317_vm1, %v308_v31  ;;  %v2573_v31 = vld [vmem:[%s3104_s3 + $0x1] ss:$0 sm:$0xff] }
  0x3a   : > { %1972 = vmatmul.mubr.msk.f32.gmra.mxu0 %vm317_vm1, %v293_v32 }
  0x3b   : > { %1996 = vmatmul.mubr.msk.f32.gmra.mxu1 %vm317_vm1, %v309_v33  ;;  %vm1048_vm1 = vcmp.lt.s32.totalorder %v2564_v26, 799 }
  0xde   : > { %v1952_v11 = vpop.f32.mrf.mxu0 }
  0xdf   : > { %v1976_v12 = vpop.f32.mrf.mxu1  ;;  %v490_v17 = vadd.f32 %v1952_v11, %v2524_v2 }
  0xe0   : > { %v570_v18 = vadd.f32 %v1976_v12, %v2524_v2  ;;  %v484_v21 = vpop.f32.mrf.mxu0 }
  0xe1   : > { %v564_v22 = vpop.f32.mrf.mxu1  ;;  %v656_v27 = vsub.f32 %v490_v17, %v2492_v52  ;;  %v485_v29 = vadd.f32 %v2524_v2, %v484_v21 }
  0xe2   : > { %v672_v28 = vsub.f32 %v570_v18, %v2492_v52  ;;  %v565_v30 = vadd.f32 %v2524_v2, %v564_v22  ;;  %v1955_v32 = vpop.f32.mrf.mxu0  ;;  %v2617_v22 = vadd.s32 %v2488_v49, %v971_v48 }
  0xe3   : > { %v1979_v33 = vpop.f32.mrf.mxu1  ;;  %v694_v38 = vmul.f32 %v2494_v53, %v656_v27  ;;  %v655_v40 = vsub.f32 %v485_v29, %v2492_v52  ;;  %v500_v44 = vadd.f32 %v1955_v32, %v2524_v2  ;;  %v970_v27 = vadd.s32 80, %v2480_v42 }
  0xe4   : > { %v710_v39 = vmul.f32 %v2494_v53, %v672_v28  ;;  %v671_v41 = vsub.f32 %v565_v30, %v2492_v52  ;;  %v580_v45 = vadd.f32 %v1979_v33, %v2524_v2  ;;  %v494_v46 = vpop.f32.mrf.mxu0 }
  0xe5   : > { %v574_v47 = vpop.f32.mrf.mxu1  ;;  %v731_v51 = vmul.f32 %v2573_v31, %v694_v38  ;;  %v693_v55 = vmul.f32 %v2494_v53, %v655_v40  ;;  %v658_v57 = vsub.f32 %v500_v44, %v2492_v52  ;;  %v495_v1 = vadd.f32 %v2524_v2, %v494_v46 }
  0xe6   : > { %v747_v54 = vmul.f32 %v2573_v31, %v710_v39  ;;  %v709_v56 = vmul.f32 %v2494_v53, %v671_v41  ;;  %v674_v0 = vsub.f32 %v580_v45, %v2492_v52  ;;  %v575_v3 = vadd.f32 %v2524_v2, %v574_v47  ;;  %v1958_v12 = vpop.f32.mrf.mxu0 }
  0xe7   : > { %v768_v4 = vadd.f32 %v2594_v43, %v731_v51  ;;  %v730_v6 = vmul.f32 %v2573_v31, %v693_v55  ;;  %v696_v13 = vmul.f32 %v2494_v53, %v658_v57  ;;  %v657_v15 = vsub.f32 %v495_v1, %v2492_v52  ;;  %v1982_v21 = vpop.f32.mrf.mxu1 }
  0xe8   : > { %v784_v5 = vadd.f32 %v2594_v43, %v747_v54  ;;  %v746_v11 = vmul.f32 %v2573_v31, %v709_v56  ;;  %v712_v14 = vmul.f32 %v2494_v53, %v674_v0  ;;  %v673_v16 = vsub.f32 %v575_v3, %v2492_v52  ;;  %v504_v40 = vpop.f32.mrf.mxu0 }
  0xe9   : > { %v832_v17 = vmul.f32 0.70710677, %v768_v4  ;;  %v767_v28 = vadd.f32 %v2594_v43, %v730_v6  ;;  %v733_v30 = vmul.f32 %v2573_v31, %v696_v13  ;;  %v695_v33 = vmul.f32 %v2494_v53, %v657_v15  ;;  %v584_v54 = vpop.f32.mrf.mxu1 }
  0xea   : > { %v848_v18 = vmul.f32 0.70710677, %v784_v5  ;;  %v783_v29 = vadd.f32 %v2594_v43, %v746_v11  ;;  %v749_v32 = vmul.f32 %v2573_v31, %v712_v14  ;;  %v711_v38 = vmul.f32 %v2494_v53, %v673_v16  ;;  %v1961_v1 = vpop.f32.mrf.mxu0 }
  0xeb   : > { %2126 = verf.f32 %v832_v17  ;;  %v510_v39 = vadd.f32 %v1958_v12, %v2524_v2  ;;  %v831_v41 = vmul.f32 0.70710677, %v767_v28  ;;  %v2628_v44 = vadd.s32 %v2488_v49, %v987_v50  ;;  %v1985_v16 = vpop.f32.mrf.mxu1 }
  0xec   : > { %2128 = verf.f32 %v848_v18  ;;  %v2631_v45 = vadd.s32 208, %v2480_v42  ;;  %v847_v46 = vmul.f32 0.70710677, %v783_v29  ;;  %v770_v47 = vadd.f32 %v2594_v43, %v733_v30 }
  0xed   : > { %v2635_v48 = vadd.f32 %v2594_v43, %v749_v32  ;;  %v732_v51 = vmul.f32 %v2573_v31, %v695_v33  ;;  %2130 = verf.f32 %v831_v41  ;;  %v748_v55 = vmul.f32 %v2573_v31, %v711_v38  ;;  %v514_v38 = vpop.f32.mrf.mxu0 }
  0xee   : > { %v660_v56 = vsub.f32 %v510_v39, %v2492_v52  ;;  %v590_v50 = vadd.f32 %v1982_v21, %v2524_v2  ;;  %v2641_v57 = vmul.f32 0.5, %v768_v4  ;;  %2132 = verf.f32 %v847_v46 }
  0xef   : > { %v834_v0 = vmul.f32 0.70710677, %v770_v47  ;;  %v2644_v3 = vadd.s32 %v2488_v49, %v970_v27  ;;  %v850_v6 = vmul.f32 0.70710677, %v2635_v48  ;;  %v769_v11 = vadd.f32 %v2594_v43, %v732_v51 }
  0xf0   : > { %v785_v12 = vadd.f32 %v2594_v43, %v748_v55  ;;  %v698_v13 = vmul.f32 %v2494_v53, %v660_v56  ;;  %v676_v14 = vsub.f32 %v590_v50, %v2492_v52  ;;  %v505_v4 = vadd.f32 %v2524_v2, %v504_v40 }
  0xf1   : > { %2134 = verf.f32 %v834_v0  ;;  %v585_v15 = vadd.f32 %v2524_v2, %v584_v54  ;;  %v816_v17 = vmul.f32 0.5, %v784_v5  ;;  %v2653_v18 = vmul.f32 0.5, %v767_v28 }
  0xf2   : > { %2136 = verf.f32 %v850_v6  ;;  %v833_v21 = vmul.f32 0.70710677, %v769_v11  ;;  %v849_v27 = vmul.f32 0.70710677, %v785_v12  ;;  %v735_v30 = vmul.f32 %v2573_v31, %v698_v13 }
  0xf3   : > { %v714_v32 = vmul.f32 %v2494_v53, %v676_v14  ;;  %v659_v33 = vsub.f32 %v505_v4, %v2492_v52  ;;  %v675_v39 = vsub.f32 %v585_v15, %v2492_v52  ;;  %v520_v40 = vadd.f32 %v1961_v1, %v2524_v2 }
  0xf4   : > { %2138 = verf.f32 %v833_v21  ;;  %v600_v41 = vadd.f32 %v1985_v16, %v2524_v2  ;;  %v772_v5 = vadd.f32 %v2594_v43, %v735_v30  ;;  %v515_v56 = vadd.f32 %v2524_v2, %v514_v38 }
  0xf5   : > { %2140 = verf.f32 %v849_v27  ;;  %v751_v28 = vmul.f32 %v2573_v31, %v714_v32  ;;  %v697_v46 = vmul.f32 %v2494_v53, %v659_v33  ;;  %v713_v51 = vmul.f32 %v2494_v53, %v675_v39 }
  0xf6   : > { %v662_v54 = vsub.f32 %v520_v40, %v2492_v52  ;;  %v678_v55 = vsub.f32 %v600_v41, %v2492_v52  ;;  %v815_v50 = vmul.f32 0.5, %v783_v29  ;;  %v836_v0 = vmul.f32 0.70710677, %v772_v5 }
  0xf7   : > { %v788_v1 = vadd.f32 %v2594_v43, %v751_v28  ;;  %v734_v6 = vmul.f32 %v2573_v31, %v697_v46  ;;  %v802_v14 = vmul.f32 0.5, %v770_v47  ;;  %v750_v4 = vmul.f32 %v2573_v31, %v713_v51 }
  0xf8   : > { %v2127_v13 = vpop.eup %2126  ;;  %v700_v15 = vmul.f32 %v2494_v53, %v662_v54  ;;  %v716_v16 = vmul.f32 %v2494_v53, %v678_v55  ;;  %2142 = verf.f32 %v836_v0  ;;  %v661_v30 = vsub.f32 %v515_v56, %v2492_v52 }
  0xf9   : > { %v2129_v21 = vpop.eup %2128  ;;  %v896_v27 = vadd.f32 1.0, %v2127_v13  ;;  %v852_v29 = vmul.f32 0.70710677, %v788_v1  ;;  %v2682_v47 = vadd.f32 %v2594_v43, %v734_v6  ;;  %v2685_v33 = vadd.f32 %v2594_v43, %v750_v4 }
  0xfa   : > { %v912_v32 = vadd.f32 1.0, %v2129_v21  ;;  %v737_v38 = vmul.f32 %v2573_v31, %v700_v15  ;;  %v2131_v39 = vpop.eup %2130  ;;  %v818_v40 = vmul.f32 0.5, %v2635_v48  ;;  %v801_v41 = vmul.f32 0.5, %v769_v11  ;;  %v594_v15 = vpop.f32.mrf.mxu1 }
  0xfb   : > { %2144 = verf.f32 %v852_v29  ;;  %v753_v28 = vmul.f32 %v2573_v31, %v716_v16  ;;  %v2133_v46 = vpop.eup %2132  ;;  %v928_v51 = vmul.f32 %v896_v27, %v2641_v57  ;;  %v895_v54 = vadd.f32 1.0, %v2131_v39 }
  0xfc   : > { %v817_v55 = vmul.f32 0.5, %v785_v12  ;;  %v835_v56 = vmul.f32 0.70710677, %v2682_v47  ;;  %v944_v0 = vmul.f32 %v912_v32, %v816_v17  ;;  %v911_v6 = vadd.f32 1.0, %v2133_v46 }
  0xfd   : > { %v2696_v48 = vmul.f32 0.5, %v772_v5  ;;  %v851_v11 = vmul.f32 0.70710677, %v2685_v33  ;;  %v927_v4 = vmul.f32 %v895_v54, %v2653_v18  ;;  %v2701_v57 = vadd.f32 %v2594_v43, %v737_v38  ;;  %v1964_v5 = vpop.f32.mrf.mxu0 }
  0xfe   : > { %v2135_v13 = vpop.eup %2134  ;;  %2146 = verf.f32 %v835_v56  ;;  %v699_v12 = vmul.f32 %v2494_v53, %v661_v30  ;;  %v943_v21 = vmul.f32 %v911_v6, %v815_v50  ;;  %v2705_v27 = vadd.f32 %v2594_v43, %v753_v28 }
  0xff   : > { %v2137_v16 = vpop.eup %2136  ;;  %v898_v17 = vadd.f32 1.0, %v2135_v13  ;;  %2148 = verf.f32 %v851_v11  ;;  %v1123_v29 = vsel %vm1027_vm2, %v928_v51, 0.0  ;;  %v1122_v18 = vsel %vm1026_vm3, %v927_v4, 0.0  ;;  %v1988_v11 = vpop.f32.mrf.mxu1 }
 0x100   : > { %v914_v32 = vadd.f32 1.0, %v2137_v16  ;;  %v838_v38 = vmul.f32 0.70710677, %v2701_v57  ;;  %v1139_v50 = vsel %vm1043_vm4, %v944_v0, 0.0  ;;  %v1820_v39 = vpack.c.bf16 %v1123_v29, %v1122_v18  ;;  %v524_v61 = vpop.f32.mrf.mxu0 }
 0x101   : > { %v2139_v30 = vpop.eup %2138  ;;  %v1138_v28 = vsel %vm1042_vm5, %v943_v21, 0.0  ;;  %v930_v46 = vmul.f32 %v898_v17, %v802_v14  ;;  %v820_v51 = vmul.f32 0.5, %v788_v1  ;;  %v854_v59 = vmul.f32 0.70710677, %v2705_v27  ;;  %v604_v7 = vpop.f32.mrf.mxu1 }
 0x102   : > { %v2141_v54 = vpop.eup %2140  ;;  %v1860_v56 = vpack.c.bf16 %v1139_v50, %v1138_v28  ;;  %v946_v58 = vmul.f32 %v914_v32, %v818_v40  ;;  %v897_v6 = vadd.f32 1.0, %v2139_v30  ;;  %1821 = vst [vmem:[%s2717_s24] sm:$0xff] %v1820_v39   ;;  %2150 = verf.f32 %v838_v38 }
 0x103   : > { %v913_v60 = vadd.f32 1.0, %v2141_v54  ;;  %v736_v0 = vmul.f32 %v2573_v31, %v699_v12  ;;  %v1125_v14 = vsel %vm1029_vm6, %v930_v46, 0.0  ;;  %v595_v1 = vadd.f32 %v2524_v2, %v594_v15 }
 0x104   : > { %1904 = vst [vmem:[%s2717_s24 + $0x40] sm:$0xff] %v1860_v56   ;;  %v929_v40 = vmul.f32 %v897_v6, %v801_v41  ;;  %v530_v13 = vadd.f32 %v1964_v5, %v2524_v2  ;;  %v1141_v4 = vsel %vm1045_vm7, %v946_v58, 0.0  ;;  %v610_v21 = vadd.f32 %v1988_v11, %v2524_v2 }
 0x105   : > { %v945_v16 = vmul.f32 %v913_v60, %v817_v55  ;;  %v2732_v12 = vadd.f32 %v2594_v43, %v736_v0  ;;  %v2143_v62 = vpop.eup %2142  ;;  %v677_v63 = vsub.f32 %v595_v1, %v2492_v52  ;;  %v525_v15 = vadd.f32 %v2524_v2, %v524_v61  ;;  %v1967_v0 = vpop.f32.mrf.mxu0 }
 0x106   : > { %v1124_v41 = vsel %vm1028_vm8, %v929_v40, 0.0  ;;  %v664_v55 = vsub.f32 %v530_v13, %v2492_v52  ;;  %v900_v29 = vadd.f32 1.0, %v2143_v62  ;;  %2152 = verf.f32 %v854_v59 }
 0x107   : > { %v1825_v17 = vpack.c.bf16 %v1125_v14, %v1124_v41  ;;  %v1140_v5 = vsel %vm1044_vm9, %v945_v16, 0.0  ;;  %v837_v38 = vmul.f32 0.70710677, %v2732_v12  ;;  %v715_v30 = vmul.f32 %v2494_v53, %v677_v63  ;;  %v1991_v63 = vpop.f32.mrf.mxu1 }
 0x108   : > { %v2145_v18 = vpop.eup %2144  ;;  %v1865_v32 = vpack.c.bf16 %v1141_v4, %v1140_v5  ;;  %v702_v50 = vmul.f32 %v2494_v53, %v664_v55  ;;  %v803_v28 = vmul.f32 0.5, %v2682_v47  ;;  %v680_v46 = vsub.f32 %v610_v21, %v2492_v52 }
 0x109   : > { %1897 = vst [vmem:[%s2717_s24 + $0x8] sm:$0xff] %v1825_v17   ;;  %v916_v39 = vadd.f32 1.0, %v2145_v18  ;;  %v663_v8 = vsub.f32 %v525_v15, %v2492_v52  ;;  %2154 = verf.f32 %v837_v38  ;;  %v752_v54 = vmul.f32 %v2573_v31, %v715_v30 }
 0x10a   : > { %1905 = vst [vmem:[%s2717_s24 + $0x48] sm:$0xff] %v1865_v32   ;;  %v739_v56 = vmul.f32 %v2573_v31, %v702_v50  ;;  %v605_v58 = vadd.f32 %v2524_v2, %v604_v7  ;;  %v932_v11 = vmul.f32 %v900_v29, %v2696_v48  ;;  %v819_v60 = vmul.f32 0.5, %v2685_v33  ;;  %v534_v29 = vpop.f32.mrf.mxu0 }
 0x10b   : > { %v2147_v6 = vpop.eup %2146  ;;  %v718_v59 = vmul.f32 %v2494_v53, %v680_v46  ;;  %v701_v47 = vmul.f32 %v2494_v53, %v663_v8  ;;  %v789_v40 = vadd.f32 %v2594_v43, %v752_v54  ;;  %v948_v4 = vmul.f32 %v916_v39, %v820_v51 }
 0x10c   : > { %v2149_v61 = vpop.eup %2148  ;;  %v899_v14 = vadd.f32 1.0, %v2147_v6  ;;  %v776_v1 = vadd.f32 %v2594_v43, %v739_v56  ;;  %v679_v13 = vsub.f32 %v605_v58, %v2492_v52  ;;  %v806_v62 = vmul.f32 0.5, %v2701_v57  ;;  %v1970_v54 = vpop.f32.mrf.mxu0 }
 0x10d   : > { %v915_v16 = vadd.f32 1.0, %v2149_v61  ;;  %v755_v21 = vmul.f32 %v2573_v31, %v718_v59  ;;  %v738_v48 = vmul.f32 %v2573_v31, %v701_v47  ;;  %v853_v41 = vmul.f32 0.70710677, %v789_v40 }
 0x10e   : > { %v931_v33 = vmul.f32 %v899_v14, %v803_v28  ;;  %v2767_v55 = vadd.s32 %v2488_v49, %v2631_v45  ;;  %v840_v17 = vmul.f32 0.70710677, %v776_v1  ;;  %v1127_v57 = vsel %vm1031_vm10, %v932_v11, 0.0  ;;  %v614_v28 = vpop.f32.mrf.mxu1 }
 0x10f   : > { %v947_v15 = vmul.f32 %v915_v16, %v819_v60  ;;  %v2770_v5 = vadd.f32 %v2594_v43, %v755_v21  ;;  %v2773_v51 = vadd.f32 %v2594_v43, %v738_v48  ;;  %v2151_v7 = vpop.eup %2150  ;;  %2156 = verf.f32 %v853_v41 }
 0x110   : > { %v1126_v18 = vsel %vm1030_vm11, %v931_v33, 0.0  ;;  %v717_v45 = vmul.f32 %v2494_v53, %v679_v13  ;;  %v1143_v32 = vsel %vm1047_vm12, %v948_v4, 0.0  ;;  %2158 = verf.f32 %v840_v17  ;;  %v1994_v14 = vpop.f32.mrf.mxu1 }
 0x111   : > { %v1830_v38 = vpack.c.bf16 %v1127_v57, %v1126_v18  ;;  %v1142_v30 = vsel %vm1046_vm13, %v947_v15, 0.0  ;;  %v822_v19 = vmul.f32 0.5, %v2705_v27  ;;  %v805_v50 = vmul.f32 0.5, %v2732_v12 }
 0x112   : > { %v1870_v9 = vpack.c.bf16 %v1143_v32, %v1142_v30  ;;  %v856_v39 = vmul.f32 0.70710677, %v2770_v5  ;;  %v902_v46 = vadd.f32 1.0, %v2151_v7  ;;  %v839_v10 = vmul.f32 0.70710677, %v2773_v51  ;;  %v544_v30 = vpop.f32.mrf.mxu0 }
 0x113   : > { %1898 = vst [vmem:[%s2717_s24 + $0x10] sm:$0xff] %v1830_v38   ;;  %v754_v8 = vmul.f32 %v2573_v31, %v717_v45  ;;  %v540_v20 = vadd.f32 %v1967_v0, %v2524_v2  ;;  %v2153_v56 = vpop.eup %2152  ;;  %v821_v58 = vmul.f32 0.5, %v789_v40  ;;  %v620_v27 = vadd.f32 %v1991_v63, %v2524_v2 }
 0x114   : > { %1906 = vst [vmem:[%s2717_s24 + $0x50] sm:$0xff] %v1870_v9   ;;  %2160 = verf.f32 %v856_v39  ;;  %v535_v12 = vadd.f32 %v2524_v2, %v534_v29  ;;  %v2796_v6 = vmul.f32 0.5, %v776_v1  ;;  %v615_v0 = vadd.f32 %v2524_v2, %v614_v28 }
 0x115   : > { %2162 = verf.f32 %v839_v10  ;;  %v2799_v11 = vadd.f32 %v2594_v43, %v754_v8  ;;  %v666_v60 = vsub.f32 %v540_v20, %v2492_v52  ;;  %v682_v59 = vsub.f32 %v620_v27, %v2492_v52 }
 0x116   : > { %v665_v47 = vsub.f32 %v535_v12, %v2492_v52  ;;  %v550_v61 = vadd.f32 %v1970_v54, %v2524_v2  ;;  %v2155_v40 = vpop.eup %2154  ;;  %v934_v13 = vmul.f32 %v902_v46, %v806_v62  ;;  %v918_v4 = vadd.f32 1.0, %v2153_v56 }
 0x117   : > { %v855_v1 = vmul.f32 0.70710677, %v2799_v11  ;;  %v704_v16 = vmul.f32 %v2494_v53, %v666_v60  ;;  %v901_v21 = vadd.f32 1.0, %v2155_v40  ;;  %v720_v48 = vmul.f32 %v2494_v53, %v682_v59  ;;  %v624_v60 = vpop.f32.mrf.mxu1 }
 0x118   : > { %v703_v33 = vmul.f32 %v2494_v53, %v665_v47  ;;  %v681_v41 = vsub.f32 %v615_v0, %v2492_v52  ;;  %vm1035_vm2 = vcmp.lt.s32.totalorder %v2576_v34, 799  ;;  %v668_v63 = vsub.f32 %v550_v61, %v2492_v52  ;;  %v1973_v0 = vpop.f32.mrf.mxu0 }
 0x119   : > { %2164 = verf.f32 %v855_v1  ;;  %v741_v62 = vmul.f32 %v2573_v31, %v704_v16  ;;  %v630_v15 = vadd.f32 %v1994_v14, %v2524_v2  ;;  %v933_v17 = vmul.f32 %v901_v21, %v805_v50 }
 0x11a   : > { %v757_v29 = vmul.f32 %v2573_v31, %v720_v48  ;;  %v740_v7 = vmul.f32 %v2573_v31, %v703_v33  ;;  %v719_v57 = vmul.f32 %v2494_v53, %v681_v41  ;;  %v1129_v18 = vsel %vm1033_vm14, %v934_v13, 0.0  ;;  %v1997_v41 = vpop.f32.mrf.mxu1 }
 0x11b   : > { %v778_v45 = vadd.f32 %v2594_v43, %v741_v62  ;;  %v706_v32 = vmul.f32 %v2494_v53, %v668_v63  ;;  %v684_v38 = vsub.f32 %v630_v15, %v2492_v52  ;;  %v1128_v9 = vsel %vm1032_vm15, %v933_v17, 0.0 }
 0x11c   : > { %vm1034_vm3 = vcmp.lt.s32.totalorder %v2582_v36, 799  ;;  %v2829_v50 = vadd.f32 %v2594_v43, %v757_v29  ;;  %v2832_v39 = vadd.f32 %v2594_v43, %v740_v7  ;;  %v756_v23 = vmul.f32 %v2573_v31, %v719_v57  ;;  %v2157_v28 = vpop.eup %2156 }
 0x11d   : > { %v1835_v46 = vpack.c.bf16 %v1129_v18, %v1128_v9  ;;  %v824_v10 = vmul.f32 0.5, %v2770_v5  ;;  %v842_v8 = vmul.f32 0.70710677, %v778_v45  ;;  %v743_v20 = vmul.f32 %v2573_v31, %v706_v32  ;;  %v2159_v25 = vpop.eup %2158 }
 0x11e   : > { %v950_v54 = vmul.f32 %v918_v4, %v822_v19  ;;  %v917_v56 = vadd.f32 1.0, %v2157_v28  ;;  %v858_v27 = vmul.f32 0.70710677, %v2829_v50  ;;  %v545_v12 = vadd.f32 %v2524_v2, %v544_v30 }
 0x11f   : > { %1899 = vst [vmem:[%s2717_s24 + $0x18] sm:$0xff] %v1835_v46   ;;  %v904_v59 = vadd.f32 1.0, %v2159_v25  ;;  %vm1051_vm4 = vcmp.lt.s32.totalorder %v2579_v35, 799  ;;  %2166 = verf.f32 %v842_v8  ;;  %v841_v47 = vmul.f32 0.70710677, %v2832_v39 }
 0x120   : > { %v2843_v5 = vadd.f32 %v2594_v43, %v756_v23  ;;  %v949_v61 = vmul.f32 %v917_v56, %v821_v58  ;;  %vm1050_vm5 = vcmp.lt.s32.totalorder %v2585_v37, 799  ;;  %2168 = verf.f32 %v858_v27  ;;  %v634_v56 = vpop.f32.mrf.mxu1 }
 0x121   : > { %v2847_v19 = vadd.f32 %v2594_v43, %v743_v20  ;;  %v722_v14 = vmul.f32 %v2494_v53, %v684_v38  ;;  %v2161_v40 = vpop.eup %2160  ;;  %v936_v13 = vmul.f32 %v904_v59, %v2796_v6  ;;  %v807_v4 = vmul.f32 0.5, %v2773_v51  ;;  %v554_v51 = vpop.f32.mrf.mxu0 }
 0x122   : > { %2170 = verf.f32 %v841_v47  ;;  %v857_v1 = vmul.f32 0.70710677, %v2843_v5  ;;  %v2163_v16 = vpop.eup %2162  ;;  %v1145_v58 = vsel %vm1049_vm0, %v950_v54, 0.0  ;;  %v1144_v21 = vsel %vm1048_vm1, %v949_v61, 0.0 }
 0x123   : > { %v920_v48 = vadd.f32 1.0, %v2161_v40  ;;  %v823_v33 = vmul.f32 0.5, %v2799_v11  ;;  %v1875_v62 = vpack.c.bf16 %v1145_v58, %v1144_v21  ;;  %v903_v63 = vadd.f32 1.0, %v2163_v16 }
 0x124   : > { %v810_v6 = vmul.f32 0.5, %v778_v45  ;;  %2172 = verf.f32 %v857_v1  ;;  %v1131_v15 = vsel %vm1035_vm2, %v936_v13, 0.0  ;;  %v844_v17 = vmul.f32 0.70710677, %v2847_v19 }
 0x125   : > { %v759_v24 = vmul.f32 %v2573_v31, %v722_v14  ;;  %v667_v29 = vsub.f32 %v545_v12, %v2492_v52  ;;  %1907 = vst [vmem:[%s2717_s24 + $0x58] sm:$0xff] %v1875_v62   ;;  %v935_v26 = vmul.f32 %v903_v63, %v807_v4  ;;  %v625_v7 = vadd.f32 %v2524_v2, %v624_v60 }
 0x126   : > { %v560_v11 = vadd.f32 %v1973_v0, %v2524_v2  ;;  %v640_v57 = vadd.f32 %v1997_v41, %v2524_v2  ;;  %v2165_v18 = vpop.eup %2164  ;;  %v952_v45 = vmul.f32 %v920_v48, %v824_v10  ;;  %v555_v38 = vadd.f32 %v2524_v2, %v554_v51 }
 0x127   : > { %v2868_v32 = vadd.f32 %v2594_v43, %v759_v24  ;;  %v705_v34 = vmul.f32 %v2494_v53, %v667_v29  ;;  %v1130_v30 = vsel %vm1034_vm3, %v935_v26, 0.0  ;;  %v919_v9 = vadd.f32 1.0, %v2165_v18 }
 0x128   : > { %vm1037_vm6 = vcmp.lt.s32.totalorder %v2617_v22, 799  ;;  %v683_v23 = vsub.f32 %v625_v7, %v2492_v52  ;;  %v670_v28 = vsub.f32 %v560_v11, %v2492_v52  ;;  %v1840_v46 = vpack.c.bf16 %v1131_v15, %v1130_v30 }
 0x129   : > { %vm1036_vm7 = vcmp.lt.s32.totalorder %v2644_v3, 799  ;;  %2174 = verf.f32 %v844_v17  ;;  %v860_v10 = vmul.f32 0.70710677, %v2868_v32  ;;  %v742_v8 = vmul.f32 %v2573_v31, %v705_v34 }
 0x12a   : > { %v951_v20 = vmul.f32 %v919_v9, %v823_v33  ;;  %v721_v36 = vmul.f32 %v2494_v53, %v683_v23  ;;  %v708_v25 = vmul.f32 %v2494_v53, %v670_v28  ;;  %v686_v54 = vsub.f32 %v640_v57, %v2492_v52  ;;  %1900 = vst [vmem:[%s2717_s24 + $0x20] sm:$0xff] %v1840_v46  }
 0x12b   : > { %v1147_v27 = vsel %vm1051_vm4, %v952_v45, 0.0  ;;  %2176 = verf.f32 %v860_v10  ;;  %v2887_v12 = vadd.f32 %v2594_v43, %v742_v8  ;;  %v669_v60 = vsub.f32 %v555_v38, %v2492_v52 }
 0x12c   : > { %v1146_v59 = vsel %vm1050_vm5, %v951_v20, 0.0  ;;  %v758_v47 = vmul.f32 %v2573_v31, %v721_v36  ;;  %v745_v0 = vmul.f32 %v2573_v31, %v708_v25  ;;  %v724_v61 = vmul.f32 %v2494_v53, %v686_v54  ;;  %v2167_v14 = vpop.eup %2166 }
 0x12d   : > { %v1880_v35 = vpack.c.bf16 %v1147_v27, %v1146_v59  ;;  %v843_v40 = vmul.f32 0.70710677, %v2887_v12  ;;  %v707_v13 = vmul.f32 %v2494_v53, %v669_v60  ;;  %v635_v4 = vadd.f32 %v2524_v2, %v634_v56  ;;  %v2169_v1 = vpop.eup %2168 }
 0x12e   : > { %v906_v16 = vadd.f32 1.0, %v2167_v14  ;;  %v2899_v37 = vadd.f32 %v2594_v43, %v758_v47  ;;  %v2902_v58 = vadd.f32 %v2594_v43, %v745_v0  ;;  %v761_v21 = vmul.f32 %v2573_v31, %v724_v61 }
 0x12f   : > { %v2171_v48 = vpop.eup %2170  ;;  %1908 = vst [vmem:[%s2717_s24 + $0x60] sm:$0xff] %v1880_v35   ;;  %v826_v33 = vmul.f32 0.5, %v2829_v50  ;;  %v922_v41 = vadd.f32 1.0, %v2169_v1  ;;  %v809_v62 = vmul.f32 0.5, %v2832_v39  ;;  %2178 = verf.f32 %v843_v40 }
 0x130   : > { %v938_v63 = vmul.f32 %v906_v16, %v810_v6  ;;  %v905_v2 = vadd.f32 1.0, %v2171_v48  ;;  %v859_v51 = vmul.f32 0.70710677, %v2899_v37  ;;  %v744_v15 = vmul.f32 %v2573_v31, %v707_v13 }
 0x131   : > { %v2173_v17 = vpop.eup %2172  ;;  %v825_v24 = vmul.f32 0.5, %v2843_v5  ;;  %v846_v29 = vmul.f32 0.70710677, %v2902_v58  ;;  %v2913_v26 = vadd.f32 %v2594_v43, %v761_v21  ;;  %v685_v50 = vsub.f32 %v635_v4, %v2492_v52 }
 0x132   : > { %v954_v7 = vmul.f32 %v922_v41, %v826_v33  ;;  %v937_v11 = vmul.f32 %v905_v2, %v809_v62  ;;  %v921_v39 = vadd.f32 1.0, %v2173_v17  ;;  %2180 = verf.f32 %v859_v51 }
 0x133   : > { %v1133_v6 = vsel %vm1037_vm6, %v938_v63, 0.0  ;;  %vm1053_vm8 = vcmp.lt.s32.totalorder %v2628_v44, 799  ;;  %vm1052_vm9 = vcmp.lt.s32.totalorder %v2767_v55, 799  ;;  %2182 = verf.f32 %v846_v29 }
 0x134   : > { %v1132_v5 = vsel %vm1036_vm7, %v937_v11, 0.0  ;;  %v953_v57 = vmul.f32 %v921_v39, %v825_v24  ;;  %v862_v18 = vmul.f32 0.70710677, %v2913_v26  ;;  %v781_v52 = vadd.f32 %v2594_v43, %v744_v15 }
 0x135   : > { %v1845_v45 = vpack.c.bf16 %v1133_v6, %v1132_v5  ;;  %v973_v34 = vadd.s32 104, %v2480_v42  ;;  %v723_v22 = vmul.f32 %v2494_v53, %v685_v50  ;;  %v1149_v30 = vsel %vm1053_vm8, %v954_v7, 0.0 }
 0x136   : > { %v2175_v38 = vpop.eup %2174  ;;  %v1148_v44 = vsel %vm1052_vm9, %v953_v57, 0.0  ;;  %v972_v55 = vadd.s32 96, %v2480_v42  ;;  %v845_v9 = vmul.f32 0.70710677, %v781_v52  ;;  %2184 = verf.f32 %v862_v18 }
 0x137   : > { %1901 = vst [vmem:[%s2717_s24 + $0x28] sm:$0xff] %v1845_v45   ;;  %v1885_v3 = vpack.c.bf16 %v1149_v30, %v1148_v44  ;;  %v760_v23 = vmul.f32 %v2573_v31, %v723_v22  ;;  %v989_v46 = vadd.s32 232, %v2480_v42  ;;  %v988_v10 = vadd.s32 224, %v2480_v42 }
 0x138   : > { %v2177_v28 = vpop.eup %2176  ;;  %2186 = verf.f32 %v845_v9  ;;  %v908_v8 = vadd.f32 1.0, %v2175_v38  ;;  %v1007_v20 = vadd.s32 %v2488_v49, %v973_v34  ;;  %v1006_v36 = vadd.s32 %v2488_v49, %v972_v55 }
 0x139   : > { %1909 = vst [vmem:[%s2717_s24 + $0x68] sm:$0xff] %v1885_v3   ;;  %v797_v53 = vadd.f32 %v2594_v43, %v760_v23  ;;  %v812_v25 = vmul.f32 0.5, %v2847_v19  ;;  %v924_v27 = vadd.f32 1.0, %v2177_v28  ;;  %v1023_v31 = vadd.s32 %v2488_v49, %v989_v46 }
 0x13a   : > { %v1022_v60 = vadd.s32 %v2488_v49, %v988_v10  ;;  %v811_v47 = vmul.f32 0.5, %v2887_v12  ;;  %vm1039_vm10 = vcmp.lt.s32.totalorder %v1007_v20, 799  ;;  %v828_v43 = vmul.f32 0.5, %v2868_v32 }
 0x13b   : > { %v861_v54 = vmul.f32 0.70710677, %v797_v53  ;;  %v940_v59 = vmul.f32 %v908_v8, %v812_v25  ;;  %vm1038_vm11 = vcmp.lt.s32.totalorder %v1006_v36, 799  ;;  %v975_v19 = vadd.s32 120, %v2480_v42 }
 0x13c   : > { %v2179_v56 = vpop.eup %2178  ;;  %v974_v35 = vadd.s32 112, %v2480_v42  ;;  %v956_v13 = vmul.f32 %v924_v27, %v828_v43  ;;  %v827_v4 = vmul.f32 0.5, %v2899_v37  ;;  %vm1055_vm12 = vcmp.lt.s32.totalorder %v1023_v31, 799 }
 0x13d   : > { %v907_v0 = vadd.f32 1.0, %v2179_v56  ;;  %2188 = verf.f32 %v861_v54  ;;  %v1135_v16 = vsel %vm1039_vm10, %v940_v59, 0.0  ;;  %vm1054_vm13 = vcmp.lt.s32.totalorder %v1022_v60, 799 }
 0x13e   : > { %v1009_v33 = vadd.s32 %v2488_v49, %v975_v19  ;;  %v991_v41 = vadd.s32 248, %v2480_v42  ;;  %v1008_v62 = vadd.s32 %v2488_v49, %v974_v35  ;;  %v1151_v2 = vsel %vm1055_vm12, %v956_v13, 0.0 }
 0x13f   : > { %v2181_v61 = vpop.eup %2180  ;;  %v939_v14 = vmul.f32 %v907_v0, %v811_v47  ;;  %v814_v37 = vmul.f32 0.5, %v2902_v58  ;;  %v990_v15 = vadd.s32 240, %v2480_v42  ;;  %v813_v50 = vmul.f32 0.5, %v781_v52 }
 0x140   : > { %v2183_v40 = vpop.eup %2182  ;;  %v923_v1 = vadd.f32 1.0, %v2181_v61  ;;  %vm1041_vm14 = vcmp.lt.s32.totalorder %v1009_v33, 799  ;;  %vm1040_vm15 = vcmp.lt.s32.totalorder %v1008_v62, 799  ;;  %v1025_v39 = vadd.s32 %v2488_v49, %v991_v41 }
 0x141   : > { %v1134_v12 = vsel %vm1038_vm11, %v939_v14, 0.0  ;;  %v910_v32 = vadd.f32 1.0, %v2183_v40  ;;  %v1024_v5 = vadd.s32 %v2488_v49, %v990_v15  ;;  %v830_v58 = vmul.f32 0.5, %v2913_v26 }
 0x142   : > { %v1850_v21 = vpack.c.bf16 %v1135_v16, %v1134_v12  ;;  %v955_v48 = vmul.f32 %v923_v1, %v827_v4  ;;  %v829_v52 = vmul.f32 0.5, %v797_v53  ;;  %vm1057_vm0 = vcmp.lt.s32.totalorder %v1025_v39, 799 }
 0x143   : > { %v2185_v63 = vpop.eup %2184  ;;  %v942_v29 = vmul.f32 %v910_v32, %v814_v37  ;;  %vm1056_vm1 = vcmp.lt.s32.totalorder %v1024_v5, 799 }
 0x144   : > { %1902 = vst [vmem:[%s2717_s24 + $0x30] sm:$0xff] %v1850_v21   ;;  %v1150_v51 = vsel %vm1054_vm13, %v955_v48, 0.0  ;;  %v926_v11 = vadd.f32 1.0, %v2185_v63 }
 0x145   : > { %v2187_v17 = vpop.eup %2186  ;;  %v1890_v24 = vpack.c.bf16 %v1151_v2, %v1150_v51  ;;  %v1137_v42 = vsel %vm1041_vm14, %v942_v29, 0.0 }
 0x146   : > { %v909_v7 = vadd.f32 1.0, %v2187_v17  ;;  %v958_v45 = vmul.f32 %v926_v11, %v830_v58 }
 0x147   : > { %1910 = vst [vmem:[%s2717_s24 + $0x70] sm:$0xff] %v1890_v24  }
 0x148   : > { %v941_v6 = vmul.f32 %v909_v7, %v813_v50  ;;  %v1153_v30 = vsel %vm1057_vm0, %v958_v45, 0.0 }
 0x14a   : > { %v2189_v57 = vpop.eup %2188  ;;  %v1136_v18 = vsel %vm1040_vm15, %v941_v6, 0.0 }
 0x14b   : > { %v1855_v34 = vpack.c.bf16 %v1137_v42, %v1136_v18  ;;  %v925_v22 = vadd.f32 1.0, %v2189_v57 }
 0x14d   : > { %1903 = vst [vmem:[%s2717_s24 + $0x38] sm:$0xff] %v1855_v34   ;;  %v957_v38 = vmul.f32 %v925_v22, %v829_v52 }
 0x14e   : > { %1320 = sbr.rel (!%p2381_p5) target bundleno = 399 (0x18f), region = 40 }
 0x14f   : > { %v1152_v44 = vsel %vm1056_vm1, %v957_v38, 0.0 }
 0x150   : > { %v1895_v55 = vpack.c.bf16 %v1153_v30, %v1152_v44 }
 0x152   : > { %1911 = vst [vmem:[%s2717_s24 + $0x78] sm:$0xff] %v1895_v55  }
 0x153   : > { %s3125_s28 = smov (!%p1323_p12, %s1322_s28), 32 }
 0x154   : > { %s1768_s9 = sshll.u32 %s3125_s28, 6 }
 0x155   : > { %p1771_p13 = scmp.eq.s32.totalorder %s1768_s9, 0 }
 0x156   : > { %s2968_s26 = sshrl.u32 (!%p1771_p13), %s3125_s28, 5 }
 0x157   : > { %1333 = sbr.rel (%p1771_p13) target bundleno = 399 (0x18f), region = 44  ;;  %p1772_p0 = scmp.le.s32.totalorder (!%p1771_p13), %s2968_s26, 0 }
 0x15c   : > { %1627 = sbr.rel (%p1772_p0) target bundleno = 382 (0x17e), region = 119  ;;  %s3107_s17 = smov (!%p1772_p0), %s2964_s8 }
 0x15d   : > { %s3108_s18 = smov (!%p1772_p0), %s2717_s24  ;;  %s2977_s10 = smov (!%p1772_p0), 0  }
 0x15e   : > { %s2979_s11 = smov (!%p1772_p0), 0  }
 0x161 LB: >> { %v1350_v49 = vld [vmem:[%s2284_s18] sm:$0xf]  ;;  %v1352_v26 = vld [vmem:[%s2284_s18 + $0x4] sm:$0xf]  ;;  %v1354_v9 = vld [vmem:[%s2284_s18 + $0x8] sm:$0xf]  ;;  %s2292_s11 = sphi %s2979_s11, %s1344_s11   ;;  %s2288_s10 = sphi %s2977_s10, %s3109_s10   ;;  %s2284_s18 = sphi %s3108_s18, %s1419_s18   ;;  %s2280_s17 = sphi %s3107_s17, %s1420_s17  }
 0x162   : >> { %1351 = vst [vmem:[%s2280_s17] sm:$0xf] %v1350_v49  ;;  %1353 = vst [vmem:[%s2280_s17 + $0x4] sm:$0xf] %v1352_v26  ;;  %v1356_v3 = vld [vmem:[%s2284_s18 + $0xc] sm:$0xf]  ;;  %s1414_s12 = sadd.s32 1, %s2288_s10 }
 0x163   : >> { %1355 = vst [vmem:[%s2280_s17 + $0x8] sm:$0xf] %v1354_v9  ;;  %v1358_v23 = vld [vmem:[%s2284_s18 + $0x10] sm:$0xf]  ;;  %v1360_v28 = vld [vmem:[%s2284_s18 + $0x14] sm:$0xf]  ;;  %p1415_p1 = scmp.ge.s32.totalorder %s1414_s12, %s2968_s26 }
 0x164   : >> { %1357 = vst [vmem:[%s2280_s17 + $0xc] sm:$0xf] %v1356_v3  ;;  %1359 = vst [vmem:[%s2280_s17 + $0x10] sm:$0xf] %v1358_v23  ;;  %v1362_v46 = vld [vmem:[%s2284_s18 + $0x18] sm:$0xf] }
 0x165   : >> { %1361 = vst [vmem:[%s2280_s17 + $0x14] sm:$0xf] %v1360_v28  ;;  %v1364_v10 = vld [vmem:[%s2284_s18 + $0x1c] sm:$0xf]  ;;  %v1366_v8 = vld [vmem:[%s2284_s18 + $0x20] sm:$0xf] }
 0x166   : >> { %1363 = vst [vmem:[%s2280_s17 + $0x18] sm:$0xf] %v1362_v46  ;;  %1365 = vst [vmem:[%s2280_s17 + $0x1c] sm:$0xf] %v1364_v10  ;;  %v1368_v53 = vld [vmem:[%s2284_s18 + $0x24] sm:$0xf] }
 0x167   : >> { %1367 = vst [vmem:[%s2280_s17 + $0x20] sm:$0xf] %v1366_v8  ;;  %v1370_v20 = vld [vmem:[%s2284_s18 + $0x28] sm:$0xf]  ;;  %v1372_v36 = vld [vmem:[%s2284_s18 + $0x2c] sm:$0xf] }
 0x168   : >> { %1369 = vst [vmem:[%s2280_s17 + $0x24] sm:$0xf] %v1368_v53  ;;  %1371 = vst [vmem:[%s2280_s17 + $0x28] sm:$0xf] %v1370_v20  ;;  %v1374_v25 = vld [vmem:[%s2284_s18 + $0x30] sm:$0xf] }
 0x169   : >> { %1373 = vst [vmem:[%s2280_s17 + $0x2c] sm:$0xf] %v1372_v36  ;;  %v1376_v54 = vld [vmem:[%s2284_s18 + $0x34] sm:$0xf]  ;;  %v1378_v56 = vld [vmem:[%s2284_s18 + $0x38] sm:$0xf] }
 0x16a   : >> { %1375 = vst [vmem:[%s2280_s17 + $0x30] sm:$0xf] %v1374_v25  ;;  %1377 = vst [vmem:[%s2280_s17 + $0x34] sm:$0xf] %v1376_v54  ;;  %v1380_v27 = vld [vmem:[%s2284_s18 + $0x3c] sm:$0xf] }
 0x16b   : >> { %1379 = vst [vmem:[%s2280_s17 + $0x38] sm:$0xf] %v1378_v56  ;;  %v1382_v31 = vld [vmem:[%s2284_s18 + $0x40] sm:$0xf]  ;;  %v1384_v60 = vld [vmem:[%s2284_s18 + $0x44] sm:$0xf] }
 0x16c   : >> { %1381 = vst [vmem:[%s2280_s17 + $0x3c] sm:$0xf] %v1380_v27  ;;  %1383 = vst [vmem:[%s2280_s17 + $0x40] sm:$0xf] %v1382_v31  ;;  %v1386_v59 = vld [vmem:[%s2284_s18 + $0x48] sm:$0xf] }
 0x16d   : >> { %1385 = vst [vmem:[%s2280_s17 + $0x44] sm:$0xf] %v1384_v60  ;;  %v1388_v47 = vld [vmem:[%s2284_s18 + $0x4c] sm:$0xf]  ;;  %v1390_v0 = vld [vmem:[%s2284_s18 + $0x50] sm:$0xf] }
 0x16e   : >> { %1387 = vst [vmem:[%s2280_s17 + $0x48] sm:$0xf] %v1386_v59  ;;  %1389 = vst [vmem:[%s2280_s17 + $0x4c] sm:$0xf] %v1388_v47  ;;  %v1392_v43 = vld [vmem:[%s2284_s18 + $0x54] sm:$0xf] }
 0x16f   : >> { %1391 = vst [vmem:[%s2280_s17 + $0x50] sm:$0xf] %v1390_v0  ;;  %v1394_v61 = vld [vmem:[%s2284_s18 + $0x58] sm:$0xf]  ;;  %v1396_v14 = vld [vmem:[%s2284_s18 + $0x5c] sm:$0xf] }
 0x170   : >> { %1393 = vst [vmem:[%s2280_s17 + $0x54] sm:$0xf] %v1392_v43  ;;  %1395 = vst [vmem:[%s2280_s17 + $0x58] sm:$0xf] %v1394_v61  ;;  %v1398_v19 = vld [vmem:[%s2284_s18 + $0x60] sm:$0xf] }
 0x171   : >> { %1397 = vst [vmem:[%s2280_s17 + $0x5c] sm:$0xf] %v1396_v14  ;;  %v1400_v35 = vld [vmem:[%s2284_s18 + $0x64] sm:$0xf]  ;;  %v1402_v40 = vld [vmem:[%s2284_s18 + $0x68] sm:$0xf] }
 0x172   : >> { %1399 = vst [vmem:[%s2280_s17 + $0x60] sm:$0xf] %v1398_v19  ;;  %1401 = vst [vmem:[%s2280_s17 + $0x64] sm:$0xf] %v1400_v35  ;;  %v1404_v13 = vld [vmem:[%s2284_s18 + $0x6c] sm:$0xf] }
 0x173   : >> { %1403 = vst [vmem:[%s2280_s17 + $0x68] sm:$0xf] %v1402_v40  ;;  %v1406_v4 = vld [vmem:[%s2284_s18 + $0x70] sm:$0xf]  ;;  %v1408_v1 = vld [vmem:[%s2284_s18 + $0x74] sm:$0xf] }
 0x174   : >> { %1405 = vst [vmem:[%s2280_s17 + $0x6c] sm:$0xf] %v1404_v13  ;;  %1407 = vst [vmem:[%s2280_s17 + $0x70] sm:$0xf] %v1406_v4  ;;  %v1410_v16 = vld [vmem:[%s2284_s18 + $0x78] sm:$0xf] }
 0x175   : >> { %1409 = vst [vmem:[%s2280_s17 + $0x74] sm:$0xf] %v1408_v1  ;;  %v1412_v12 = vld [vmem:[%s2284_s18 + $0x7c] sm:$0xf]  ;;  %1411 = vst [vmem:[%s2280_s17 + $0x78] sm:$0xf] %v1410_v16 }
 0x176   : >> { %1413 = vst [vmem:[%s2280_s17 + $0x7c] sm:$0xf] %v1412_v12  ;;  %s3127_s12 = smov (%p1415_p1, %s1414_s12), 0  ;;  %s1344_s11 = sadd.s32 1, %s2292_s11  }
 0x177   : >> { %s1773_s13 = sshll.u32 %s3127_s12, 7  ;;  %p1343_p2 = scmp.ge.s32.totalorder %s1344_s11, %s2968_s26 }
 0x178   : >> { %s1419_s18 = scalar_lea.vmem %s2717_s24, %s1773_s13 [#allocation2]   ;;  %s1420_s17 = scalar_lea.vmem %s2964_s8, %s1773_s13  }
 0x179   : >> { %s3109_s10 = smov %s3127_s12  ;;  %1346 = sbr.rel (!%p1343_p2) target bundleno = 353 (0x161), region = 125 }
 0x17e PF: > { %s3072_s14 = sand.u32 31, %s3125_s28   ;;  %s1815_s15 = sshll.u32 %s2968_s26, 7 }
 0x17f   : > { %s1425_s25 = scalar_lea.vmem %s2717_s24, %s1815_s15 [#allocation2]   ;;  %s1427_s27 = scalar_lea.vmem %s2964_s8, %s1815_s15  }
 0x180   : > { %p1778_p3 = scmp.le.s32.totalorder %s3072_s14, 0 }
 0x181   : > { %s2294_s29 = smov (!%p1778_p3), %s1427_s27   ;;  %s2298_s5 = smov (!%p1778_p3), %s1425_s25  }
 0x182   : > { %1641 = sbr.rel (%p1778_p3) target bundleno = 399 (0x18f), region = 130  ;;  %s2302_s6 = smov (!%p1778_p3), 0  }
 0x183   : > { %s2306_s7 = smov (!%p1778_p3), 0  }
 0x187 LB: >> { %v1437_v21 = vld [vmem:[%s2300_s5] sm:$0xf]  ;;  %s1439_s28 = sadd.s32 1, %s2304_s6  ;;  %s1431_s7 = sadd.s32 1, %s2308_s7   ;;  %s2308_s7 = sphi %s2306_s7, %s1431_s7   ;;  %s2304_s6 = sphi %s2302_s6, %s2303_s6   ;;  %s2300_s5 = sphi %s2298_s5, %s1444_s5   ;;  %s2296_s29 = sphi %s2294_s29, %s1445_s29  }
 0x188   : >> { %1438 = vst [vmem:[%s2296_s29] sm:$0xf] %v1437_v21  ;;  %p1440_p4 = scmp.ge.s32.totalorder %s1439_s28, %s3072_s14  ;;  %p1430_p5 = scmp.ge.s32.totalorder %s1431_s7, %s3072_s14 }
 0x18a   : >> { %s3129_s28 = smov (%p1440_p4, %s1439_s28), 0  ;;  %1433 = sbr.rel (!%p1430_p5) target bundleno = 391 (0x187), region = 136 }
 0x18b   : >> { %s1779_s24 = sshll.u32 %s3129_s28, 2  ;;  %s2303_s6 = smov %s3129_s28  }
 0x18c   : >> { %s1444_s5 = scalar_lea.vmem %s1425_s25, %s1779_s24 [#allocation2]   ;;  %s1445_s29 = scalar_lea.vmem %s1427_s27, %s1779_s24  }
 0x18f PF: > { %s14_s21 = sadd.s32 1, %s2276_s21   ;;  %s3110_s15 = smov %s2256_s16 }
 0x190   : > { %p11_p6 = scmp.ge.s32.totalorder %s14_s21, 10   ;;  %s3111_s16 = smov %s2392_s30 }
 0x191   : > { %s3112_s17 = smov %s2268_s19  ;;  %s3113_s18 = smov %s2272_s20 }
 0x192   : > { %s3114_s19 = smov %s3117_s22  ;;  %s3115_s20 = smov %s3121_s23 }
 0x193   :  { %13 = sbr.rel (!%p11_p6) target bundleno = 4 (0x4), region = 147 }

// kernel: hubert_feature_encoder.6
= control target key start
LH: loop header
LB: loop body
LE: loop exit
PB: predicated region body
PF: predicated region fallthrough
CT: control target
= control target key end

     0   :  { %s3132_s15 = smov 0   ;;  %s3134_s16 = smov 0   ;;  %s3995_s0 = inlined_call_operand.vmem [shape: bf16[2,400,256], index: 0, kind: input, shape index: {}, may-alias: {0,1}]   ;;  %s3996_s1 = inlined_call_operand.vmem [shape: bf16[2,400,256], index: 1, kind: input, shape index: {}, may-alias: {0,1}]   ;;  %s3997_s2 = inlined_call_operand.vmem [shape: bf16[384,128], index: 2, kind: input, shape index: {}]   ;;  %s3998_s3 = inlined_call_operand.vmem [shape: f32[3,128], index: 3, kind: input, shape index: {}]   ;;  %s3999_s4 = inlined_call_operand.vmem [shape: bf16[2,400,128], index: 4, kind: output, shape index: {}]  }
   0x1   :  { %s3136_s17 = smov 0   ;;  %s3138_s18 = smov 0  }
   0x2   :  { %s3140_s19 = smov 0   ;;  %s3142_s20 = smov 0  }
   0x3   :  { %s3144_s21 = smov 0  }
   0x4 LB: > { %s23_s22 = sadd.s32 1, %s3065_s19  ;;  %s26_s23 = sadd.s32 1, %s3069_s20  ;;  %s3073_s21 = sphi %s3144_s21, %s14_s21   ;;  %s3069_s20 = sphi %s3142_s20, %s4010_s20   ;;  %s3065_s19 = sphi %s3140_s19, %s4009_s19   ;;  %s3061_s18 = sphi %s3138_s18, %s4008_s18   ;;  %s3057_s17 = sphi %s3136_s17, %s4007_s17   ;;  %s3053_s16 = sphi %s3134_s16, %s4006_s16   ;;  %s3049_s15 = sphi %s3132_s15, %s4005_s15  }
   0x5   : > { %p24_p0 = scmp.ge.s32.totalorder %s23_s22, 2  ;;  %s2238_s24 = sadd.s32 4294967295, %s3073_s21  }
   0x6   : > { %p155_p1 = scmp.ne.s32.totalorder %s3053_s16, %s3049_s15  ;;  %p156_p2 = scmp.eq.s32.totalorder %s2238_s24, 3 }
   0x7   : > { %s4012_s22 = smov (%p24_p0, %s23_s22), 0  ;;  %s4014_s23 = smov (!%p24_p0, %s26_s23), %s3069_s20 }
   0x8   : > { %s141_s25 = ssub.s32 %s3065_s19, %s4012_s22  ;;  %p28_p3 = scmp.ge.s32.totalorder %s4014_s23, 2 }
   0x9   : > { %p2244_p4 = scmp.ge.s32.totalorder %s3073_s21, 1  ;;  %p3178_p5 = por %p156_p2, %p155_p1 }
   0xa   : > { %p234_p6 = scmp.lt.s32.totalorder %s3073_s21, 5  ;;  %s4016_s23 = smov (%p28_p3, %s4014_s23), 0 }
   0xb   : > { %s140_s27 = ssub.s32 %s3069_s20, %s4016_s23  ;;  %s145_s29 = sadd.s32 1, %s3053_s16 }
   0xc   : > { %p235_p7 = pnand %p2244_p4, %p234_p6  ;;  %s142_s28 = sor.u32 %s141_s25, %s140_s27 }
   0xd   : > { %p143_p8 = scmp.eq.s32.totalorder %s142_s28, 0  ;;  %p284_p9 = scmp.lt.s32.totalorder (!%p235_p7), %s3057_s17, 1 }
   0xe   : > { %238 = sbr.rel (%p235_p7) target bundleno = 437 (0x1b5), region = 36  ;;  %p292_p10 = scmp.lt.s32.totalorder (!%p235_p7), %s3061_s18, 1 }
   0xf   : > { %s3189_s30 = scalar_select %p143_p8, %s3053_s16, %s145_s29  }
  0x10   : > { %s2328_s28 = sshll.u32 (!%p235_p7), %s3057_s17, 8 }
  0x13   : > { %v2835_v0 = vld [vmem:[%s3997_s2 + $0xb8] sm:$0xff]   ;;  %s285_s11 = scalar_select %p284_p9, %s3057_s17, 1  ;;  %v2838_v3 = vld [vmem:[%s3997_s2 + $0xb0] sm:$0xff]   ;;  %v2841_v6 = vld [vmem:[%s3997_s2 + $0xa8] sm:$0xff]   ;;  %vm525_vm0 = vsmask.f32 7424 }
  0x14   : > { %v3198_v1 = vld [vmem:[%s3997_s2 + $0x78] sm:$0xff]   ;;  %2649 = vmatprep.subr.bf16.mxu0 %v2835_v0  ;;  %v3215_v4 = vld [vmem:[%s3997_s2 + $0x70] sm:$0xff]   ;;  %v3229_v7 = vld [vmem:[%s3997_s2 + $0x68] sm:$0xff]   ;;  %s3240_s10 = scalar_select %p292_p10, %s3061_s18, 1 }
  0x15   : > { %v3203_v2 = vld [vmem:[%s3997_s2 + $0x38] sm:$0xff]   ;;  %2697 = vmatprep.subr.bf16.mxu1 %v3198_v1  ;;  %2650 = vmatpush3.bf16.msra.mxu0 %v2835_v0  ;;  %s2246_s25 = sshll.u32 %s285_s11, 5  ;;  %v3220_v5 = vld [vmem:[%s3997_s2 + $0x30] sm:$0xff]   ;;  %v3235_v8 = vld [vmem:[%s3997_s2 + $0x28] sm:$0xff]   ;;  %s2714_s7 = smul.u32 (%p3178_p5), 50, %s3061_s18 }
  0x16   : > { %2705 = vmatpush3.bf16.msra.mxu1 %v3203_v2  ;;  %2651 = vmatprep.subr.bf16.mxu0 %v2838_v3  ;;  %p294_p11 = scmp.lt.s32.totalorder %s2246_s25, 49  ;;  %v2844_v9 = vld [vmem:[%s3997_s2 + $0xa0] sm:$0xff]   ;;  %v2847_v12 = vld [vmem:[%s3997_s2 + $0x98] sm:$0xff]   ;;  %s2713_s5 = smul.u32 100, %s3240_s10  ;;  %v2850_v15 = vld [vmem:[%s3997_s2 + $0x90] sm:$0xff]  }
  0x17   : > { %2698 = vmatprep.subr.bf16.mxu1 %v3215_v4  ;;  %v3249_v10 = vld [vmem:[%s3997_s2 + $0x60] sm:$0xff]   ;;  %v3265_v13 = vld [vmem:[%s3997_s2 + $0x58] sm:$0xff]   ;;  %v3282_v16 = vld [vmem:[%s3997_s2 + $0x50] sm:$0xff]  }
  0x18   : > { %s4018_s25 = smov (!%p294_p11, %s2246_s25), 49  ;;  %v3254_v11 = vld [vmem:[%s3997_s2 + $0x20] sm:$0xff]   ;;  %v3270_v14 = vld [vmem:[%s3997_s2 + $0x18] sm:$0xff]   ;;  %v3287_v17 = vld [vmem:[%s3997_s2 + $0x10] sm:$0xff]  }
  0x19   : > { %2652 = vmatpush3.bf16.msra.mxu0 %v2838_v3  ;;  %s2247_s8 = sshll.u32 %s4018_s25, 1  ;;  %v2853_v18 = vld [vmem:[%s3997_s2 + $0x88] sm:$0xff]   ;;  %v2856_v21 = vld [vmem:[%s3997_s2 + $0x80] sm:$0xff]  }
  0x1a   : > { %2706 = vmatpush3.bf16.msra.mxu1 %v3220_v5  ;;  %2653 = vmatprep.subr.bf16.mxu0 %v2841_v6  ;;  %s298_s14 = sadd.s32 %s2713_s5, %s2247_s8  ;;  %v3297_v19 = vld [vmem:[%s3997_s2 + $0x48] sm:$0xff]   ;;  %v3315_v22 = vld [vmem:[%s3997_s2 + $0x40] sm:$0xff]   ;;  %s3355_s8 = sshll.u32 %s3057_s17, 5 }
  0x1b   : > { %2699 = vmatprep.subr.bf16.mxu1 %v3229_v7  ;;  %s2248_s29 = sshll.u32 %s298_s14, 2  ;;  %v3302_v20 = vld [vmem:[%s3997_s2 + $0x8] sm:$0xff]   ;;  %v3324_v25 = vld [vmem:[%s3997_s2] sm:$0xff]   ;;  %s2383_s9 = sadd.s32 32, %s3355_s8 }
  0x1c   : > { %s3310_s25 = scalar_lea.vmem %s3995_s0, %s2248_s29  ;;  %p3365_p12 = scmp.lt.s32.totalorder %s2383_s9, 49 }
  0x1d   : > { %2654 = vmatpush3.bf16.msra.mxu0 %v2841_v6  ;;  %v2859_v23 = vld [vmem:[%s3310_s25] ss:$8 sps:$4 sm:$0xff]   ;;  %v2860_v24 = vld [vmem:[%s3310_s25 + $0x10] ss:$8 sps:$4 sm:$0xff]   ;;  %v2863_v29 = vld [vmem:[%s3310_s25 + $0x44] ss:$8 sps:$4 sm:$0xff]  }
  0x1e   : > { %2707 = vmatpush3.bf16.msra.mxu1 %v3235_v8  ;;  %2655 = vmatprep.subr.bf16.mxu0 %v2844_v9  ;;  %v527_v26 = vshrl.u32 %v2859_v23, 16  ;;  %v529_v27 = vshll.u32 %v2859_v23, 16  ;;  %v534_v28 = vshll.u32 %v2860_v24, 16  ;;  %v538_v30 = vshrl.u32 %v2860_v24, 16  ;;  %v2864_v31 = vld [vmem:[%s3310_s25 + $0x20] ss:$8 sps:$4 sm:$0xff]  }
  0x1f   : > { %2700 = vmatprep.subr.bf16.mxu1 %v3249_v10  ;;  %v2861_v34 = vld [vmem:[%s3310_s25 + $0x40] ss:$8 sps:$4 sm:$0xff]   ;;  %1203 = vmatprep.mubr.bf16.mxu1 %v2863_v29  ;;  %v542_v35 = vshll.u32 %v2864_v31, 16  ;;  %v2865_v36 = vld [vmem:[%s3310_s25 + $0x30] ss:$8 sps:$4 sm:$0xff]   ;;  %v546_v37 = vshrl.u32 %v2864_v31, 16 }
  0x20   : > { %v531_v32 = vrot.slane %v529_v27, 1  ;;  %v536_v33 = vrot.slane %v534_v28, 1  ;;  %v2866_v40 = vld [vmem:[%s3310_s25 + $0x54] ss:$8 sps:$4 sm:$0xff]   ;;  %v550_v42 = vshll.u32 %v2865_v36, 16  ;;  %v554_v44 = vshrl.u32 %v2865_v36, 16 }
  0x21   : > { %2656 = vmatpush3.bf16.msra.mxu0 %v2844_v9  ;;  %v544_v41 = vrot.slane %v542_v35, 1  ;;  %v2868_v43 = vld [vmem:[%s3310_s25 + $0x40] ss:$8 sps:$4 sm:$0xff]   ;;  %v2870_v50 = vld [vmem:[%s3310_s25 + $0x50] ss:$8 sps:$4 sm:$0xff]   ;;  %s4020_s9 = smov (!%p3365_p12, %s2383_s9), 49 }
  0x22   : > { %2708 = vmatpush3.bf16.msra.mxu1 %v3254_v11  ;;  %2657 = vmatprep.subr.bf16.mxu0 %v2847_v12  ;;  %v532_v38 = vor.u32 %v531_v32, %v527_v26  ;;  %v540_v39 = vor.u32 %v538_v30, %v536_v33  ;;  %v552_v48 = vrot.slane %v550_v42, 1  ;;  %v558_v49 = vshll.u32 %v2868_v43, 16  ;;  %v2873_v56 = vld [vmem:[%s3310_s25 + $0x60] ss:$8 sps:$4 sm:$0xff]   ;;  %v2875_v59 = vld [vmem:[%s3310_s25 + $0x70] ss:$8 sps:$4 sm:$0xff]  }
  0x23   : > { %2701 = vmatprep.subr.bf16.mxu1 %v3265_v13  ;;  %v548_v47 = vor.u32 %v546_v37, %v544_v41  ;;  %v562_v51 = vshrl.u32 %v2868_v43, 16  ;;  %v566_v55 = vshll.u32 %v2870_v50, 16  ;;  %v2869_v60 = vld [vmem:[%s3310_s25 + $0x50] ss:$8 sps:$4 sm:$0xff]   ;;  %v574_v61 = vshll.u32 %v2873_v56, 16  ;;  %s4022_s9 = smov (!%p3365_p12, %s4020_s9), 49 }
  0x24   : > { %v537_v45 = vsel %vm525_vm0, %v532_v38, %v536_v33  ;;  %v545_v46 = vsel %vm525_vm0, %v540_v39, %v544_v41  ;;  %v556_v53 = vor.u32 %v554_v44, %v552_v48  ;;  %v560_v54 = vrot.slane %v558_v49, 1  ;;  %v2871_v63 = vld [vmem:[%s3310_s25 + $0x64] ss:$8 sps:$4 sm:$0xff]   ;;  %v2878_v6 = vld [vmem:[%s3310_s25 + $0x80] ss:$8 sps:$4 sm:$0xff]   ;;  %s2253_s12 = sshll.u32 %s4022_s9, 1  ;;  %s1866_s9 = sadd.s32 (%p3178_p5), %s2714_s7, %s3355_s8 }
  0x25   : > { %2658 = vmatpush3.bf16.msra.mxu0 %v2847_v12  ;;  %2665 = vmatprep.mubr.bf16.mxu0 %v537_v45  ;;  %v553_v52 = vsel %vm525_vm0, %v548_v47, %v552_v48  ;;  %v568_v58 = vrot.slane %v566_v55, 1  ;;  %v570_v0 = vshrl.u32 %v2870_v50, 16  ;;  %v582_v3 = vshll.u32 %v2875_v59, 16  ;;  %v2876_v23 = vld [vmem:[%s3310_s25 + $0x74] ss:$8 sps:$4 sm:$0xff]   ;;  %s319_s13 = sadd.s32 %s2713_s5, %s2253_s12  ;;  %s281_s17 = sand.u32 1, %s3049_s15  }
  0x26   : > { %2709 = vmatpush3.bf16.msra.mxu1 %v3270_v14  ;;  %2659 = vmatprep.subr.bf16.mxu0 %v2850_v15  ;;  %v564_v57 = vor.u32 %v562_v51, %v560_v54  ;;  %v561_v62 = vsel %vm525_vm0, %v556_v53, %v560_v54  ;;  %v586_v24 = vshrl.u32 %v2875_v59, 16  ;;  %v2883_v28 = vld [vmem:[%s3310_s25 + $0xa0] ss:$8 sps:$4 sm:$0xff]   ;;  %v2885_v31 = vld [vmem:[%s3310_s25 + $0xb0] ss:$8 sps:$4 sm:$0xff]   ;;  %s2254_s14 = sshll.u32 %s319_s13, 2 }
  0x27   : > { %2702 = vmatprep.subr.bf16.mxu1 %v3282_v16  ;;  %v572_v9 = vor.u32 %v570_v0, %v568_v58  ;;  %v584_v12 = vrot.slane %v582_v3, 1  ;;  %v606_v32 = vshll.u32 %v2883_v28, 16  ;;  %v610_v37 = vshrl.u32 %v2883_v28, 16  ;;  %v2890_v42 = vld [vmem:[%s3310_s25 + $0xd0] ss:$8 sps:$4 sm:$0xff]   ;;  %s321_s10 = scalar_lea.vmem %s3996_s1, %s2254_s14  ;;  %s3519_s15 = sshll.u32 %s281_s17, 7 }
  0x28   : > { %v614_v38 = vshll.u32 %v2885_v31, 16  ;;  %v2886_v44 = vld [vmem:[%s3310_s25 + $0x94] ss:$8 sps:$4 sm:$0xff]   ;;  %v618_v45 = vshrl.u32 %v2885_v31, 16  ;;  %v630_v48 = vshll.u32 %v2890_v42, 16  ;;  %s3549_s6 = scalar_lea.vmem [#allocation2], %s3519_s15  }
  0x29   : > { %2660 = vmatpush3.bf16.msra.mxu0 %v2850_v15  ;;  %v2880_v15 = vld [vmem:[%s3310_s25 + $0x90] ss:$8 sps:$4 sm:$0xff]   ;;  %v588_v29 = vor.u32 %v586_v24, %v584_v12  ;;  %v444_v0 = vld [vmem:[%s321_s10] sm:$0xf]  ;;  %v2896_v3 = vld [vmem:[%s3310_s25 + $0xb4] ss:$8 sps:$4 sm:$0xff]  }
  0x2a   : > { %2710 = vmatpush3.bf16.msra.mxu1 %v3287_v17  ;;  %2661 = vmatprep.subr.bf16.mxu0 %v2853_v18  ;;  %v598_v27 = vshll.u32 %v2880_v15, 16  ;;  %v602_v35 = vshrl.u32 %v2880_v15, 16  ;;  %v616_v41 = vrot.slane %v614_v38, 1  ;;  %v632_v51 = vrot.slane %v630_v48, 1  ;;  %v2889_v53 = vld [vmem:[%s3310_s25 + $0x90] ss:$8 sps:$4 sm:$0xff]  }
  0x2b   : > { %2703 = vmatprep.subr.bf16.mxu1 %v3297_v19  ;;  %v2898_v15 = vld [vmem:[%s3310_s25 + $0xb0] ss:$8 sps:$4 sm:$0xff]   ;;  %v2904_v24 = vld [vmem:[%s3310_s25 + $0xc0] ss:$8 sps:$4 sm:$0xff]   ;;  %v2911_v28 = vld [vmem:[%s3310_s25 + $0x24] ss:$8 sps:$4 sm:$0xff]  }
  0x2c   : > { %v600_v30 = vrot.slane %v598_v27, 1  ;;  %v620_v49 = vor.u32 %v618_v45, %v616_v41  ;;  %v2909_v27 = vld [vmem:[%s3310_s25 + $0x10] ss:$8 sps:$4 sm:$0xff]   ;;  %v2917_v31 = vld [vmem:[%s3310_s25 + $0x34] ss:$8 sps:$4 sm:$0xff]   ;;  %s1860_s29 = ssub.s32 (%p3178_p5), 50, %s3355_s8 }
  0x2d   : > { %2662 = vmatpush3.bf16.msra.mxu0 %v2853_v18  ;;  %v590_v18 = vshll.u32 %v2878_v6, 16  ;;  %v3443_v48 = vld [vmem:[%s3998_s3] ss:$0 sm:$0xff]  ;;  %p1861_p13 = scmp.lt.s32.totalorder (%p3178_p5), %s1860_s29, 32  ;;  %s2365_s11 = sshll.u32 (%p3178_p5), %s1866_s9, 2 }
  0x2e   : > { %2711 = vmatpush3.bf16.msra.mxu1 %v3302_v20  ;;  %2663 = vmatprep.subr.bf16.mxu0 %v2856_v21  ;;  %v604_v39 = vor.u32 %v602_v35, %v600_v30  ;;  %s3859_s24 = scalar_lea.vmem (%p3178_p5), %s3999_s4, %s2365_s11  }
  0x2f   : > { %2704 = vmatprep.subr.bf16.mxu1 %v3315_v22 }
  0x31   : > { %2664 = vmatpush3.bf16.msra.mxu0 %v2856_v21 }
  0x32   : > { %2712 = vmatpush3.bf16.msra.mxu1 %v3324_v25  ;;  %2537 = vmatprep.subr.bf16.mxu0 %v3198_v1  ;;  %v569_v1 = vsel %vm525_vm0, %v564_v57, %v568_v58 }
  0x34   : > { %2666 = vmatmul.mubr.bf16.vlgmr.msra.gmra.mxu0 %v545_v46 }
  0x35   : > { %1204 = vmatmul.mubr.bf16.vlgmr.msra.gmra.mxu1 %v2861_v34  ;;  %2538 = vmatpush3.bf16.msra.mxu0 %v3203_v2  ;;  %v578_v2 = vshrl.u32 %v2873_v56, 16  ;;  %v2881_v34 = vld [vmem:[%s3310_s25 + $0x84] ss:$8 sps:$4 sm:$0xff]   ;;  %v634_v56 = vshrl.u32 %v2890_v42, 16 }
  0x36   : > { %1211 = vmatprep.mubr.bf16.mxu1 %v2866_v40  ;;  %2669 = vmatprep.mubr.bf16.mxu0 %v553_v52  ;;  %v2895_v52 = vld [vmem:[%s3310_s25 + $0xf0] ss:$8 sps:$4 sm:$0xff]  }
  0x37   : > { %2539 = vmatprep.subr.bf16.mxu0 %v3215_v4  ;;  %v576_v4 = vrot.slane %v574_v61, 1  ;;  %v646_v59 = vshll.u32 %v2895_v52, 16  ;;  %v636_v61 = vor.u32 %v634_v56, %v632_v51 }
  0x39   : > { %2540 = vmatpush3.bf16.msra.mxu0 %v3220_v5  ;;  %v580_v5 = vor.u32 %v578_v2, %v576_v4  ;;  %v577_v21 = vsel %vm525_vm0, %v572_v9, %v576_v4  ;;  %v650_v4 = vshrl.u32 %v2895_v52, 16 }
  0x3a   : > { %2541 = vmatprep.subr.bf16.mxu0 %v3229_v7  ;;  %v2874_v7 = vld [vmem:[%s3310_s25 + $0x60] ss:$8 sps:$4 sm:$0xff]  }
  0x3b   : > { %v585_v26 = vsel %vm525_vm0, %v580_v5, %v584_v12 }
  0x3c   : > { %2670 = vmatmul.mubr.bf16.gmra.mxu0 %v561_v62 }
  0x3d   : > { %1212 = vmatmul.mubr.bf16.gmra.mxu1 %v2869_v60  ;;  %2673 = vmatprep.mubr.bf16.mxu0 %v569_v1  ;;  %v2894_v1 = vld [vmem:[%s3310_s25 + $0xa0] ss:$8 sps:$4 sm:$0xff]  }
  0x3e   : > { %1219 = vmatprep.mubr.bf16.mxu1 %v2871_v63  ;;  %2542 = vmatpush3.bf16.msra.mxu0 %v3235_v8  ;;  %v594_v8 = vshrl.u32 %v2878_v6, 16  ;;  %v648_v63 = vrot.slane %v646_v59, 1  ;;  %v654_v6 = vshll.u32 %v444_v0, 16 }
  0x3f   : > { %2543 = vmatprep.subr.bf16.mxu0 %v3249_v10  ;;  %v592_v10 = vrot.slane %v590_v18, 1  ;;  %v2901_v18 = vld [vmem:[%s3310_s25 + $0x4] ss:$8 sps:$4 sm:$0xff]  }
  0x40   : > { %v652_v5 = vor.u32 %v650_v4, %v648_v63  ;;  %v656_v12 = vrot.slane %v654_v6, 1 }
  0x41   : > { %v593_v33 = vsel %vm525_vm0, %v588_v29, %v592_v10  ;;  %v2913_v29 = vld [vmem:[%s3310_s25 + $0xe4] ss:$8 sps:$4 sm:$0xff]  }
  0x42   : > { %2544 = vmatpush3.bf16.msra.mxu0 %v3254_v11  ;;  %v596_v11 = vor.u32 %v594_v8, %v592_v10  ;;  %v2907_v8 = vld [vmem:[%s3310_s25 + $0xd4] ss:$8 sps:$4 sm:$0xff]   ;;  %v2910_v10 = vld [vmem:[%s3310_s25 + $0xd0] ss:$8 sps:$4 sm:$0xff]  }
  0x43   : > { %2545 = vmatprep.subr.bf16.mxu0 %v3265_v13  ;;  %v2879_v13 = vld [vmem:[%s3310_s25 + $0x70] ss:$8 sps:$4 sm:$0xff]  }
  0x44   : > { %2674 = vmatmul.mubr.bf16.gmra.mxu0 %v577_v21  ;;  %v601_v36 = vsel %vm525_vm0, %v596_v11, %v600_v30  ;;  %v2902_v21 = vld [vmem:[%s3310_s25 + $0xc4] ss:$8 sps:$4 sm:$0xff]   ;;  %v2915_v11 = vld [vmem:[%s3310_s25 + $0x20] ss:$8 sps:$4 sm:$0xff]  }
  0x45   : > { %1220 = vmatmul.mubr.bf16.gmra.mxu1 %v2874_v7  ;;  %2677 = vmatprep.mubr.bf16.mxu0 %v585_v26  ;;  %v657_v7 = vsel %vm525_vm0, %v652_v5, %v656_v12  ;;  %v2905_v26 = vld [vmem:[%s3310_s25 + $0x14] ss:$8 sps:$4 sm:$0xff]   ;;  %v2916_v30 = vld [vmem:[%s3310_s25 + $0xe0] ss:$8 sps:$4 sm:$0xff]  }
  0x46   : > { %1227 = vmatprep.mubr.bf16.mxu1 %v2876_v23  ;;  %2546 = vmatpush3.bf16.msra.mxu0 %v3270_v14  ;;  %v608_v14 = vrot.slane %v606_v32, 1  ;;  %v2899_v23 = vld [vmem:[%s3310_s25] ss:$8 sps:$4 sm:$0xff]   ;;  %v2921_v32 = vld [vmem:[%s3310_s25 + $0x30] ss:$8 sps:$4 sm:$0xff]  }
  0x47   : > { %2547 = vmatprep.subr.bf16.mxu0 %v3282_v16  ;;  %v2888_v16 = vld [vmem:[%s3310_s25 + $0xc0] ss:$8 sps:$4 sm:$0xff]  }
  0x48   : > { %v612_v40 = vor.u32 %v610_v37, %v608_v14  ;;  %v609_v43 = vsel %vm525_vm0, %v604_v39, %v608_v14  ;;  %v626_v47 = vshrl.u32 %v2888_v16, 16 }
  0x4a   : > { %2548 = vmatpush3.bf16.msra.mxu0 %v3287_v17  ;;  %v2884_v17 = vld [vmem:[%s3310_s25 + $0x80] ss:$8 sps:$4 sm:$0xff]   ;;  %v617_v46 = vsel %vm525_vm0, %v612_v40, %v616_v41 }
  0x4b   : > { %2549 = vmatprep.subr.bf16.mxu0 %v3297_v19  ;;  %v622_v19 = vshll.u32 %v2888_v16, 16 }
  0x4c   : > { %2678 = vmatmul.mubr.bf16.gmra.mxu0 %v593_v33  ;;  %v2922_v33 = vld [vmem:[%s3310_s25 + $0xf0] ss:$8 sps:$4 sm:$0xff]  }
  0x4d   : > { %1228 = vmatmul.mubr.bf16.gmra.mxu1 %v2879_v13  ;;  %2681 = vmatprep.mubr.bf16.mxu0 %v601_v36  ;;  %v2919_v13 = vld [vmem:[%s3310_s25 + $0xf4] ss:$8 sps:$4 sm:$0xff]  }
  0x4e   : > { %1235 = vmatprep.mubr.bf16.mxu1 %v2881_v34  ;;  %2550 = vmatpush3.bf16.msra.mxu0 %v3302_v20  ;;  %v624_v20 = vrot.slane %v622_v19, 1 }
  0x4f   : > { %2551 = vmatprep.subr.bf16.mxu0 %v3315_v22  ;;  %v2893_v22 = vld [vmem:[%s3310_s25 + $0xe0] ss:$8 sps:$4 sm:$0xff]  }
  0x50   : > { %v628_v50 = vor.u32 %v626_v47, %v624_v20  ;;  %v638_v54 = vshll.u32 %v2893_v22, 16  ;;  %v625_v55 = vsel %vm525_vm0, %v620_v49, %v624_v20  ;;  %v642_v58 = vshrl.u32 %v2893_v22, 16 }
  0x52   : > { %2552 = vmatpush3.bf16.msra.mxu0 %v3324_v25  ;;  %v2891_v25 = vld [vmem:[%s3310_s25 + $0xa4] ss:$8 sps:$4 sm:$0xff]   ;;  %v633_v57 = vsel %vm525_vm0, %v628_v50, %v632_v51  ;;  %v640_v60 = vrot.slane %v638_v54, 1 }
  0x54   : > { %2682 = vmatmul.mubr.bf16.gmra.mxu0 %v609_v43  ;;  %v644_v62 = vor.u32 %v642_v58, %v640_v60  ;;  %v641_v2 = vsel %vm525_vm0, %v636_v61, %v640_v60 }
  0x55   : > { %1236 = vmatmul.mubr.bf16.gmra.mxu1 %v2884_v17  ;;  %2685 = vmatprep.mubr.bf16.mxu0 %v617_v46 }
  0x56   : > { %1243 = vmatprep.mubr.bf16.mxu1 %v2886_v44  ;;  %v649_v9 = vsel %vm525_vm0, %v644_v62, %v648_v63 }
  0x5c   : > { %2686 = vmatmul.mubr.bf16.gmra.mxu0 %v625_v55 }
  0x5d   : > { %1244 = vmatmul.mubr.bf16.gmra.mxu1 %v2889_v53  ;;  %2689 = vmatprep.mubr.bf16.mxu0 %v633_v57  ;;  %v1497_v57 = vlaneseq }
  0x5e   : > { %1251 = vmatprep.mubr.bf16.mxu1 %v2891_v25 }
  0x5f   : > { %v3456_v4 = vshrl.u32 %v1497_v57, 7 }
  0x64   : > { %2690 = vmatmul.mubr.bf16.gmra.mxu0 %v641_v2 }
  0x65   : > { %1252 = vmatmul.mubr.bf16.gmra.mxu1 %v2894_v1  ;;  %2693 = vmatprep.mubr.bf16.mxu0 %v649_v9 }
  0x66   : > { %1259 = vmatprep.mubr.bf16.mxu1 %v2896_v3 }
  0x6c   : > { %2694 = vmatmul.mubr.bf16.gmra.mxu0 %v657_v7 }
  0x6d   : > { %1260 = vmatmul.mubr.bf16.gmra.mxu1 %v2898_v15  ;;  %1171 = vmatprep.mubr.bf16.mxu0 %v2901_v18 }
  0x6e   : > { %1267 = vmatprep.mubr.bf16.mxu1 %v2902_v21 }
  0x74   : > { %1172 = vmatmul.mubr.bf16.vlgmr.msra.gmra.mxu0 %v2899_v23 }
  0x75   : > { %1268 = vmatmul.mubr.bf16.gmra.mxu1 %v2904_v24  ;;  %1179 = vmatprep.mubr.bf16.mxu0 %v2905_v26  ;;  %v1508_v26 = vadd.s32 80, %v3456_v4 }
  0x76   : > { %1275 = vmatprep.mubr.bf16.mxu1 %v2907_v8 }
  0x7c   : > { %1180 = vmatmul.mubr.bf16.gmra.mxu0 %v2909_v27 }
  0x7d   : > { %1276 = vmatmul.mubr.bf16.gmra.mxu1 %v2910_v10  ;;  %1187 = vmatprep.mubr.bf16.mxu0 %v2911_v28  ;;  %v3468_v28 = vstv %s2328_s28 }
  0x7e   : > { %1283 = vmatprep.mubr.bf16.mxu1 %v2913_v29  ;;  %v1506_v29 = vadd.s32 64, %v3456_v4 }
  0x84   : > { %1188 = vmatmul.mubr.bf16.gmra.mxu0 %v2915_v11  ;;  %v1509_v11 = vadd.s32 88, %v3456_v4 }
  0x85   : > { %1284 = vmatmul.mubr.bf16.gmra.mxu1 %v2916_v30  ;;  %1195 = vmatprep.mubr.bf16.mxu0 %v2917_v31 }
  0x86   : > { %1291 = vmatprep.mubr.bf16.mxu1 %v2919_v13 }
  0x8c   : > { %1196 = vmatmul.mubr.bf16.gmra.mxu0 %v2921_v32 }
  0x8d   : > { %1292 = vmatmul.mubr.bf16.gmra.mxu1 %v2922_v33 }
  0xf4   : > { %v3424_v34 = vpop.f32.mrf.mxu0 }
  0xf5   : > { %v2577_v35 = vpop.f32.mrf.mxu1 }
  0xf6   : > { %v3426_v36 = vpop.f32.mrf.mxu0 }
  0xf7   : > { %v2578_v37 = vpop.f32.mrf.mxu1 }
  0xf8   : > { %v3428_v38 = vpop.f32.mrf.mxu0  ;;  %v2579_v22 = vadd.f32 %v2578_v37, %v2577_v35  ;;  %v1507_v35 = vadd.s32 72, %v3456_v4 }
  0xf9   : > { %v2580_v14 = vpop.f32.mrf.mxu1 }
  0xfa   : > { %v3430_v16 = vpop.f32.mrf.mxu0 }
  0xfb   : > { %v2581_v39 = vpop.f32.mrf.mxu1 }
  0xfc   : > { %v3432_v40 = vpop.f32.mrf.mxu0  ;;  %v2582_v60 = vadd.f32 %v2581_v39, %v2580_v14 }
  0xfd   : > { %v2583_v41 = vpop.f32.mrf.mxu1 }
  0xfe   : > { %v3434_v42 = vpop.f32.mrf.mxu0 }
  0xff   : > { %v2584_v17 = vpop.f32.mrf.mxu1 }
 0x100   : > { %v3436_v19 = vpop.f32.mrf.mxu0  ;;  %v2585_v46 = vadd.f32 %v2584_v17, %v2583_v41  ;;  %v3480_v41 = vadd.s32 %v3468_v28, %v1508_v26  ;;  %v1513_v26 = vadd.s32 120, %v3456_v4 }
 0x101   : > { %v2586_v43 = vpop.f32.mrf.mxu1 }
 0x102   : > { %v3438_v44 = vpop.f32.mrf.mxu0  ;;  %vm1574_vm1 = vcmp.lt.s32.totalorder %v3480_v41, 399 }
 0x103   : > { %v2587_v45 = vpop.f32.mrf.mxu1 }
 0x104   : > { %v2675_v47 = vpop.f32.mrf.mxu0  ;;  %v2588_v52 = vadd.f32 %v2587_v45, %v2586_v43  ;;  %v3487_v45 = vadd.s32 %v3468_v28, %v1506_v29 }
 0x105   : > { %v2589_v20 = vpop.f32.mrf.mxu1  ;;  %v1214_v49 = vadd.f32 %v2675_v47, %v2585_v46  ;;  %v1543_v46 = vadd.s32 %v3468_v28, %v1509_v11 }
 0x106   : > { %v788_v50 = vpop.f32.mrf.mxu0  ;;  %vm1572_vm2 = vcmp.lt.s32.totalorder %v3487_v45, 399 }
 0x107   : > { %v2590_v51 = vpop.f32.mrf.mxu1  ;;  %v3446_v53 = vadd.f32 %v3443_v48, %v1214_v49  ;;  %v1206_v54 = vadd.f32 %v2579_v22, %v788_v50  ;;  %vm1575_vm3 = vcmp.lt.s32.totalorder %v1543_v46, 399 }
 0x108   : > { %v2676_v55 = vpop.f32.mrf.mxu0  ;;  %v2591_v6 = vadd.f32 %v2590_v51, %v2589_v20 }
 0x109   : > { %v2592_v25 = vpop.f32.mrf.mxu1  ;;  %v1379_v56 = vmul.f32 0.70710677, %v3446_v53  ;;  %v3450_v58 = vadd.f32 %v3443_v48, %v1206_v54  ;;  %v1217_v59 = vadd.f32 %v2676_v55, %v2588_v52  ;;  %v3492_v52 = vadd.s32 %v3468_v28, %v1507_v35 }
 0x10a   : > { %v791_v61 = vpop.f32.mrf.mxu0  ;;  %v1510_v54 = vadd.s32 96, %v3456_v4 }
 0x10b   : > { %v2593_v62 = vpop.f32.mrf.mxu1  ;;  %2923 = verf.f32 %v1379_v56  ;;  %v1377_v63 = vmul.f32 0.70710677, %v3450_v58  ;;  %v3454_v0 = vadd.f32 %v3443_v48, %v1217_v59  ;;  %v1209_v1 = vadd.f32 %v2582_v60, %v791_v61 }
 0x10c   : > { %v2679_v2 = vpop.f32.mrf.mxu0  ;;  %v2594_v8 = vadd.f32 %v2593_v62, %v2592_v25  ;;  %v1512_v61 = vadd.s32 112, %v3456_v4  ;;  %vm1573_vm4 = vcmp.lt.s32.totalorder %v3492_v52, 399 }
 0x10d   : > { %v2595_v3 = vpop.f32.mrf.mxu1  ;;  %2925 = verf.f32 %v1377_v63  ;;  %v1380_v9 = vmul.f32 0.70710677, %v3454_v0  ;;  %v3460_v5 = vadd.f32 %v3443_v48, %v1209_v1 }
 0x10e   : > { %v804_v12 = vpop.f32.mrf.mxu0 }
 0x10f   : > { %v2596_v15 = vpop.f32.mrf.mxu1  ;;  %2927 = verf.f32 %v1380_v9  ;;  %v1222_v7 = vadd.f32 %v2591_v6, %v804_v12  ;;  %v1378_v21 = vmul.f32 0.70710677, %v3460_v5  ;;  %v1346_v35 = vmul.f32 0.5, %v3460_v5 }
 0x110   : > { %v2597_v18 = vadd.f32 %v2596_v15, %v2595_v3  ;;  %v2680_v23 = vpop.f32.mrf.mxu0  ;;  %v1511_v3 = vadd.s32 104, %v3456_v4  ;;  %v3538_v5 = vadd.s32 %v3468_v28, %v1513_v26 }
 0x111   : > { %v2598_v24 = vpop.f32.mrf.mxu1  ;;  %v3466_v27 = vadd.f32 %v3443_v48, %v1222_v7  ;;  %2929 = verf.f32 %v1378_v21  ;;  %v3512_v7 = vadd.s32 %v3468_v28, %v1510_v54 }
 0x112   : > { %v1230_v10 = vadd.f32 %v2679_v2, %v2597_v18  ;;  %v807_v30 = vpop.f32.mrf.mxu0  ;;  %v1347_v2 = vmul.f32 0.5, %v3446_v53  ;;  %v1348_v53 = vmul.f32 0.5, %v3454_v0  ;;  %v3527_v0 = vadd.s32 %v3468_v28, %v1511_v3 }
 0x113   : > { %v2599_v31 = vpop.f32.mrf.mxu1  ;;  %v1381_v13 = vmul.f32 0.70710677, %v3466_v27  ;;  %v1225_v33 = vadd.f32 %v2594_v8, %v807_v30  ;;  %v1345_v8 = vmul.f32 0.5, %v3450_v58  ;;  %vm1576_vm5 = vcmp.lt.s32.totalorder %v3512_v7, 399 }
 0x114   : > { %v3474_v32 = vadd.f32 %v3443_v48, %v1230_v10  ;;  %v2600_v37 = vadd.f32 %v2599_v31, %v2598_v24  ;;  %v3477_v14 = vpop.f32.mrf.mxu0  ;;  %v3522_v10 = vadd.s32 %v3468_v28, %v1512_v61  ;;  %vm1577_vm7 = vcmp.lt.s32.totalorder %v3527_v0, 399 }
 0x115   : > { %v2601_v39 = vpop.f32.mrf.mxu1  ;;  %2931 = verf.f32 %v1381_v13  ;;  %v3484_v43 = vadd.f32 %v3443_v48, %v1225_v33  ;;  %vm1579_vm8 = vcmp.lt.s32.totalorder %v3538_v5, 399  ;;  %v1519_v5 = vadd.s32 168, %v3456_v4 }
 0x116   : > { %v1383_v17 = vmul.f32 0.70710677, %v3474_v32  ;;  %v1233_v47 = vadd.f32 %v2680_v23, %v2600_v37  ;;  %v820_v20 = vpop.f32.mrf.mxu0  ;;  %vm1578_vm6 = vcmp.lt.s32.totalorder %v3522_v10, 399 }
 0x117   : > { %v2602_v22 = vpop.f32.mrf.mxu1  ;;  %v1382_v49 = vmul.f32 0.70710677, %v3484_v43  ;;  %v1350_v26 = vmul.f32 0.5, %v3484_v43 }
 0x118   : > { %2933 = verf.f32 %v1383_v17  ;;  %v2603_v50 = vadd.f32 %v2602_v22, %v2601_v39  ;;  %v2924_v51 = vpop.eup %2923  ;;  %v3496_v55 = vadd.f32 %v3443_v48, %v1233_v47  ;;  %v3498_v25 = vpop.f32.mrf.mxu0 }
 0x119   : > { %v2604_v56 = vpop.f32.mrf.mxu1  ;;  %v1443_v57 = vadd.f32 1.0, %v2924_v51  ;;  %2935 = verf.f32 %v1382_v49 }
 0x11a   : > { %v1238_v59 = vadd.f32 %v2603_v50, %v820_v20  ;;  %v2926_v60 = vpop.eup %2925  ;;  %v1384_v62 = vmul.f32 0.70710677, %v3496_v55  ;;  %v823_v63 = vpop.f32.mrf.mxu0 }
 0x11b   : > { %v2605_v1 = vpop.f32.mrf.mxu1  ;;  %v1441_v15 = vadd.f32 1.0, %v2926_v60  ;;  %v1475_v23 = vmul.f32 %v1443_v57, %v1347_v2 }
 0x11c   : > { %v3508_v6 = vadd.f32 %v3443_v48, %v1238_v59  ;;  %v2606_v9 = vadd.f32 %v2605_v1, %v2604_v56  ;;  %v2928_v12 = vpop.eup %2927  ;;  %2937 = verf.f32 %v1384_v62  ;;  %v3514_v18 = vpop.f32.mrf.mxu0 }
 0x11d   : > { %v2607_v21 = vpop.f32.mrf.mxu1  ;;  %v1444_v24 = vadd.f32 1.0, %v2928_v12  ;;  %v1473_v39 = vmul.f32 %v1441_v15, %v1345_v8  ;;  %v1670_v22 = vsel %vm1574_vm1, %v1475_v23, 0.0  ;;  %v1514_v15 = vadd.s32 128, %v3456_v4 }
 0x11e   : > { %v1385_v29 = vmul.f32 0.70710677, %v3508_v6  ;;  %v1241_v11 = vadd.f32 %v2606_v9, %v823_v63  ;;  %v836_v30 = vpop.f32.mrf.mxu0  ;;  %v2930_v13 = vpop.eup %2929  ;;  %v1349_v9 = vmul.f32 0.5, %v3466_v27  ;;  %v1353_v10 = vmul.f32 0.5, %v3508_v6 }
 0x11f   : > { %v2608_v31 = vpop.f32.mrf.mxu1  ;;  %v1476_v33 = vmul.f32 %v1444_v24, %v1348_v53  ;;  %v1442_v58 = vadd.f32 1.0, %v2930_v13  ;;  %v1668_v63 = vsel %vm1572_vm2, %v1473_v39, 0.0  ;;  %v1517_v39 = vadd.s32 152, %v3456_v4 }
 0x120   : > { %v2609_v37 = vadd.f32 %v2608_v31, %v2607_v21  ;;  %2939 = verf.f32 %v1385_v29  ;;  %v3530_v17 = vadd.f32 %v3443_v48, %v1241_v11  ;;  %v3532_v47 = vpop.f32.mrf.mxu0  ;;  %v1351_v29 = vmul.f32 0.5, %v3474_v32 }
 0x121   : > { %v2610_v20 = vpop.f32.mrf.mxu1  ;;  %v1671_v49 = vsel %vm1575_vm3, %v1476_v33, 0.0  ;;  %v1474_v56 = vmul.f32 %v1442_v58, %v1346_v35  ;;  %v1515_v11 = vadd.s32 136, %v3456_v4 }
 0x122   : > { %v1246_v50 = vadd.f32 %v3477_v14, %v2609_v37  ;;  %v2932_v51 = vpop.eup %2931  ;;  %v2446_v54 = vpack.c.bf16 %v1671_v49, %v1670_v22  ;;  %v1386_v57 = vmul.f32 0.70710677, %v3530_v17  ;;  %v839_v59 = vpop.f32.mrf.mxu0  ;;  %v1516_v37 = vadd.s32 144, %v3456_v4 }
 0x123   : > { %v2611_v60 = vpop.f32.mrf.mxu1  ;;  %v1445_v61 = vadd.f32 1.0, %v2932_v51  ;;  %v1669_v14 = vsel %vm1573_vm4, %v1474_v56, 0.0  ;;  %v1549_v7 = vadd.s32 %v3468_v28, %v1515_v11  ;;  %v1354_v6 = vmul.f32 0.5, %v3530_v17 }
 0x124   : > { %v3544_v41 = vadd.f32 %v3443_v48, %v1246_v50  ;;  %v2612_v46 = vadd.f32 %v2611_v60, %v2610_v20  ;;  %2502 = vst [vmem:[%s3549_s6 + $0x28] sm:$0xff] %v2446_v54   ;;  %2941 = verf.f32 %v1386_v57  ;;  %v3555_v1 = vpop.f32.mrf.mxu0  ;;  %v2441_v3 = vpack.c.bf16 %v1669_v14, %v1668_v63 }
 0x125   : > { %v2934_v62 = vpop.eup %2933  ;;  %v2613_v2 = vpop.f32.mrf.mxu1  ;;  %v1477_v24 = vmul.f32 %v1445_v61, %v1349_v9  ;;  %v1352_v20 = vmul.f32 0.5, %v3496_v55  ;;  %v1548_v55 = vadd.s32 %v3468_v28, %v1514_v15  ;;  %v3592_v63 = vadd.s32 %v3468_v28, %v1516_v37 }
 0x126   : > { %v2936_v45 = vpop.eup %2935  ;;  %v1447_v12 = vadd.f32 1.0, %v2934_v62  ;;  %v1387_v52 = vmul.f32 0.70710677, %v3544_v41  ;;  %v1249_v21 = vadd.f32 %v3498_v25, %v2612_v46  ;;  %v3563_v23 = vpop.f32.mrf.mxu0  ;;  %2501 = vst [vmem:[%s3549_s6 + $0x20] sm:$0xff] %v2441_v3   ;;  %vm1581_vm10 = vcmp.lt.s32.totalorder %v1549_v7, 399 }
 0x127   : > { %v2614_v53 = vpop.f32.mrf.mxu1  ;;  %v1446_v27 = vadd.f32 1.0, %v2936_v45  ;;  %v1672_v51 = vsel %vm1576_vm5, %v1477_v24, 0.0  ;;  %v3601_v45 = vadd.s32 %v3468_v28, %v1517_v39  ;;  %v1520_v24 = vadd.s32 176, %v3456_v4 }
 0x128   : > { %v2615_v8 = vadd.f32 %v2614_v53, %v2613_v2  ;;  %2943 = verf.f32 %v1387_v52  ;;  %v3570_v31 = vadd.f32 %v3443_v48, %v1249_v21  ;;  %v3572_v13 = vpop.f32.mrf.mxu0  ;;  %v1479_v58 = vmul.f32 %v1447_v12, %v1351_v29 }
 0x129   : > { %v2616_v25 = vpop.f32.mrf.mxu1  ;;  %v2938_v33 = vpop.eup %2937  ;;  %v1478_v35 = vmul.f32 %v1446_v27, %v1350_v26  ;;  %v1518_v53 = vadd.s32 160, %v3456_v4  ;;  %vm1580_vm9 = vcmp.lt.s32.totalorder %v1548_v55, 399  ;;  %v1521_v39 = vadd.s32 184, %v3456_v4 }
 0x12a   : > { %v1254_v43 = vadd.f32 %v2615_v8, %v836_v30  ;;  %v1448_v32 = vadd.f32 1.0, %v2938_v33  ;;  %v1388_v22 = vmul.f32 0.70710677, %v3570_v31  ;;  %v3578_v49 = vpop.f32.mrf.mxu0  ;;  %v1674_v2 = vsel %vm1578_vm6, %v1479_v58, 0.0 }
 0x12b   : > { %v2617_v50 = vpop.f32.mrf.mxu1  ;;  %v1673_v54 = vsel %vm1577_vm7, %v1478_v35, 0.0  ;;  %vm1582_vm11 = vcmp.lt.s32.totalorder %v3592_v63, 399  ;;  %vm1583_vm12 = vcmp.lt.s32.totalorder %v3601_v45, 399  ;;  %v3630_v17 = vadd.s32 %v3468_v28, %v1519_v5 }
 0x12c   : > { %v3585_v56 = vadd.f32 %v3443_v48, %v1254_v43  ;;  %v2618_v30 = vadd.f32 %v2617_v50, %v2616_v25  ;;  %v2451_v57 = vpack.c.bf16 %v1673_v54, %v1672_v51  ;;  %v1480_v60 = vmul.f32 %v1448_v32, %v1352_v20  ;;  %v3588_v61 = vpop.f32.mrf.mxu0 }
 0x12d   : > { %2945 = verf.f32 %v1388_v22  ;;  %v2619_v46 = vpop.f32.mrf.mxu1  ;;  %v2940_v62 = vpop.eup %2939  ;;  %v3633_v32 = vadd.s32 %v3468_v28, %v1520_v24  ;;  %v3650_v55 = vadd.s32 %v3468_v28, %v3456_v4  ;;  %vm1585_vm14 = vcmp.lt.s32.totalorder %v3630_v17, 399 }
 0x12e   : > { %v1389_v0 = vmul.f32 0.70710677, %v3585_v56  ;;  %v1257_v14 = vadd.f32 %v2618_v30, %v839_v59  ;;  %2503 = vst [vmem:[%s3549_s6 + $0x30] sm:$0xff] %v2451_v57   ;;  %v1675_v3 = vsel %vm1579_vm8, %v1480_v60, 0.0  ;;  %v1449_v9 = vadd.f32 1.0, %v2940_v62  ;;  %v3603_v12 = vpop.f32.mrf.mxu0 }
 0x12f   : > { %v2620_v15 = vpop.f32.mrf.mxu1  ;;  %v2456_v52 = vpack.c.bf16 %v1675_v3, %v1674_v2  ;;  %v1522_v57 = vadd.s32 192, %v3456_v4  ;;  %v1499_v60 = vadd.s32 8, %v3456_v4  ;;  %vm1586_vm15 = vcmp.lt.s32.totalorder %v3633_v32, 399 }
 0x130   : > { %2947 = verf.f32 %v1389_v0  ;;  %v3606_v21 = vadd.f32 %v3443_v48, %v1257_v14  ;;  %v2621_v59 = vadd.f32 %v2620_v15, %v2619_v46  ;;  %v3612_v26 = vpop.f32.mrf.mxu0  ;;  %v1481_v25 = vmul.f32 %v1449_v9, %v1353_v10 }
 0x131   : > { %v2622_v27 = vpop.f32.mrf.mxu1  ;;  %v2942_v8 = vpop.eup %2941  ;;  %2504 = vst [vmem:[%s3549_s6 + $0x38] sm:$0xff] %v2456_v52   ;;  %v3642_v14 = vadd.s32 %v3468_v28, %v1521_v39  ;;  %v1355_v52 = vmul.f32 0.5, %v3544_v41  ;;  %v3661_v41 = vadd.s32 %v3468_v28, %v1499_v60  ;;  %vm1564_vm1 = vcmp.lt.s32.totalorder %v3650_v55, 399 }
 0x132   : > { %v1390_v29 = vmul.f32 0.70710677, %v3606_v21  ;;  %v1262_v11 = vadd.f32 %v3514_v18, %v2621_v59  ;;  %v1450_v33 = vadd.f32 1.0, %v2942_v8  ;;  %v3618_v35 = vpop.f32.mrf.mxu0  ;;  %v3627_v18 = vadd.s32 %v3468_v28, %v1518_v53 }
 0x133   : > { %v2623_v37 = vpop.f32.mrf.mxu1  ;;  %v1676_v46 = vsel %vm1580_vm9, %v1481_v25, 0.0  ;;  %v1523_v53 = vadd.s32 200, %v3456_v4  ;;  %v3658_v8 = vadd.s32 %v3468_v28, %v1522_v57  ;;  %vm1587_vm0 = vcmp.lt.s32.totalorder %v3642_v14, 399 }
 0x134   : > { %2949 = verf.f32 %v1390_v29  ;;  %v3624_v43 = vadd.f32 %v3443_v48, %v1262_v11  ;;  %v2624_v58 = vadd.f32 %v2623_v37, %v2622_v27  ;;  %v1482_v20 = vmul.f32 %v1450_v33, %v1354_v6  ;;  %v2553_v22 = vpop.f32.mrf.mxu0 }
 0x135   : > { %v2625_v50 = vpop.f32.mrf.mxu1  ;;  %v2944_v51 = vpop.eup %2943  ;;  %vm1584_vm13 = vcmp.lt.s32.totalorder %v3627_v18, 399  ;;  %v1356_v11 = vmul.f32 0.5, %v3570_v31  ;;  %v3673_v31 = vadd.s32 %v3468_v28, %v1523_v53  ;;  %vm1588_vm2 = vcmp.lt.s32.totalorder %v3658_v8, 399 }
 0x136   : > { %v1391_v54 = vmul.f32 0.70710677, %v3624_v43  ;;  %v1265_v30 = vadd.f32 %v3532_v47, %v2624_v58  ;;  %v1677_v62 = vsel %vm1581_vm10, %v1482_v20, 0.0  ;;  %v1451_v0 = vadd.f32 1.0, %v2944_v51  ;;  %v2554_v2 = vpop.f32.mrf.mxu0 }
 0x137   : > { %v2626_v3 = vpop.f32.mrf.mxu1  ;;  %v2461_v9 = vpack.c.bf16 %v1677_v62, %v1676_v46  ;;  %v2555_v47 = vadd.f32 %v2554_v2, %v2553_v22  ;;  %vm1565_vm3 = vcmp.lt.s32.totalorder %v3661_v41, 399  ;;  %vm1589_vm4 = vcmp.lt.s32.totalorder %v3673_v31, 399 }
 0x138   : > { %2951 = verf.f32 %v1391_v54  ;;  %v3645_v15 = vadd.f32 %v3443_v48, %v1265_v30  ;;  %v2627_v7 = vadd.f32 %v2626_v3, %v2625_v50  ;;  %v2556_v59 = vpop.f32.mrf.mxu0  ;;  %v1483_v29 = vmul.f32 %v1451_v0, %v1355_v52 }
 0x139   : > { %v2628_v10 = vpop.f32.mrf.mxu1  ;;  %2505 = vst [vmem:[%s3549_s6 + $0x40] sm:$0xff] %v2461_v9   ;;  %v1174_v27 = vadd.f32 %v2555_v47, %v3426_v36  ;;  %v1357_v30 = vmul.f32 0.5, %v3585_v56 }
 0x13a   : > { %v2946_v5 = vpop.eup %2945  ;;  %v1392_v24 = vmul.f32 0.70710677, %v3645_v15  ;;  %v1270_v6 = vadd.f32 %v2627_v7, %v3563_v23  ;;  %v2557_v33 = vpop.f32.mrf.mxu0  ;;  %v1500_v23 = vadd.s32 16, %v3456_v4  ;;  %v1678_v62 = vsel %vm1582_vm11, %v1483_v29, 0.0 }
 0x13b   : > { %v1452_v25 = vadd.f32 1.0, %v2946_v5  ;;  %v2629_v37 = vpop.f32.mrf.mxu1  ;;  %v3667_v39 = vadd.f32 %v3443_v48, %v1174_v27  ;;  %v2558_v36 = vadd.f32 %v2557_v33, %v2556_v59  ;;  %v1524_v27 = vadd.s32 208, %v3456_v4 }
 0x13c   : > { %2953 = verf.f32 %v1392_v24  ;;  %v2630_v58 = vadd.f32 %v2629_v37, %v2628_v10  ;;  %v3670_v50 = vadd.f32 %v3443_v48, %v1270_v6  ;;  %v2559_v51 = vpop.f32.mrf.mxu0 }
 0x13d   : > { %v2948_v20 = vpop.eup %2947  ;;  %v1484_v22 = vmul.f32 %v1452_v25, %v1356_v11  ;;  %v2631_v54 = vpop.f32.mrf.mxu1  ;;  %v1369_v60 = vmul.f32 0.70710677, %v3667_v39  ;;  %v1177_v46 = vadd.f32 %v2558_v36, %v3430_v16  ;;  %v3700_v25 = vadd.s32 %v3468_v28, %v1500_v23 }
 0x13e   : > { %v1453_v57 = vadd.f32 1.0, %v2948_v20  ;;  %v1393_v2 = vmul.f32 0.70710677, %v3670_v50  ;;  %v1273_v3 = vadd.f32 %v2630_v58, %v3578_v49  ;;  %v2560_v9 = vpop.f32.mrf.mxu0  ;;  %v1358_v49 = vmul.f32 0.5, %v3606_v21 }
 0x13f   : > { %v1679_v0 = vsel %vm1583_vm12, %v1484_v22, 0.0  ;;  %v2632_v47 = vpop.f32.mrf.mxu1  ;;  %2955 = verf.f32 %v1369_v60  ;;  %v3686_v7 = vadd.f32 %v3443_v48, %v1177_v46  ;;  %v2561_v45 = vadd.f32 %v2560_v9, %v2559_v51 }
 0x140   : > { %v2466_v52 = vpack.c.bf16 %v1679_v0, %v1678_v62  ;;  %v1485_v56 = vmul.f32 %v1453_v57, %v1357_v30  ;;  %2957 = verf.f32 %v1393_v2  ;;  %v3689_v63 = vadd.f32 %v3443_v48, %v1273_v3  ;;  %v2562_v10 = vpop.f32.mrf.mxu0 }
 0x141   : > { %v2950_v16 = vpop.eup %2949  ;;  %v2633_v59 = vadd.f32 %v2632_v47, %v2631_v54  ;;  %v2634_v53 = vpop.f32.mrf.mxu1  ;;  %v1370_v24 = vmul.f32 0.70710677, %v3686_v7  ;;  %v1182_v11 = vadd.f32 %v3424_v34, %v2561_v45  ;;  %v1359_v46 = vmul.f32 0.5, %v3624_v43 }
 0x142   : > { %2506 = vst [vmem:[%s3549_s6 + $0x48] sm:$0xff] %v2466_v52   ;;  %v1454_v5 = vadd.f32 1.0, %v2950_v16  ;;  %v1394_v29 = vmul.f32 0.70710677, %v3689_v63  ;;  %v2563_v33 = vpop.f32.mrf.mxu0  ;;  %v1680_v22 = vsel %vm1584_vm13, %v1485_v56, 0.0  ;;  %v1501_v0 = vadd.s32 24, %v3456_v4 }
 0x143   : > { %v1278_v6 = vadd.f32 %v3555_v1, %v2633_v59  ;;  %v2635_v21 = vpop.f32.mrf.mxu1  ;;  %2959 = verf.f32 %v1370_v24  ;;  %v2564_v36 = vadd.f32 %v2563_v33, %v2562_v10  ;;  %v3706_v51 = vadd.f32 %v3443_v48, %v1182_v11 }
 0x144   : > { %v1486_v37 = vmul.f32 %v1454_v5, %v1358_v49  ;;  %v2636_v58 = vadd.f32 %v2635_v21, %v2634_v53  ;;  %2961 = verf.f32 %v1394_v29  ;;  %v2565_v54 = vpop.f32.mrf.mxu0  ;;  %v3720_v17 = vadd.s32 %v3468_v28, %v1524_v27 }
 0x145   : > { %v2952_v20 = vpop.eup %2951  ;;  %v3709_v34 = vadd.f32 %v3443_v48, %v1278_v6  ;;  %v2637_v23 = vpop.f32.mrf.mxu1  ;;  %v1185_v57 = vadd.f32 %v3428_v38, %v2564_v36  ;;  %v1371_v62 = vmul.f32 0.70710677, %v3706_v51  ;;  %v1360_v59 = vmul.f32 0.5, %v3645_v15 }
 0x146   : > { %v1681_v1 = vsel %vm1585_vm14, %v1486_v37, 0.0  ;;  %v1455_v30 = vadd.f32 1.0, %v2952_v20  ;;  %v1281_v60 = vadd.f32 %v3572_v13, %v2636_v58  ;;  %v2566_v2 = vpop.f32.mrf.mxu0  ;;  %v1525_v53 = vadd.s32 216, %v3456_v4 }
 0x147   : > { %v2471_v18 = vpack.c.bf16 %v1681_v1, %v1680_v22  ;;  %v2638_v3 = vpop.f32.mrf.mxu1  ;;  %v1395_v9 = vmul.f32 0.70710677, %v3709_v34  ;;  %v3723_v47 = vadd.f32 %v3443_v48, %v1185_v57  ;;  %2963 = verf.f32 %v1371_v62 }
 0x148   : > { %v3726_v38 = vadd.f32 %v3443_v48, %v1281_v60  ;;  %v1487_v43 = vmul.f32 %v1455_v30, %v1359_v46  ;;  %v2567_v52 = vadd.f32 %v2566_v2, %v2565_v54  ;;  %v2639_v56 = vadd.f32 %v2638_v3, %v2637_v23  ;;  %v2568_v16 = vpop.f32.mrf.mxu0 }
 0x149   : > { %v2954_v13 = vpop.eup %2953  ;;  %2507 = vst [vmem:[%s3549_s6 + $0x50] sm:$0xff] %v2471_v18   ;;  %v2640_v45 = vpop.f32.mrf.mxu1  ;;  %2965 = verf.f32 %v1395_v9  ;;  %v1372_v49 = vmul.f32 0.70710677, %v3723_v47  ;;  %v3736_v5 = vadd.s32 %v3468_v28, %v1501_v0  ;;  %v1337_v6 = vmul.f32 0.5, %v3667_v39 }
 0x14a   : > { %v1456_v10 = vadd.f32 1.0, %v2954_v13  ;;  %v1396_v24 = vmul.f32 0.70710677, %v3726_v38  ;;  %v1190_v27 = vadd.f32 %v2567_v52, %v3434_v42  ;;  %v2569_v29 = vpop.f32.mrf.mxu0  ;;  %v1286_v33 = vadd.f32 %v2639_v56, %v3603_v12 }
 0x14b   : > { %v2641_v11 = vpop.f32.mrf.mxu1  ;;  %v2570_v21 = vadd.f32 %v2569_v29, %v2568_v16  ;;  %v1682_v36 = vsel %vm1586_vm15, %v1487_v43, 0.0  ;;  %2967 = verf.f32 %v1372_v49  ;;  %v1361_v32 = vmul.f32 0.5, %v3670_v50 }
 0x14c   : > { %v1488_v15 = vmul.f32 %v1456_v10, %v1360_v59  ;;  %v2956_v37 = vpop.eup %2955  ;;  %v3746_v58 = vadd.f32 %v3443_v48, %v1190_v27  ;;  %v2642_v20 = vadd.f32 %v2641_v11, %v2640_v45  ;;  %v2571_v42 = vpop.f32.mrf.mxu0  ;;  %2969 = verf.f32 %v1396_v24 }
 0x14d   : > { %v2643_v22 = vpop.f32.mrf.mxu1  ;;  %v2958_v54 = vpop.eup %2957  ;;  %v1433_v23 = vadd.f32 1.0, %v2956_v37  ;;  %v3751_v12 = vadd.f32 %v3443_v48, %v1286_v33  ;;  %v3756_v62 = vadd.s32 %v3468_v28, %v1525_v53  ;;  %v1193_v0 = vadd.f32 %v2570_v21, %v3438_v44 }
 0x14e   : > { %v1683_v39 = vsel %vm1587_vm0, %v1488_v15, 0.0  ;;  %v1457_v30 = vadd.f32 1.0, %v2958_v54  ;;  %v1373_v57 = vmul.f32 0.70710677, %v3746_v58  ;;  %v2572_v60 = vpop.f32.mrf.mxu0  ;;  %v1289_v9 = vadd.f32 %v2642_v20, %v3618_v35 }
 0x14f   : > { %v2476_v1 = vpack.c.bf16 %v1683_v39, %v1682_v36  ;;  %v2644_v18 = vpop.f32.mrf.mxu1  ;;  %v1465_v46 = vmul.f32 %v1433_v23, %v1337_v6  ;;  %v1397_v14 = vmul.f32 0.70710677, %v3751_v12  ;;  %v2573_v50 = vadd.f32 %v2572_v60, %v2571_v42 }
 0x150   : > { %v2960_v2 = vpop.eup %2959  ;;  %v1489_v3 = vmul.f32 %v1457_v30, %v1361_v32  ;;  %2971 = verf.f32 %v1373_v57  ;;  %v2574_v13 = vpop.f32.mrf.mxu0  ;;  %v1338_v52 = vmul.f32 0.5, %v3686_v7  ;;  %v3764_v16 = vadd.f32 %v3443_v48, %v1193_v0 }
 0x151   : > { %2508 = vst [vmem:[%s3549_s6 + $0x58] sm:$0xff] %v2476_v1   ;;  %v2962_v43 = vpop.eup %2961  ;;  %v1434_v56 = vadd.f32 1.0, %v2960_v2  ;;  %2973 = verf.f32 %v1397_v14  ;;  %v2646_v45 = vpop.f32.mrf.mxu1  ;;  %v1362_v59 = vmul.f32 0.5, %v3689_v63  ;;  %v3768_v10 = vadd.f32 %v3443_v48, %v1289_v9 }
 0x152   : > { %v1458_v44 = vadd.f32 1.0, %v2962_v43  ;;  %v1198_v53 = vadd.f32 %v3432_v40, %v2573_v50  ;;  %v2575_v35 = vpop.f32.mrf.mxu0  ;;  %v1660_v49 = vsel %vm1564_vm1, %v1465_v46, 0.0  ;;  %vm1566_vm5 = vcmp.lt.s32.totalorder %v3700_v25, 399 }
 0x153   : > { %v1466_v24 = vmul.f32 %v1434_v56, %v1338_v52  ;;  %vm1590_vm6 = vcmp.lt.s32.totalorder %v3720_v17, 399  ;;  %vm1567_vm7 = vcmp.lt.s32.totalorder %v3736_v5, 399  ;;  %v1374_v7 = vmul.f32 0.70710677, %v3764_v16  ;;  %v2647_v21 = vpop.f32.mrf.mxu1 }
 0x154   : > { %v2645_v63 = vadd.f32 %v2644_v18, %v2643_v22  ;;  %v1684_v27 = vsel %vm1588_vm2, %v1489_v3, 0.0  ;;  %v1490_v29 = vmul.f32 %v1458_v44, %v1362_v59  ;;  %v1398_v40 = vmul.f32 0.70710677, %v3768_v10  ;;  %v2964_v55 = vpop.eup %2963 }
 0x155   : > { %v3781_v11 = vadd.f32 %v3443_v48, %v1198_v53  ;;  %v1661_v15 = vsel %vm1565_vm3, %v1466_v24, 0.0  ;;  %2975 = verf.f32 %v1374_v7  ;;  %v2576_v33 = vadd.f32 %v2575_v35, %v2574_v13 }
 0x156   : > { %v1294_v6 = vadd.f32 %v3588_v61, %v2645_v63  ;;  %v2966_v37 = vpop.eup %2965  ;;  %v2421_v8 = vpack.c.bf16 %v1661_v15, %v1660_v49  ;;  %v1685_v36 = vsel %vm1589_vm4, %v1490_v29, 0.0  ;;  %v1435_v20 = vadd.f32 1.0, %v2964_v55 }
 0x157   : > { %2977 = verf.f32 %v1398_v40  ;;  %v2481_v42 = vpack.c.bf16 %v1685_v36, %v1684_v27  ;;  %v1339_v22 = vmul.f32 0.5, %v3706_v51  ;;  %v1459_v54 = vadd.f32 1.0, %v2966_v37 }
 0x158   : > { %v1375_v41 = vmul.f32 0.70710677, %v3781_v11  ;;  %2422 = vst [vmem:[%s3549_s6] sm:$0xff] %v2421_v8   ;;  %v1363_v39 = vmul.f32 0.5, %v3709_v34  ;;  %v3793_v61 = vadd.f32 %v3443_v48, %v1294_v6  ;;  %v1201_v23 = vadd.f32 %v3436_v19, %v2576_v33  ;;  %v2968_v32 = vpop.eup %2967 }
 0x159   : > { %v2648_v1 = vadd.f32 %v2647_v21, %v2646_v45  ;;  %2509 = vst [vmem:[%s3549_s6 + $0x60] sm:$0xff] %v2481_v42   ;;  %v1340_v31 = vmul.f32 0.5, %v3723_v47  ;;  %vm1591_vm8 = vcmp.lt.s32.totalorder %v3756_v62, 399  ;;  %v1502_v51 = vadd.s32 32, %v3456_v4  ;;  %v2970_v30 = vpop.eup %2969 }
 0x15a   : > { %2979 = verf.f32 %v1375_v41  ;;  %v1467_v57 = vmul.f32 %v1435_v20, %v1339_v22  ;;  %v1491_v60 = vmul.f32 %v1459_v54, %v1363_v39  ;;  %v1436_v18 = vadd.f32 1.0, %v2968_v32 }
 0x15b   : > { %v1399_v34 = vmul.f32 0.70710677, %v3793_v61  ;;  %v1364_v46 = vmul.f32 0.5, %v3726_v38  ;;  %v1460_v14 = vadd.f32 1.0, %v2970_v30  ;;  %v3803_v19 = vadd.f32 %v3443_v48, %v1201_v23 }
 0x15c   : > { %v1297_v0 = vadd.f32 %v3612_v26, %v2648_v1  ;;  %v1468_v47 = vmul.f32 %v1436_v18, %v1340_v31  ;;  %v1526_v2 = vadd.s32 224, %v3456_v4  ;;  %v1503_v3 = vadd.s32 40, %v3456_v4 }
 0x15d   : > { %2981 = verf.f32 %v1399_v34  ;;  %v2972_v9 = vpop.eup %2971  ;;  %v1492_v50 = vmul.f32 %v1460_v14, %v1364_v46  ;;  %v1527_v13 = vadd.s32 232, %v3456_v4  ;;  %v1376_v43 = vmul.f32 0.70710677, %v3803_v19 }
 0x15e   : > { %v3811_v38 = vadd.f32 %v3443_v48, %v1297_v0  ;;  %v2974_v52 = vpop.eup %2973  ;;  %v1662_v26 = vsel %vm1566_vm5, %v1467_v57, 0.0  ;;  %v1686_v56 = vsel %vm1590_vm6, %v1491_v60, 0.0  ;;  %v1663_v45 = vsel %vm1567_vm7, %v1468_v47, 0.0 }
 0x15f   : > { %v1536_v59 = vadd.s32 %v3468_v28, %v1502_v51  ;;  %v2426_v44 = vpack.c.bf16 %v1663_v45, %v1662_v26  ;;  %v1687_v53 = vsel %vm1591_vm8, %v1492_v50, 0.0  ;;  %v1437_v35 = vadd.f32 1.0, %v2972_v9 }
 0x160   : > { %2983 = verf.f32 %v1376_v43  ;;  %v2486_v48 = vpack.c.bf16 %v1687_v53, %v1686_v56  ;;  %v1461_v49 = vadd.f32 1.0, %v2974_v52  ;;  %v1537_v25 = vadd.s32 %v3468_v28, %v1503_v3 }
 0x161   : > { %v1400_v24 = vmul.f32 0.70710677, %v3811_v38  ;;  %2498 = vst [vmem:[%s3549_s6 + $0x8] sm:$0xff] %v2426_v44   ;;  %v1341_v17 = vmul.f32 0.5, %v3746_v58  ;;  %v1560_v5 = vadd.s32 %v3468_v28, %v1526_v2  ;;  %v1561_v7 = vadd.s32 %v3468_v28, %v1527_v13 }
 0x162   : > { %v2976_v63 = vpop.eup %2975  ;;  %2510 = vst [vmem:[%s3549_s6 + $0x68] sm:$0xff] %v2486_v48   ;;  %v1365_v62 = vmul.f32 0.5, %v3751_v12  ;;  %vm1568_vm9 = vcmp.lt.s32.totalorder %v1536_v59, 399  ;;  %v1342_v40 = vmul.f32 0.5, %v3764_v16  ;;  %vm1569_vm10 = vcmp.lt.s32.totalorder %v1537_v25, 399 }
 0x163   : > { %2985 = verf.f32 %v1400_v24  ;;  %v1469_v29 = vmul.f32 %v1437_v35, %v1341_v17  ;;  %v1438_v55 = vadd.f32 1.0, %v2976_v63  ;;  %v1366_v6 = vmul.f32 0.5, %v3768_v10 }
 0x164   : > { %v2978_v27 = vpop.eup %2977  ;;  %v1493_v15 = vmul.f32 %v1461_v49, %v1365_v62  ;;  %vm1592_vm11 = vcmp.lt.s32.totalorder %v1560_v5, 399  ;;  %vm1593_vm12 = vcmp.lt.s32.totalorder %v1561_v7, 399  ;;  %v1504_v12 = vadd.s32 48, %v3456_v4 }
 0x165   : > { %v1462_v58 = vadd.f32 1.0, %v2978_v27  ;;  %v1470_v33 = vmul.f32 %v1438_v55, %v1342_v40  ;;  %v1505_v8 = vadd.s32 56, %v3456_v4  ;;  %v1664_v36 = vsel %vm1568_vm9, %v1469_v29, 0.0 }
 0x166   : > { %v1688_v16 = vsel %vm1592_vm11, %v1493_v15, 0.0  ;;  %v1528_v54 = vadd.s32 240, %v3456_v4  ;;  %v1529_v23 = vadd.s32 248, %v3456_v4  ;;  %v1538_v1 = vadd.s32 %v3468_v28, %v1504_v12 }
 0x167   : > { %v2980_v21 = vpop.eup %2979  ;;  %v1494_v37 = vmul.f32 %v1462_v58, %v1366_v6  ;;  %v1665_v20 = vsel %vm1569_vm10, %v1470_v33, 0.0  ;;  %v1539_v32 = vadd.s32 %v3468_v28, %v1505_v8  ;;  %v1343_v31 = vmul.f32 0.5, %v3781_v11 }
 0x168   : > { %v2431_v42 = vpack.c.bf16 %v1665_v20, %v1664_v36  ;;  %v1439_v39 = vadd.f32 1.0, %v2980_v21  ;;  %v1562_v57 = vadd.s32 %v3468_v28, %v1528_v54  ;;  %v1344_v18 = vmul.f32 0.5, %v3803_v19 }
 0x169   : > { %v1689_v22 = vsel %vm1593_vm12, %v1494_v37, 0.0  ;;  %v1563_v46 = vadd.s32 %v3468_v28, %v1529_v23  ;;  %vm1570_vm13 = vcmp.lt.s32.totalorder %v1538_v1, 399  ;;  %v1367_v4 = vmul.f32 0.5, %v3793_v61 }
 0x16a   : > { %v2982_v10 = vpop.eup %2981  ;;  %v2491_v41 = vpack.c.bf16 %v1689_v22, %v1688_v16  ;;  %2499 = vst [vmem:[%s3549_s6 + $0x10] sm:$0xff] %v2431_v42   ;;  %v1471_v60 = vmul.f32 %v1439_v39, %v1343_v31  ;;  %vm1571_vm14 = vcmp.lt.s32.totalorder %v1539_v32, 399  ;;  %v1368_v11 = vmul.f32 0.5, %v3811_v38 }
 0x16b   : > { %v1463_v30 = vadd.f32 1.0, %v2982_v10  ;;  %vm1594_vm15 = vcmp.lt.s32.totalorder %v1562_v57, 399  ;;  %vm1595_vm0 = vcmp.lt.s32.totalorder %v1563_v46, 399 }
 0x16c   : > { %2511 = vst [vmem:[%s3549_s6 + $0x70] sm:$0xff] %v2491_v41   ;;  %v1666_v3 = vsel %vm1570_vm13, %v1471_v60, 0.0 }
 0x16d   : > { %v2984_v51 = vpop.eup %2983  ;;  %v1495_v47 = vmul.f32 %v1463_v30, %v1367_v4 }
 0x16e   : > { %v1440_v34 = vadd.f32 1.0, %v2984_v51 }
 0x16f   : > { %v1690_v13 = vsel %vm1594_vm15, %v1495_v47, 0.0 }
 0x170   : > { %v2986_v14 = vpop.eup %2985  ;;  %v1472_v0 = vmul.f32 %v1440_v34, %v1344_v18 }
 0x171   : > { %v1464_v2 = vadd.f32 1.0, %v2986_v14 }
 0x172   : > { %v1667_v9 = vsel %vm1571_vm14, %v1472_v0, 0.0 }
 0x173   : > { %v2436_v19 = vpack.c.bf16 %v1667_v9, %v1666_v3  ;;  %v1496_v50 = vmul.f32 %v1464_v2, %v1368_v11 }
 0x174   : > { %1858 = sbr.rel (!%p3178_p5) target bundleno = 437 (0x1b5), region = 40 }
 0x175   : > { %2500 = vst [vmem:[%s3549_s6 + $0x18] sm:$0xff] %v2436_v19   ;;  %v1691_v28 = vsel %vm1595_vm0, %v1496_v50, 0.0 }
 0x176   : > { %v2496_v43 = vpack.c.bf16 %v1691_v28, %v1690_v13 }
 0x178   : > { %2512 = vst [vmem:[%s3549_s6 + $0x78] sm:$0xff] %v2496_v43  }
 0x179   : > { %s4024_s29 = smov (!%p1861_p13, %s1860_s29), 32 }
 0x17a   : > { %s2363_s12 = sshll.u32 %s4024_s29, 6 }
 0x17b   : > { %p2366_p0 = scmp.eq.s32.totalorder %s2363_s12, 0 }
 0x17c   : > { %s3862_s26 = sshrl.u32 (!%p2366_p0), %s4024_s29, 5 }
 0x17d   : > { %1871 = sbr.rel (%p2366_p0) target bundleno = 437 (0x1b5), region = 44  ;;  %p2367_p1 = scmp.le.s32.totalorder (!%p2366_p0), %s3862_s26, 0 }
 0x182   : > { %2177 = sbr.rel (%p2367_p1) target bundleno = 420 (0x1a4), region = 119  ;;  %s4002_s18 = smov (!%p2367_p1), %s3859_s24 }
 0x183   : > { %s4003_s8 = smov (!%p2367_p1), %s3549_s6  ;;  %s3871_s27 = smov (!%p2367_p1), 0  }
 0x184   : > { %s3873_s10 = smov (!%p2367_p1), 0  }
 0x187 LB: >> { %v1888_v61 = vld [vmem:[%s3081_s8] sm:$0xf]  ;;  %v1890_v38 = vld [vmem:[%s3081_s8 + $0x4] sm:$0xf]  ;;  %v1892_v52 = vld [vmem:[%s3081_s8 + $0x8] sm:$0xf]  ;;  %s3089_s10 = sphi %s3873_s10, %s1882_s10   ;;  %s3085_s27 = sphi %s3871_s27, %s4004_s27   ;;  %s3081_s8 = sphi %s4003_s8, %s1957_s8   ;;  %s3077_s18 = sphi %s4002_s18, %s1958_s18  }
 0x188   : >> { %1889 = vst [vmem:[%s3077_s18] sm:$0xf] %v1888_v61  ;;  %1891 = vst [vmem:[%s3077_s18 + $0x4] sm:$0xf] %v1890_v38  ;;  %v1894_v26 = vld [vmem:[%s3081_s8 + $0xc] sm:$0xf]  ;;  %s1952_s5 = sadd.s32 1, %s3085_s27 }
 0x189   : >> { %1893 = vst [vmem:[%s3077_s18 + $0x8] sm:$0xf] %v1892_v52  ;;  %v1896_v56 = vld [vmem:[%s3081_s8 + $0x10] sm:$0xf]  ;;  %v1898_v45 = vld [vmem:[%s3081_s8 + $0x14] sm:$0xf]  ;;  %p1953_p2 = scmp.ge.s32.totalorder %s1952_s5, %s3862_s26 }
 0x18a   : >> { %1895 = vst [vmem:[%s3077_s18 + $0xc] sm:$0xf] %v1894_v26  ;;  %1897 = vst [vmem:[%s3077_s18 + $0x10] sm:$0xf] %v1896_v56  ;;  %v1900_v59 = vld [vmem:[%s3081_s8 + $0x18] sm:$0xf] }
 0x18b   : >> { %1899 = vst [vmem:[%s3077_s18 + $0x14] sm:$0xf] %v1898_v45  ;;  %v1902_v44 = vld [vmem:[%s3081_s8 + $0x1c] sm:$0xf]  ;;  %v1904_v53 = vld [vmem:[%s3081_s8 + $0x20] sm:$0xf] }
 0x18c   : >> { %1901 = vst [vmem:[%s3077_s18 + $0x18] sm:$0xf] %v1900_v59  ;;  %1903 = vst [vmem:[%s3077_s18 + $0x1c] sm:$0xf] %v1902_v44  ;;  %v1906_v35 = vld [vmem:[%s3081_s8 + $0x24] sm:$0xf] }
 0x18d   : >> { %1905 = vst [vmem:[%s3077_s18 + $0x20] sm:$0xf] %v1904_v53  ;;  %v1908_v48 = vld [vmem:[%s3081_s8 + $0x28] sm:$0xf]  ;;  %v1910_v49 = vld [vmem:[%s3081_s8 + $0x2c] sm:$0xf] }
 0x18e   : >> { %1907 = vst [vmem:[%s3077_s18 + $0x24] sm:$0xf] %v1906_v35  ;;  %1909 = vst [vmem:[%s3077_s18 + $0x28] sm:$0xf] %v1908_v48  ;;  %v1912_v25 = vld [vmem:[%s3081_s8 + $0x30] sm:$0xf] }
 0x18f   : >> { %1911 = vst [vmem:[%s3077_s18 + $0x2c] sm:$0xf] %v1910_v49  ;;  %v1914_v24 = vld [vmem:[%s3081_s8 + $0x34] sm:$0xf]  ;;  %v1916_v17 = vld [vmem:[%s3081_s8 + $0x38] sm:$0xf] }
 0x190   : >> { %1913 = vst [vmem:[%s3077_s18 + $0x30] sm:$0xf] %v1912_v25  ;;  %1915 = vst [vmem:[%s3077_s18 + $0x34] sm:$0xf] %v1914_v24  ;;  %v1918_v5 = vld [vmem:[%s3081_s8 + $0x3c] sm:$0xf] }
 0x191   : >> { %1917 = vst [vmem:[%s3077_s18 + $0x38] sm:$0xf] %v1916_v17  ;;  %v1920_v7 = vld [vmem:[%s3081_s8 + $0x40] sm:$0xf]  ;;  %v1922_v63 = vld [vmem:[%s3081_s8 + $0x44] sm:$0xf] }
 0x192   : >> { %1919 = vst [vmem:[%s3077_s18 + $0x3c] sm:$0xf] %v1918_v5  ;;  %1921 = vst [vmem:[%s3077_s18 + $0x40] sm:$0xf] %v1920_v7  ;;  %v1924_v62 = vld [vmem:[%s3081_s8 + $0x48] sm:$0xf] }
 0x193   : >> { %1923 = vst [vmem:[%s3077_s18 + $0x44] sm:$0xf] %v1922_v63  ;;  %v1926_v27 = vld [vmem:[%s3081_s8 + $0x4c] sm:$0xf]  ;;  %v1928_v29 = vld [vmem:[%s3081_s8 + $0x50] sm:$0xf] }
 0x194   : >> { %1925 = vst [vmem:[%s3077_s18 + $0x48] sm:$0xf] %v1924_v62  ;;  %1927 = vst [vmem:[%s3077_s18 + $0x4c] sm:$0xf] %v1926_v27  ;;  %v1930_v40 = vld [vmem:[%s3081_s8 + $0x54] sm:$0xf] }
 0x195   : >> { %1929 = vst [vmem:[%s3077_s18 + $0x50] sm:$0xf] %v1928_v29  ;;  %v1932_v55 = vld [vmem:[%s3081_s8 + $0x58] sm:$0xf]  ;;  %v1934_v15 = vld [vmem:[%s3081_s8 + $0x5c] sm:$0xf] }
 0x196   : >> { %1931 = vst [vmem:[%s3077_s18 + $0x54] sm:$0xf] %v1930_v40  ;;  %1933 = vst [vmem:[%s3077_s18 + $0x58] sm:$0xf] %v1932_v55  ;;  %v1936_v6 = vld [vmem:[%s3081_s8 + $0x60] sm:$0xf] }
 0x197   : >> { %1935 = vst [vmem:[%s3077_s18 + $0x5c] sm:$0xf] %v1934_v15  ;;  %v1938_v58 = vld [vmem:[%s3081_s8 + $0x64] sm:$0xf]  ;;  %v1940_v33 = vld [vmem:[%s3081_s8 + $0x68] sm:$0xf] }
 0x198   : >> { %1937 = vst [vmem:[%s3077_s18 + $0x60] sm:$0xf] %v1936_v6  ;;  %1939 = vst [vmem:[%s3077_s18 + $0x64] sm:$0xf] %v1938_v58  ;;  %v1942_v21 = vld [vmem:[%s3081_s8 + $0x6c] sm:$0xf] }
 0x199   : >> { %1941 = vst [vmem:[%s3077_s18 + $0x68] sm:$0xf] %v1940_v33  ;;  %v1944_v37 = vld [vmem:[%s3081_s8 + $0x70] sm:$0xf]  ;;  %v1946_v12 = vld [vmem:[%s3081_s8 + $0x74] sm:$0xf] }
 0x19a   : >> { %1943 = vst [vmem:[%s3077_s18 + $0x6c] sm:$0xf] %v1942_v21  ;;  %1945 = vst [vmem:[%s3077_s18 + $0x70] sm:$0xf] %v1944_v37  ;;  %v1948_v8 = vld [vmem:[%s3081_s8 + $0x78] sm:$0xf] }
 0x19b   : >> { %1947 = vst [vmem:[%s3077_s18 + $0x74] sm:$0xf] %v1946_v12  ;;  %v1950_v36 = vld [vmem:[%s3081_s8 + $0x7c] sm:$0xf]  ;;  %1949 = vst [vmem:[%s3077_s18 + $0x78] sm:$0xf] %v1948_v8 }
 0x19c   : >> { %1951 = vst [vmem:[%s3077_s18 + $0x7c] sm:$0xf] %v1950_v36  ;;  %s4026_s5 = smov (%p1953_p2, %s1952_s5), 0  ;;  %s1882_s10 = sadd.s32 1, %s3089_s10  }
 0x19d   : >> { %s2368_s25 = sshll.u32 %s4026_s5, 7  ;;  %p1881_p3 = scmp.ge.s32.totalorder %s1882_s10, %s3862_s26 }
 0x19e   : >> { %s1957_s8 = scalar_lea.vmem %s3549_s6, %s2368_s25 [#allocation2]   ;;  %s1958_s18 = scalar_lea.vmem %s3859_s24, %s2368_s25  }
 0x19f   : >> { %s4004_s27 = smov %s4026_s5  ;;  %1884 = sbr.rel (!%p1881_p3) target bundleno = 391 (0x187), region = 125 }
 0x1a4 PF: > { %s3966_s28 = sand.u32 31, %s4024_s29   ;;  %s2416_s17 = sshll.u32 %s3862_s26, 7 }
 0x1a5   : > { %s1963_s15 = scalar_lea.vmem %s3549_s6, %s2416_s17 [#allocation2]   ;;  %s1965_s7 = scalar_lea.vmem %s3859_s24, %s2416_s17  }
 0x1a6   : > { %p2373_p4 = scmp.le.s32.totalorder %s3966_s28, 0 }
 0x1a7   : > { %s3091_s9 = smov (!%p2373_p4), %s1965_s7   ;;  %s3095_s11 = smov (!%p2373_p4), %s1963_s15  }
 0x1a8   : > { %2191 = sbr.rel (%p2373_p4) target bundleno = 437 (0x1b5), region = 130  ;;  %s3099_s12 = smov (!%p2373_p4), 0  }
 0x1a9   : > { %s3103_s13 = smov (!%p2373_p4), 0  }
 0x1ad LB: >> { %v1975_v20 = vld [vmem:[%s3097_s11] sm:$0xf]  ;;  %s1977_s29 = sadd.s32 1, %s3101_s12  ;;  %s1969_s13 = sadd.s32 1, %s3105_s13   ;;  %s3105_s13 = sphi %s3103_s13, %s1969_s13   ;;  %s3101_s12 = sphi %s3099_s12, %s3100_s12   ;;  %s3097_s11 = sphi %s3095_s11, %s1982_s11   ;;  %s3093_s9 = sphi %s3091_s9, %s1983_s9  }
 0x1ae   : >> { %1976 = vst [vmem:[%s3093_s9] sm:$0xf] %v1975_v20  ;;  %p1978_p5 = scmp.ge.s32.totalorder %s1977_s29, %s3966_s28  ;;  %p1968_p6 = scmp.ge.s32.totalorder %s1969_s13, %s3966_s28 }
 0x1b0   : >> { %s4028_s29 = smov (%p1978_p5, %s1977_s29), 0  ;;  %1971 = sbr.rel (!%p1968_p6) target bundleno = 429 (0x1ad), region = 136 }
 0x1b1   : >> { %s2374_s6 = sshll.u32 %s4028_s29, 2  ;;  %s3100_s12 = smov %s4028_s29  }
 0x1b2   : >> { %s1982_s11 = scalar_lea.vmem %s1963_s15, %s2374_s6 [#allocation2]   ;;  %s1983_s9 = scalar_lea.vmem %s1965_s7, %s2374_s6  }
 0x1b5 PF: > { %s14_s21 = sadd.s32 1, %s3073_s21   ;;  %s4005_s15 = smov %s3053_s16 }
 0x1b6   : > { %p11_p7 = scmp.ge.s32.totalorder %s14_s21, 6   ;;  %s4006_s16 = smov %s3189_s30 }
 0x1b7   : > { %s4007_s17 = smov %s3065_s19  ;;  %s4008_s18 = smov %s3069_s20 }
 0x1b8   : > { %s4009_s19 = smov %s4012_s22  ;;  %s4010_s20 = smov %s4016_s23 }
 0x1b9   :  { %13 = sbr.rel (!%p11_p7) target bundleno = 4 (0x4), region = 147 }

// kernel: hubert_feature_encoder.7
= control target key start
LH: loop header
LB: loop body
LE: loop exit
PB: predicated region body
PF: predicated region fallthrough
CT: control target
= control target key end

     0   :  { %s1642_s12 = smov 0   ;;  %s1644_s13 = smov 0   ;;  %s1901_s0 = inlined_call_operand.vmem [shape: bf16[2,200,256], index: 0, kind: input, shape index: {}]   ;;  %s1902_s1 = inlined_call_operand.vmem [shape: bf16[256,128], index: 1, kind: input, shape index: {}]   ;;  %s1903_s2 = inlined_call_operand.vmem [shape: f32[3,128], index: 2, kind: input, shape index: {}]   ;;  %s1904_s3 = inlined_call_operand.vmem [shape: f32[2,128,199], index: 3, kind: output, shape index: {}]  }
   0x1   :  { %s1646_s14 = smov 0  }
   0x2 LB: > { %s25_s15 = sadd.s32 1, %s1616_s13  ;;  %p1274_p0 = scmp.ge.s32.totalorder %s1620_s14, 1  ;;  %s1620_s14 = sphi %s1646_s14, %s13_s14   ;;  %s1616_s13 = sphi %s1644_s13, %s1906_s13   ;;  %s1612_s12 = sphi %s1642_s12, %s1905_s12  }
   0x3   : > { %p27_p1 = scmp.ge.s32.totalorder %s25_s15, 2  ;;  %p173_p2 = scmp.lt.s32.totalorder %s1620_s14, 3 }
   0x5   : > { %s1908_s15 = smov (%p27_p1, %s25_s15), 0  ;;  %p174_p3 = pnand %p1274_p0, %p173_p2 }
   0x6   : > { %p217_p4 = scmp.lt.s32.totalorder (!%p174_p3), %s1612_s12, 1 }
   0x7   : > { %177 = sbr.rel (%p174_p3) target bundleno = 452 (0x1c4), region = 32 }
   0xc   : > { %v1484_v0 = vld [vmem:[%s1902_s1 + $0x78] sm:$0xff]   ;;  %v1486_v2 = vld [vmem:[%s1902_s1 + $0x70] sm:$0xff]   ;;  %v1488_v4 = vld [vmem:[%s1902_s1 + $0x68] sm:$0xff]   ;;  %s1910_s12 = smov (!%p217_p4, %s1612_s12), 1 }
   0xd   : > { %v1485_v1 = vld [vmem:[%s1902_s1 + $0x38] sm:$0xff]   ;;  %1330 = vmatprep.subr.bf16.mxu0 %v1484_v0  ;;  %1442 = vmatprep.subr.bf16.mxu1 %v1484_v0  ;;  %v1487_v3 = vld [vmem:[%s1902_s1 + $0x30] sm:$0xff]   ;;  %v1489_v5 = vld [vmem:[%s1902_s1 + $0x28] sm:$0xff]   ;;  %s1458_s30 = smul.u32 200, %s1910_s12  ;;  %s1329_s4 = sshll.u32 %s1910_s12, 8 }
   0xe   : > { %1331 = vmatpush3.bf16.msra.mxu0 %v1485_v1  ;;  %1450 = vmatpush3.bf16.msra.mxu1 %v1485_v1  ;;  %v1490_v6 = vld [vmem:[%s1902_s1 + $0x60] sm:$0xff]   ;;  %v1492_v8 = vld [vmem:[%s1902_s1 + $0x58] sm:$0xff]   ;;  %v1494_v10 = vld [vmem:[%s1902_s1 + $0x50] sm:$0xff]   ;;  %s1858_s7 = scalar_lea.vmem %s1904_s3, %s1329_s4 }
   0xf   : > { %1332 = vmatprep.subr.bf16.mxu0 %v1486_v2  ;;  %1443 = vmatprep.subr.bf16.mxu1 %v1486_v2  ;;  %v1491_v7 = vld [vmem:[%s1902_s1 + $0x20] sm:$0xff]   ;;  %s1693_s10 = scalar_lea.vmem %s1901_s0, %s1458_s30  ;;  %v1493_v9 = vld [vmem:[%s1902_s1 + $0x18] sm:$0xff]   ;;  %v1495_v13 = vld [vmem:[%s1902_s1 + $0x10] sm:$0xff]  }
  0x10   : > { %v1502_v11 = vld [vmem:[%s1693_s10 + $0x4] ss:$8 sps:$4 sm:$0xff]   ;;  %v1500_v18 = vld [vmem:[%s1693_s10] ss:$8 sps:$4 sm:$0xff]   ;;  %v1506_v20 = vld [vmem:[%s1693_s10 + $0x14] ss:$8 sps:$4 sm:$0xff]  }
  0x11   : > { %v1505_v12 = vld [vmem:[%s1693_s10 + $0x84] ss:$8 sps:$4 sm:$0xff]   ;;  %600 = vmatprep.mubr.bf16.mxu0 %v1502_v11  ;;  %v1503_v19 = vld [vmem:[%s1693_s10 + $0x80] ss:$8 sps:$4 sm:$0xff]   ;;  %v1508_v21 = vld [vmem:[%s1693_s10 + $0x94] ss:$8 sps:$4 sm:$0xff]  }
  0x12   : > { %1333 = vmatpush3.bf16.msra.mxu0 %v1487_v3  ;;  %1451 = vmatpush3.bf16.msra.mxu1 %v1487_v3  ;;  %v1496_v14 = vld [vmem:[%s1902_s1 + $0x48] sm:$0xff]   ;;  %v1498_v16 = vld [vmem:[%s1902_s1 + $0x40] sm:$0xff]   ;;  %v1510_v22 = vld [vmem:[%s1693_s10 + $0x10] ss:$8 sps:$4 sm:$0xff]  }
  0x13   : > { %1334 = vmatprep.subr.bf16.mxu0 %v1488_v4  ;;  %1444 = vmatprep.subr.bf16.mxu1 %v1488_v4  ;;  %v1497_v15 = vld [vmem:[%s1902_s1 + $0x8] sm:$0xff]   ;;  %v1499_v17 = vld [vmem:[%s1902_s1] sm:$0xff]   ;;  %v1511_v23 = vld [vmem:[%s1693_s10 + $0x90] ss:$8 sps:$4 sm:$0xff]  }
  0x14   : > { %664 = vmatprep.mubr.bf16.mxu1 %v1505_v12  ;;  %v1512_v24 = vld [vmem:[%s1693_s10 + $0x24] ss:$8 sps:$4 sm:$0xff]   ;;  %v1516_v26 = vld [vmem:[%s1693_s10 + $0x20] ss:$8 sps:$4 sm:$0xff]   ;;  %v1518_v28 = vld [vmem:[%s1693_s10 + $0x34] ss:$8 sps:$4 sm:$0xff]  }
  0x15   : > { %v1514_v25 = vld [vmem:[%s1693_s10 + $0xa4] ss:$8 sps:$4 sm:$0xff]   ;;  %v1517_v27 = vld [vmem:[%s1693_s10 + $0xa0] ss:$8 sps:$4 sm:$0xff]   ;;  %v1520_v29 = vld [vmem:[%s1693_s10 + $0xb4] ss:$8 sps:$4 sm:$0xff]  }
  0x16   : > { %1335 = vmatpush3.bf16.msra.mxu0 %v1489_v5  ;;  %1452 = vmatpush3.bf16.msra.mxu1 %v1489_v5  ;;  %v1522_v30 = vld [vmem:[%s1693_s10 + $0x30] ss:$8 sps:$4 sm:$0xff]   ;;  %v1524_v32 = vld [vmem:[%s1693_s10 + $0x44] ss:$8 sps:$4 sm:$0xff]   ;;  %v1528_v34 = vld [vmem:[%s1693_s10 + $0x40] ss:$8 sps:$4 sm:$0xff]  }
  0x17   : > { %1336 = vmatprep.subr.bf16.mxu0 %v1490_v6  ;;  %1445 = vmatprep.subr.bf16.mxu1 %v1490_v6  ;;  %v1523_v31 = vld [vmem:[%s1693_s10 + $0xb0] ss:$8 sps:$4 sm:$0xff]   ;;  %v1526_v33 = vld [vmem:[%s1693_s10 + $0xc4] ss:$8 sps:$4 sm:$0xff]   ;;  %v1529_v35 = vld [vmem:[%s1693_s10 + $0xc0] ss:$8 sps:$4 sm:$0xff]  }
  0x18   : > { %v1530_v36 = vld [vmem:[%s1693_s10 + $0x54] ss:$8 sps:$4 sm:$0xff]   ;;  %v1532_v38 = vld [vmem:[%s1693_s10 + $0x50] ss:$8 sps:$4 sm:$0xff]   ;;  %v1533_v40 = vld [vmem:[%s1693_s10 + $0x64] ss:$8 sps:$4 sm:$0xff]  }
  0x19   : > { %v1539_v37 = vld [vmem:[%s1693_s10 + $0xd4] ss:$8 sps:$4 sm:$0xff]   ;;  %v1541_v39 = vld [vmem:[%s1693_s10 + $0xd0] ss:$8 sps:$4 sm:$0xff]   ;;  %v1535_v41 = vld [vmem:[%s1693_s10 + $0x60] ss:$8 sps:$4 sm:$0xff]  }
  0x1a   : > { %1337 = vmatpush3.bf16.msra.mxu0 %v1491_v7  ;;  %1453 = vmatpush3.bf16.msra.mxu1 %v1491_v7  ;;  %v1536_v42 = vld [vmem:[%s1693_s10 + $0x74] ss:$8 sps:$4 sm:$0xff]   ;;  %v1538_v43 = vld [vmem:[%s1693_s10 + $0x70] ss:$8 sps:$4 sm:$0xff]   ;;  %v1542_v44 = vld [vmem:[%s1693_s10 + $0xe4] ss:$8 sps:$4 sm:$0xff]  }
  0x1b   : > { %1338 = vmatprep.subr.bf16.mxu0 %v1492_v8  ;;  %1446 = vmatprep.subr.bf16.mxu1 %v1492_v8  ;;  %v1544_v45 = vld [vmem:[%s1693_s10 + $0xe0] ss:$8 sps:$4 sm:$0xff]   ;;  %v1545_v46 = vld [vmem:[%s1693_s10 + $0xf4] ss:$8 sps:$4 sm:$0xff]   ;;  %v1547_v47 = vld [vmem:[%s1693_s10 + $0xf0] ss:$8 sps:$4 sm:$0xff]  }
  0x1c   : > { %v1751_v50 = vld [vmem:[%s1903_s2] ss:$0 sm:$0xff] }
  0x1e   : > { %1339 = vmatpush3.bf16.msra.mxu0 %v1493_v9  ;;  %1454 = vmatpush3.bf16.msra.mxu1 %v1493_v9 }
  0x1f   : > { %1340 = vmatprep.subr.bf16.mxu0 %v1494_v10  ;;  %1447 = vmatprep.subr.bf16.mxu1 %v1494_v10 }
  0x22   : > { %1341 = vmatpush3.bf16.msra.mxu0 %v1495_v13  ;;  %1455 = vmatpush3.bf16.msra.mxu1 %v1495_v13 }
  0x23   : > { %1342 = vmatprep.subr.bf16.mxu0 %v1496_v14  ;;  %1448 = vmatprep.subr.bf16.mxu1 %v1496_v14 }
  0x26   : > { %1343 = vmatpush3.bf16.msra.mxu0 %v1497_v15  ;;  %1456 = vmatpush3.bf16.msra.mxu1 %v1497_v15 }
  0x27   : > { %1344 = vmatprep.subr.bf16.mxu0 %v1498_v16  ;;  %1449 = vmatprep.subr.bf16.mxu1 %v1498_v16 }
  0x2a   : > { %1345 = vmatpush3.bf16.msra.mxu0 %v1499_v17  ;;  %1457 = vmatpush3.bf16.msra.mxu1 %v1499_v17 }
  0x2d   : > { %601 = vmatmul.mubr.bf16.vlgmr.msra.gmra.mxu0 %v1500_v18  ;;  %665 = vmatmul.mubr.bf16.vlgmr.msra.gmra.mxu1 %v1503_v19 }
  0x2e   : > { %608 = vmatprep.mubr.bf16.mxu0 %v1506_v20  ;;  %672 = vmatprep.mubr.bf16.mxu1 %v1508_v21 }
  0x35   : > { %609 = vmatmul.mubr.bf16.gmra.mxu0 %v1510_v22  ;;  %673 = vmatmul.mubr.bf16.gmra.mxu1 %v1511_v23 }
  0x36   : > { %616 = vmatprep.mubr.bf16.mxu0 %v1512_v24  ;;  %680 = vmatprep.mubr.bf16.mxu1 %v1514_v25 }
  0x3d   : > { %617 = vmatmul.mubr.bf16.gmra.mxu0 %v1516_v26  ;;  %681 = vmatmul.mubr.bf16.gmra.mxu1 %v1517_v27 }
  0x3e   : > { %624 = vmatprep.mubr.bf16.mxu0 %v1518_v28  ;;  %688 = vmatprep.mubr.bf16.mxu1 %v1520_v29 }
  0x45   : > { %625 = vmatmul.mubr.bf16.gmra.mxu0 %v1522_v30  ;;  %689 = vmatmul.mubr.bf16.gmra.mxu1 %v1523_v31 }
  0x46   : > { %632 = vmatprep.mubr.bf16.mxu0 %v1524_v32  ;;  %696 = vmatprep.mubr.bf16.mxu1 %v1526_v33 }
  0x4d   : > { %633 = vmatmul.mubr.bf16.gmra.mxu0 %v1528_v34  ;;  %697 = vmatmul.mubr.bf16.gmra.mxu1 %v1529_v35 }
  0x4e   : > { %640 = vmatprep.mubr.bf16.mxu0 %v1530_v36  ;;  %704 = vmatprep.mubr.bf16.mxu1 %v1539_v37 }
  0x55   : > { %641 = vmatmul.mubr.bf16.gmra.mxu0 %v1532_v38  ;;  %705 = vmatmul.mubr.bf16.gmra.mxu1 %v1541_v39 }
  0x56   : > { %648 = vmatprep.mubr.bf16.mxu0 %v1533_v40  ;;  %712 = vmatprep.mubr.bf16.mxu1 %v1542_v44 }
  0x5d   : > { %649 = vmatmul.mubr.bf16.gmra.mxu0 %v1535_v41  ;;  %713 = vmatmul.mubr.bf16.gmra.mxu1 %v1544_v45 }
  0x5e   : > { %656 = vmatprep.mubr.bf16.mxu0 %v1536_v42  ;;  %720 = vmatprep.mubr.bf16.mxu1 %v1545_v46 }
  0x65   : > { %657 = vmatmul.mubr.bf16.gmra.mxu0 %v1538_v43  ;;  %721 = vmatmul.mubr.bf16.gmra.mxu1 %v1547_v47 }
  0xed   : > { %v1346_v48 = vpop.f32.mrf.mxu0  ;;  %v1394_v49 = vpop.f32.mrf.mxu1 }
  0xef   : > { %v1347_v51 = vpop.f32.mrf.mxu0  ;;  %v1395_v52 = vpop.f32.mrf.mxu1 }
  0xf0   : > { %v1348_v53 = vadd.f32 %v1347_v51, %v1346_v48  ;;  %v1396_v54 = vadd.f32 %v1395_v52, %v1394_v49 }
  0xf1   : > { %v1349_v55 = vpop.f32.mrf.mxu0  ;;  %v1397_v56 = vpop.f32.mrf.mxu1 }
  0xf2   : > { %v603_v57 = vadd.f32 %v1348_v53, %v1751_v50  ;;  %v667_v58 = vadd.f32 %v1396_v54, %v1751_v50 }
  0xf3   : > { %v1350_v59 = vpop.f32.mrf.mxu0  ;;  %v1398_v60 = vpop.f32.mrf.mxu1 }
  0xf4   : > { %v761_v61 = vmul.f32 0.70710677, %v603_v57  ;;  %v777_v62 = vmul.f32 0.70710677, %v667_v58  ;;  %v1351_v63 = vadd.f32 %v1350_v59, %v1349_v55  ;;  %v1399_v0 = vadd.f32 %v1398_v60, %v1397_v56 }
  0xf5   : > { %v1352_v1 = vpop.f32.mrf.mxu0  ;;  %v1400_v2 = vpop.f32.mrf.mxu1  ;;  %v745_v45 = vmul.f32 0.5, %v667_v58  ;;  %v729_v47 = vmul.f32 0.5, %v603_v57 }
  0xf6   : > { %1548 = verf.f32 %v761_v61  ;;  %v1756_v3 = vadd.f32 %v1351_v63, %v1751_v50  ;;  %v1759_v4 = vadd.f32 %v1399_v0, %v1751_v50 }
  0xf7   : > { %1550 = verf.f32 %v777_v62  ;;  %v1353_v5 = vpop.f32.mrf.mxu0  ;;  %v1401_v6 = vpop.f32.mrf.mxu1 }
  0xf8   : > { %v762_v7 = vmul.f32 0.70710677, %v1756_v3  ;;  %v778_v8 = vmul.f32 0.70710677, %v1759_v4  ;;  %v1354_v9 = vadd.f32 %v1353_v5, %v1352_v1  ;;  %v1402_v10 = vadd.f32 %v1401_v6, %v1400_v2 }
  0xf9   : > { %v1355_v11 = vpop.f32.mrf.mxu0  ;;  %v1403_v12 = vpop.f32.mrf.mxu1  ;;  %v746_v0 = vmul.f32 0.5, %v1759_v4  ;;  %v730_v2 = vmul.f32 0.5, %v1756_v3 }
  0xfa   : > { %1552 = verf.f32 %v762_v7  ;;  %v1764_v13 = vadd.f32 %v1354_v9, %v1751_v50  ;;  %v1767_v14 = vadd.f32 %v1402_v10, %v1751_v50 }
  0xfb   : > { %1554 = verf.f32 %v778_v8  ;;  %v1356_v15 = vpop.f32.mrf.mxu0  ;;  %v1404_v16 = vpop.f32.mrf.mxu1 }
  0xfc   : > { %v763_v17 = vmul.f32 0.70710677, %v1764_v13  ;;  %v779_v18 = vmul.f32 0.70710677, %v1767_v14  ;;  %v1357_v19 = vadd.f32 %v1356_v15, %v1355_v11  ;;  %v1405_v20 = vadd.f32 %v1404_v16, %v1403_v12 }
  0xfd   : > { %v1358_v21 = vpop.f32.mrf.mxu0  ;;  %v1406_v22 = vpop.f32.mrf.mxu1 }
  0xfe   : > { %1556 = verf.f32 %v763_v17  ;;  %v1772_v23 = vadd.f32 %v1357_v19, %v1751_v50  ;;  %v1775_v24 = vadd.f32 %v1405_v20, %v1751_v50  ;;  %v747_v20 = vmul.f32 0.5, %v1767_v14 }
  0xff   : > { %1558 = verf.f32 %v779_v18  ;;  %v1359_v25 = vpop.f32.mrf.mxu0  ;;  %v1407_v26 = vpop.f32.mrf.mxu1 }
 0x100   : > { %v764_v27 = vmul.f32 0.70710677, %v1772_v23  ;;  %v780_v28 = vmul.f32 0.70710677, %v1775_v24  ;;  %v1360_v29 = vadd.f32 %v1359_v25, %v1358_v21  ;;  %v1408_v30 = vadd.f32 %v1407_v26, %v1406_v22 }
 0x101   : > { %v1361_v31 = vpop.f32.mrf.mxu0  ;;  %v1409_v32 = vpop.f32.mrf.mxu1  ;;  %v731_v22 = vmul.f32 0.5, %v1764_v13 }
 0x102   : > { %1560 = verf.f32 %v764_v27  ;;  %v1780_v33 = vadd.f32 %v1360_v29, %v1751_v50  ;;  %v1783_v34 = vadd.f32 %v1408_v30, %v1751_v50 }
 0x103   : > { %v1549_v35 = vpop.eup %1548  ;;  %1562 = verf.f32 %v780_v28  ;;  %v1362_v36 = vpop.f32.mrf.mxu0 }
 0x104   : > { %v1410_v37 = vpop.f32.mrf.mxu1  ;;  %v1551_v38 = vpop.eup %1550  ;;  %v765_v39 = vmul.f32 0.70710677, %v1780_v33  ;;  %v781_v40 = vmul.f32 0.70710677, %v1783_v34  ;;  %v1363_v41 = vadd.f32 %v1362_v36, %v1361_v31  ;;  %v825_v48 = vadd.f32 1.0, %v1549_v35 }
 0x105   : > { %v1411_v42 = vadd.f32 %v1410_v37, %v1409_v32  ;;  %v1364_v43 = vpop.f32.mrf.mxu0  ;;  %v841_v46 = vadd.f32 1.0, %v1551_v38 }
 0x106   : > { %v1412_v44 = vpop.f32.mrf.mxu1  ;;  %1564 = verf.f32 %v765_v39  ;;  %v1788_v49 = vadd.f32 %v1363_v41, %v1751_v50  ;;  %v857_v56 = vmul.f32 %v825_v48, %v729_v47 }
 0x107   : > { %v1791_v51 = vadd.f32 %v1411_v42, %v1751_v50  ;;  %v1553_v52 = vpop.eup %1552  ;;  %1566 = verf.f32 %v781_v40  ;;  %v1365_v53 = vpop.f32.mrf.mxu0  ;;  %v873_v55 = vmul.f32 %v841_v46, %v745_v45  ;;  %v748_v40 = vmul.f32 0.5, %v1775_v24 }
 0x108   : > { %v1413_v54 = vpop.f32.mrf.mxu1  ;;  %v1555_v59 = vpop.eup %1554  ;;  %v766_v60 = vmul.f32 0.70710677, %v1788_v49  ;;  %v1366_v57 = vadd.f32 %v1365_v53, %v1364_v43  ;;  %1084 = vxpose.xlu0.b32.start [1/16] %v857_v56, 128  ;;  %v826_v5 = vadd.f32 1.0, %v1553_v52  ;;  %v732_v42 = vmul.f32 0.5, %v1772_v23 }
 0x109   : > { %v782_v58 = vmul.f32 0.70710677, %v1791_v51  ;;  %v1414_v61 = vadd.f32 %v1413_v54, %v1412_v44  ;;  %1116 = vxpose.xlu1.b32.start [1/9] (short) %v873_v55, 128  ;;  %v1367_v62 = vpop.f32.mrf.mxu0  ;;  %v842_v1 = vadd.f32 1.0, %v1555_v59  ;;  %v733_v54 = vmul.f32 0.5, %v1780_v33 }
 0x10a   : > { %v1415_v63 = vpop.f32.mrf.mxu1  ;;  %1568 = verf.f32 %v766_v60  ;;  %v1798_v6 = vadd.f32 %v1366_v57, %v1751_v50  ;;  %v858_v12 = vmul.f32 %v826_v5, %v730_v2 }
 0x10b   : > { %v1801_v7 = vadd.f32 %v1414_v61, %v1751_v50  ;;  %v1557_v8 = vpop.eup %1556  ;;  %1570 = verf.f32 %v782_v58  ;;  %v1368_v9 = vpop.f32.mrf.mxu0  ;;  %v874_v11 = vmul.f32 %v842_v1, %v746_v0  ;;  %v749_v58 = vmul.f32 0.5, %v1783_v34 }
 0x10c   : > { %v1416_v10 = vpop.f32.mrf.mxu1  ;;  %v1559_v15 = vpop.eup %1558  ;;  %v767_v4 = vmul.f32 0.70710677, %v1798_v6  ;;  %v1369_v3 = vadd.f32 %v1368_v9, %v1367_v62  ;;  %1085 = vxpose.xlu0.b32.cont [2/16] %v858_v12, 128  ;;  %v827_v25 = vadd.f32 1.0, %v1557_v8  ;;  %v750_v12 = vmul.f32 0.5, %v1791_v51 }
 0x10d   : > { %v783_v16 = vmul.f32 0.70710677, %v1801_v7  ;;  %v1417_v17 = vadd.f32 %v1416_v10, %v1415_v63  ;;  %1117 = vxpose.xlu1.b32.cont [2/9] (short) %v874_v11, 128  ;;  %v1370_v18 = vpop.f32.mrf.mxu0  ;;  %v843_v21 = vadd.f32 1.0, %v1559_v15  ;;  %v734_v10 = vmul.f32 0.5, %v1788_v49 }
 0x10e   : > { %v1418_v19 = vpop.f32.mrf.mxu1  ;;  %1572 = verf.f32 %v767_v4  ;;  %v1808_v26 = vadd.f32 %v1369_v3, %v1751_v50  ;;  %v859_v32 = vmul.f32 %v827_v25, %v731_v22 }
 0x10f   : > { %v1811_v27 = vadd.f32 %v1417_v17, %v1751_v50  ;;  %v1561_v28 = vpop.eup %1560  ;;  %1574 = verf.f32 %v783_v16  ;;  %v1371_v29 = vpop.f32.mrf.mxu0  ;;  %v875_v31 = vmul.f32 %v843_v21, %v747_v20  ;;  %v889_v17 = vlaneseq }
 0x110   : > { %v1419_v30 = vpop.f32.mrf.mxu1  ;;  %v1563_v35 = vpop.eup %1562  ;;  %v768_v14 = vmul.f32 0.70710677, %v1808_v26  ;;  %v1372_v13 = vadd.f32 %v1371_v29, %v1370_v18  ;;  %1086 = vxpose.xlu0.b32.cont [3/16] %v859_v32, 128  ;;  %v828_v43 = vadd.f32 1.0, %v1561_v28  ;;  %v735_v28 = vmul.f32 0.5, %v1798_v6 }
 0x111   : > { %v784_v36 = vmul.f32 0.70710677, %v1811_v27  ;;  %v1420_v37 = vadd.f32 %v1419_v30, %v1418_v19  ;;  %1118 = vxpose.xlu1.b32.cont [3/9] (short) %v875_v31, 128  ;;  %v1373_v38 = vpop.f32.mrf.mxu0  ;;  %v844_v41 = vadd.f32 1.0, %v1563_v35  ;;  %v751_v30 = vmul.f32 0.5, %v1801_v7 }
 0x112   : > { %v1421_v39 = vpop.f32.mrf.mxu1  ;;  %1576 = verf.f32 %v768_v14  ;;  %v1818_v44 = vadd.f32 %v1372_v13, %v1751_v50  ;;  %v860_v53 = vmul.f32 %v828_v43, %v732_v42  ;;  %v890_v14 = vshrl.u32 %v889_v17, 7 }
 0x113   : > { %v1821_v45 = vadd.f32 %v1420_v37, %v1751_v50  ;;  %v1565_v46 = vpop.eup %1564  ;;  %1578 = verf.f32 %v784_v36  ;;  %v1374_v47 = vpop.f32.mrf.mxu0  ;;  %v876_v52 = vmul.f32 %v844_v41, %v748_v40  ;;  %v736_v40 = vmul.f32 0.5, %v1808_v26 }
 0x114   : > { %v1422_v48 = vpop.f32.mrf.mxu1  ;;  %v1567_v24 = vpop.eup %1566  ;;  %v769_v55 = vmul.f32 0.70710677, %v1818_v44  ;;  %v1375_v56 = vadd.f32 %v1374_v47, %v1373_v38  ;;  %v829_v59 = vadd.f32 1.0, %v1565_v46  ;;  %1087 = vxpose.xlu0.b32.cont [4/16] %v860_v53, 128  ;;  %v752_v42 = vmul.f32 0.5, %v1811_v27 }
 0x115   : > { %v785_v23 = vmul.f32 0.70710677, %v1821_v45  ;;  %1119 = vxpose.xlu1.b32.cont [4/9] (short) %v876_v52, 128  ;;  %v1376_v60 = vpop.f32.mrf.mxu0  ;;  %v845_v57 = vadd.f32 1.0, %v1567_v24  ;;  %v914_v48 = vadd.s32 192, %v890_v14  ;;  %v737_v26 = vmul.f32 0.5, %v1818_v44 }
 0x116   : > { %v1424_v61 = vpop.f32.mrf.mxu1  ;;  %1580 = verf.f32 %v769_v55  ;;  %v1828_v62 = vadd.f32 %v1375_v56, %v1751_v50  ;;  %v861_v63 = vmul.f32 %v829_v59, %v733_v54  ;;  %v753_v27 = vmul.f32 0.5, %v1821_v45 }
 0x117   : > { %v1569_v33 = vpop.eup %1568  ;;  %1582 = verf.f32 %v785_v23  ;;  %v1377_v0 = vpop.f32.mrf.mxu0  ;;  %v877_v1 = vmul.f32 %v845_v57, %v749_v58  ;;  %vm980_vm0 = vcmp.lt.s32.totalorder %v914_v48, 199 }
 0x118   : > { %v1425_v2 = vpop.f32.mrf.mxu1  ;;  %v1571_v5 = vpop.eup %1570  ;;  %v770_v8 = vmul.f32 0.70710677, %v1828_v62  ;;  %v1378_v9 = vadd.f32 %v1377_v0, %v1376_v60  ;;  %v830_v11 = vadd.f32 1.0, %v1569_v33  ;;  %1088 = vxpose.xlu0.b32.cont [5/16] %v861_v63, 128 }
 0x119   : > { %1120 = vxpose.xlu1.b32.cont [5/9] (short) %v877_v1, 128  ;;  %v1379_v34 = vpop.f32.mrf.mxu0  ;;  %v846_v15 = vadd.f32 1.0, %v1571_v5  ;;  %v738_v2 = vmul.f32 0.5, %v1828_v62 }
 0x11a   : > { %v1427_v4 = vpop.f32.mrf.mxu1  ;;  %1584 = verf.f32 %v770_v8  ;;  %v1834_v16 = vadd.f32 %v1378_v9, %v1751_v50  ;;  %v862_v3 = vmul.f32 %v830_v11, %v734_v10 }
 0x11b   : > { %v1573_v18 = vpop.eup %1572  ;;  %v1380_v19 = vpop.f32.mrf.mxu0  ;;  %v878_v20 = vmul.f32 %v846_v15, %v750_v12 }
 0x11c   : > { %v1428_v21 = vpop.f32.mrf.mxu1  ;;  %v1575_v22 = vpop.eup %1574  ;;  %v771_v49 = vmul.f32 0.70710677, %v1834_v16  ;;  %v1381_v25 = vadd.f32 %v1380_v19, %v1379_v34  ;;  %v831_v29 = vadd.f32 1.0, %v1573_v18  ;;  %1089 = vxpose.xlu0.b32.cont [6/16] %v862_v3, 128  ;;  %v739_v15 = vmul.f32 0.5, %v1834_v16 }
 0x11d   : > { %1121 = vxpose.xlu1.b32.cont [6/9] (short) %v878_v20, 128  ;;  %v1382_v51 = vpop.f32.mrf.mxu0  ;;  %v847_v31 = vadd.f32 1.0, %v1575_v22 }
 0x11e   : > { %1586 = verf.f32 %v771_v49  ;;  %v1840_v32 = vadd.f32 %v1381_v25, %v1751_v50  ;;  %v863_v35 = vmul.f32 %v831_v29, %v735_v28  ;;  %v1430_v17 = vpop.f32.mrf.mxu1 }
 0x11f   : > { %v1577_v36 = vpop.eup %1576  ;;  %v1383_v13 = vpop.f32.mrf.mxu0  ;;  %v879_v37 = vmul.f32 %v847_v31, %v751_v30 }
 0x120   : > { %v1579_v38 = vpop.eup %1578  ;;  %v772_v39 = vmul.f32 0.70710677, %v1840_v32  ;;  %v1384_v6 = vadd.f32 %v1383_v13, %v1382_v51  ;;  %v832_v41 = vadd.f32 1.0, %v1577_v36  ;;  %1090 = vxpose.xlu0.b32.cont [7/16] %v863_v35, 128  ;;  %v740_v20 = vmul.f32 0.5, %v1840_v32  ;;  %v1431_v22 = vpop.f32.mrf.mxu1 }
 0x121   : > { %1122 = vxpose.xlu1.b32.cont [7/9] (short) %v879_v37, 128  ;;  %v1385_v7 = vpop.f32.mrf.mxu0  ;;  %v848_v43 = vadd.f32 1.0, %v1579_v38 }
 0x122   : > { %1588 = verf.f32 %v772_v39  ;;  %v651_v46 = vadd.f32 %v1384_v6, %v1751_v50  ;;  %v864_v47 = vmul.f32 %v832_v41, %v736_v40  ;;  %v1433_v25 = vpop.f32.mrf.mxu1 }
 0x123   : > { %v1581_v52 = vpop.eup %1580  ;;  %v1386_v53 = vpop.f32.mrf.mxu0  ;;  %v880_v54 = vmul.f32 %v848_v43, %v752_v42 }
 0x124   : > { %v1583_v24 = vpop.eup %1582  ;;  %v773_v55 = vmul.f32 0.70710677, %v651_v46  ;;  %v1387_v23 = vadd.f32 %v1386_v53, %v1385_v7  ;;  %v833_v56 = vadd.f32 1.0, %v1581_v52  ;;  %1091 = vxpose.xlu0.b32.cont [8/16] %v864_v47, 128  ;;  %v741_v29 = vmul.f32 0.5, %v651_v46  ;;  %v1434_v51 = vpop.f32.mrf.mxu1 }
 0x125   : > { %1123 = vxpose.xlu1.b32.cont [8/9] (short) %v880_v54, 128  ;;  %v1388_v59 = vpop.f32.mrf.mxu0  ;;  %v849_v60 = vadd.f32 1.0, %v1583_v24 }
 0x126   : > { %1590 = verf.f32 %v773_v55  ;;  %v654_v58 = vadd.f32 %v1387_v23, %v1751_v50  ;;  %v865_v57 = vmul.f32 %v833_v56, %v737_v26 }
 0x127   : > { %v1585_v61 = vpop.eup %1584  ;;  %v1389_v63 = vpop.f32.mrf.mxu0  ;;  %v881_v33 = vmul.f32 %v849_v60, %v753_v27 }
 0x128   : > { %v774_v0 = vmul.f32 0.70710677, %v654_v58  ;;  %v1390_v1 = vadd.f32 %v1389_v63, %v1388_v59  ;;  %v834_v44 = vadd.f32 1.0, %v1585_v61  ;;  %1092 = vxpose.xlu0.b32.cont [9/16] %v865_v57, 128  ;;  %v742_v35 = vmul.f32 0.5, %v654_v58 }
 0x129   : > { %v1076_v5 = vsel %vm980_vm0, %v881_v33, 0.0  ;;  %v1391_v8 = vpop.f32.mrf.mxu0 }
 0x12a   : > { %1592 = verf.f32 %v774_v0  ;;  %v659_v45 = vadd.f32 %v1390_v1, %v1751_v50  ;;  %1124 = vxpose.xlu1.b32.end [9/9] (short) %v1076_v5, 128  ;;  %v866_v9 = vmul.f32 %v834_v44, %v738_v2 }
 0x12b   : > { %v1587_v10 = vpop.eup %1586  ;;  %v1392_v11 = vpop.f32.mrf.mxu0 }
 0x12c   : > { %v775_v34 = vmul.f32 0.70710677, %v659_v45  ;;  %v1393_v12 = vadd.f32 %v1392_v11, %v1391_v8  ;;  %v835_v4 = vadd.f32 1.0, %v1587_v10  ;;  %1093 = vxpose.xlu0.b32.cont [10/16] %v866_v9, 128  ;;  %v743_v38 = vmul.f32 0.5, %v659_v45 }
 0x12e   : > { %1594 = verf.f32 %v775_v34  ;;  %v662_v62 = vadd.f32 %v1393_v12, %v1751_v50  ;;  %v867_v3 = vmul.f32 %v835_v4, %v739_v15  ;;  %v1436_v50 = vpop.f32.mrf.mxu1 }
 0x12f   : > { %v1589_v18 = vpop.eup %1588 }
 0x130   : > { %v776_v19 = vmul.f32 0.70710677, %v662_v62  ;;  %v836_v21 = vadd.f32 1.0, %v1589_v18  ;;  %1094 = vxpose.xlu0.b32.cont [11/16] %v867_v3, 128  ;;  %v1437_v36 = vpop.f32.mrf.mxu1  ;;  %v744_v7 = vmul.f32 0.5, %v662_v62 }
 0x132   : > { %1596 = verf.f32 %v776_v19  ;;  %v868_v49 = vmul.f32 %v836_v21, %v740_v20  ;;  %v1439_v37 = vpop.f32.mrf.mxu1 }
 0x133   : > { %v1591_v28 = vpop.eup %1590 }
 0x134   : > { %v837_v16 = vadd.f32 1.0, %v1591_v28  ;;  %1095 = vxpose.xlu0.b32.cont [12/16] %v868_v49, 128  ;;  %v1440_v6 = vpop.f32.mrf.mxu1 }
 0x136   : > { %v869_v30 = vmul.f32 %v837_v16, %v741_v29 }
 0x137   : > { %v1593_v31 = vpop.eup %1592 }
 0x138   : > { %v838_v14 = vadd.f32 1.0, %v1593_v31  ;;  %1096 = vxpose.xlu0.b32.cont [13/16] %v869_v30, 128 }
 0x13a   : > { %v870_v32 = vmul.f32 %v838_v14, %v742_v35 }
 0x13b   : > { %v1595_v13 = vpop.eup %1594 }
 0x13c   : > { %v839_v39 = vadd.f32 1.0, %v1595_v13  ;;  %1097 = vxpose.xlu0.b32.cont [14/16] %v870_v32, 128 }
 0x13e   : > { %v871_v40 = vmul.f32 %v839_v39, %v743_v38 }
 0x13f   : > { %v1597_v41 = vpop.eup %1596 }
 0x140   : > { %v840_v42 = vadd.f32 1.0, %v1597_v41  ;;  %1098 = vxpose.xlu0.b32.cont [15/16] %v871_v40, 128 }
 0x142   : > { %v872_v43 = vmul.f32 %v840_v42, %v744_v7 }
 0x144   : > { %1099 = vxpose.xlu0.b32.end [16/16] %v872_v43, 128 }
 0x184   : > { %v1100_v46 = vpop.trf.xlu0 }
 0x185   : > { %1148 = vst [vmem:[%s1858_s7] sm:$0xff] %v1100_v46 }
 0x186   : > { %v1132_v47 = vpop.trf.xlu1 }
 0x187   : > { %1149 = vst [vmem:[%s1858_s7 + $0x8] sm:$0xff] %v1132_v47 }
 0x188   : > { %v1101_v48 = vpop.trf.xlu0 }
 0x189   : > { %1150 = vst [vmem:[%s1858_s7 + $0x10] sm:$0xff] %v1101_v48 }
 0x18a   : > { %v1133_v52 = vpop.trf.xlu1 }
 0x18b   : > { %1151 = vst [vmem:[%s1858_s7 + $0x18] sm:$0xff] %v1133_v52 }
 0x18c   : > { %v1102_v53 = vpop.trf.xlu0 }
 0x18d   : > { %1152 = vst [vmem:[%s1858_s7 + $0x20] sm:$0xff] %v1102_v53 }
 0x18e   : > { %v1134_v54 = vpop.trf.xlu1 }
 0x18f   : > { %1153 = vst [vmem:[%s1858_s7 + $0x28] sm:$0xff] %v1134_v54 }
 0x190   : > { %v1103_v24 = vpop.trf.xlu0 }
 0x191   : > { %1154 = vst [vmem:[%s1858_s7 + $0x30] sm:$0xff] %v1103_v24 }
 0x192   : > { %v1135_v55 = vpop.trf.xlu1 }
 0x193   : > { %1155 = vst [vmem:[%s1858_s7 + $0x38] sm:$0xff] %v1135_v55 }
 0x194   : > { %v1104_v23 = vpop.trf.xlu0 }
 0x195   : > { %1156 = vst [vmem:[%s1858_s7 + $0x40] sm:$0xff] %v1104_v23 }
 0x196   : > { %v1136_v26 = vpop.trf.xlu1 }
 0x197   : > { %1157 = vst [vmem:[%s1858_s7 + $0x48] sm:$0xff] %v1136_v26 }
 0x198   : > { %v1105_v56 = vpop.trf.xlu0 }
 0x199   : > { %1158 = vst [vmem:[%s1858_s7 + $0x50] sm:$0xff] %v1105_v56 }
 0x19a   : > { %v1137_v59 = vpop.trf.xlu1 }
 0x19b   : > { %1159 = vst [vmem:[%s1858_s7 + $0x58] sm:$0xff] %v1137_v59 }
 0x19c   : > { %v1106_v27 = vpop.trf.xlu0 }
 0x19d   : > { %1160 = vst [vmem:[%s1858_s7 + $0x60] sm:$0xff] %v1106_v27 }
 0x19e   : > { %v1138_v60 = vpop.trf.xlu1 }
 0x19f   : > { %1161 = vst [vmem:[%s1858_s7 + $0x68] sm:$0xff] %v1138_v60 }
 0x1a0   : > { %v1107_v58 = vpop.trf.xlu0 }
 0x1a1   : > { %1162 = vst [vmem:[%s1858_s7 + $0x70] sm:$0xff] %v1107_v58 }
 0x1a2   : > { %v1139_v57 = vpop.trf.xlu1 }
 0x1a3   : > { %1163 = vst [vmem:[%s1858_s7 + $0x78] sm:$0xff] %v1139_v57 }
 0x1a4   : > { %v1108_v61 = vpop.trf.xlu0 }
 0x1a5   : > { %1164 = vst [vmem:[%s1858_s7 + $0x80] sm:$0xff] %v1108_v61 }
 0x1a6   : > { %v1140_v63 = vpop.trf.xlu1 }
 0x1a7   : > { %1165 = vst [vmem:[%s1858_s7 + $0x88] sm:$0xff] %v1140_v63 }
 0x1a8   : > { %v1109_v33 = vpop.trf.xlu0 }
 0x1a9   : > { %1166 = vst [vmem:[%s1858_s7 + $0x90] sm:$0xff] %v1109_v33 }
 0x1aa   : > { %v1141_v0 = vpop.trf.xlu1 }
 0x1ab   : > { %1167 = vst [vmem:[%s1858_s7 + $0x98] sm:$0xff] %v1141_v0 }
 0x1ac   : > { %v1110_v1 = vpop.trf.xlu0 }
 0x1ad   : > { %1168 = vst [vmem:[%s1858_s7 + $0xa0] sm:$0xff] %v1110_v1 }
 0x1ae   : > { %v1142_v2 = vpop.trf.xlu1 }
 0x1af   : > { %1169 = vst [vmem:[%s1858_s7 + $0xa8] sm:$0xff] %v1142_v2 }
 0x1b0   : > { %v1111_v44 = vpop.trf.xlu0 }
 0x1b1   : > { %1170 = vst [vmem:[%s1858_s7 + $0xb0] sm:$0xff] %v1111_v44 }
 0x1b2   : > { %v1143_v5 = vpop.trf.xlu1 }
 0x1b3   : > { %1171 = vst [vmem:[%s1858_s7 + $0xb8] sm:$0xff] %v1143_v5 }
 0x1b4   : > { %v1112_v8 = vpop.trf.xlu0 }
 0x1b5   : > { %1172 = vst [vmem:[%s1858_s7 + $0xc0] sm:$0xff] %v1112_v8 }
 0x1b6   : > { %v1144_v45 = vpop.trf.xlu1 }
 0x1b7   : > { %1173 = vst [vmem:[%s1858_s7 + $0xc8] sm:$0xff] %v1144_v45 }
 0x1b8   : > { %v1113_v9 = vpop.trf.xlu0 }
 0x1b9   : > { %1174 = vst [vmem:[%s1858_s7 + $0xd0] sm:$0xff] %v1113_v9 }
 0x1ba   : > { %v1145_v10 = vpop.trf.xlu1 }
 0x1bb   : > { %1175 = vst [vmem:[%s1858_s7 + $0xd8] sm:$0xff] %v1145_v10 }
 0x1bc   : > { %v1114_v11 = vpop.trf.xlu0 }
 0x1bd   : > { %1176 = vst [vmem:[%s1858_s7 + $0xe0] sm:$0xff] %v1114_v11 }
 0x1be   : > { %v1146_v34 = vpop.trf.xlu1 }
 0x1bf   : > { %1177 = vst [vmem:[%s1858_s7 + $0xe8] sm:$0xff] %v1146_v34 }
 0x1c0   : > { %v1115_v12 = vpop.trf.xlu0 }
 0x1c1   : > { %1178 = vst [vmem:[%s1858_s7 + $0xf0] sm:$0xff] %v1115_v12 }
 0x1c2   : > { %v1147_v15 = vpop.trf.xlu1 }
 0x1c3   : > { %1179 = vst [vmem:[%s1858_s7 + $0xf8] sm:$0xff] %v1147_v15 }
 0x1c4 PF: > { %s13_s14 = sadd.s32 1, %s1620_s14   ;;  %s1905_s12 = smov %s1616_s13 }
 0x1c5   : > { %p10_p5 = scmp.ge.s32.totalorder %s13_s14, 4   ;;  %s1906_s13 = smov %s1908_s15 }
 0x1c7   :  { %12 = sbr.rel (!%p10_p5) target bundleno = 2 (0x2), region = 62 }

</bundles_post_ra>
